<compile_context>
chip_gen: v6e
topology: v6e:2x2x1
jax: 0.10.0
libtpu: 0.0.40
codegen_flags: <defaults>
</compile_context>

<pallas_src>
import functools

import jax
import jax.numpy as jnp
from jax.experimental import pallas as pl
from jax.experimental.pallas import tpu as pltpu


def _round_up(x, m):
    return (x + m - 1) // m * m


def _layer_norm(x, gamma, beta, eps=1e-5):
    # PyTorch nn.LayerNorm semantics: biased variance, eps inside sqrt.
    mu = jnp.mean(x, axis=-1, keepdims=True)
    var = jnp.mean((x - mu) ** 2, axis=-1, keepdims=True)
    return (x - mu) * jax.lax.rsqrt(var + eps) * gamma + beta


def _subsets_kernel(
    vert_feat_ref,   # (TB, A, G_F)    f32
    vert_mask_ref,   # (TB, A)         f32
    subsets_ref,     # (TB, S_pad, A)  bf16 {0,1}
    masses_ref,      # (TB, S_pad, NM) f32
    intens_ref,      # (TB, S_pad, NM) f32
    w1_ref,          # (G_F, D)
    w2_ref,          # (D, D)
    slab_ref,        # (8, DP) packed: ln0_g, ln0_b, b1, b2, ln1_g, ln1_b, ws, bs
    spect_ref,       # out (TB, SPECT)
    probs_ref,       # out (TB, S_pad)
    *, s_valid,
):
    TB, A, G_F = vert_feat_ref.shape
    S_pad = subsets_ref.shape[1]
    NM = masses_ref.shape[2]
    SPECT = spect_ref.shape[1]
    D = w2_ref.shape[0]

    feat = vert_feat_ref[...]                              # (TB, A, G_F)
    mask = vert_mask_ref[...]                              # (TB, A)
    subs = subsets_ref[...].astype(jnp.float32)            # (TB, S_pad, A)
    # Only the subsets need masking: mask is {0,1}, so masking feat too is redundant.
    subs_m = subs * mask[:, None, :]

    # per-batch (S_pad, A) @ (A, G_F) == einsum('ijk,ilj->ilk') of the PyTorch module
    ssum = jnp.einsum("bsa,baf->bsf", subs_m, feat,
                      preferred_element_type=jnp.float32)   # (TB, S_pad, G_F)
    size = jnp.sum(subs_m, axis=2, keepdims=True) + 1e-4    # (TB, S_pad, 1)
    mean = ssum / size

    # unpack the packed small-parameter slab
    ln0_g = slab_ref[0:1, 0:G_F]
    ln0_b = slab_ref[1:2, 0:G_F]
    b1 = slab_ref[2:3, 0:D]
    b2 = slab_ref[3:4, 0:D]
    ln1_g = slab_ref[4:5, 0:D]
    ln1_b = slab_ref[5:6, 0:D]
    ws = slab_ref[6:7, 0:D]
    bs = slab_ref[7:8, 0:1]

    # flatten batch-block x subsets so the MLP matmuls run with M = TB * S_pad
    x = mean.reshape(TB * S_pad, G_F)
    x = _layer_norm(x, ln0_g, ln0_b)                                   # subset_weighted_norm
    x = jnp.maximum(jnp.dot(x, w1_ref[...],
                            preferred_element_type=jnp.float32) + b1, 0.0)   # f_combine_l1
    x = jnp.maximum(jnp.dot(x, w2_ref[...],
                            preferred_element_type=jnp.float32) + b2, 0.0)   # f_combine_l2
    x = _layer_norm(x, ln1_g, ln1_b)                                   # norm_pre_score

    # score head on the VPU (N=1 matmul would waste the MXU): lane multiply + lane reduce
    x3 = x.reshape(TB, S_pad, D)
    scores = jnp.sum(x3 * ws, axis=-1) + bs                 # (TB, S_pad)

    if s_valid < S_pad:   # mask padded subset columns out of the softmax (static branch)
        col = jax.lax.broadcasted_iota(jnp.int32, (TB, S_pad), 1)
        scores = jnp.where(col < s_valid, scores, -1e30)

    # softmax over the SUBSET_SAMPLES_N axis (prob_softmax=True)
    m = jnp.max(scores, axis=-1, keepdims=True)
    e = jnp.exp(scores - m)
    probs = e / jnp.sum(e, axis=-1, keepdims=True)          # (TB, S_pad), lane-dense
    probs_ref[...] = probs

    # Dense equivalent of create_mass_matrix_sparse + sparse mm, no MXU involved:
    #   spect[b, bin] = sum_{s,i} intensity[b,s,i] * probs[b,s] * [round(mass[b,s,i]) == bin]
    # The static NM loop keeps full (S_pad sublane x SPECT lane) vreg utilization; total
    # element work is identical to a single fused (S_pad*NM, SPECT) pass.
    weighted = probs[:, :, None] * intens_ref[...]          # (TB, S_pad, NM)
    bins = jnp.round(masses_ref[...]).astype(jnp.int32)     # (TB, S_pad, NM)
    bin_iota = jax.lax.broadcasted_iota(jnp.int32, (TB, S_pad, SPECT), 2)

    spect = jnp.zeros((TB, SPECT), jnp.float32)
    for i in range(NM):                                     # NM is small and static
        contrib = jnp.where(bin_iota == bins[:, :, i][:, :, None],
                            weighted[:, :, i][:, :, None], 0.0)   # (TB, S_pad, SPECT)
        spect = spect + jnp.sum(contrib, axis=1)                  # sublane reduce
    spect_ref[...] = spect


def init_params(key, g_feat_in, internal_d):
    """Deterministic parameter init mirroring the module's __init__ shapes."""
    ks = jax.random.split(key, 6)

    def linear(k, fan_in, fan_out):
        bound = 1.0 / jnp.sqrt(fan_in)
        kw, kb = jax.random.split(k)
        w = jax.random.uniform(kw, (fan_in, fan_out), jnp.float32, -bound, bound)
        b = jax.random.uniform(kb, (1, fan_out), jnp.float32, -bound, bound)
        return w, b

    w1, b1 = linear(ks[0], g_feat_in, internal_d)       # f_combine_l1
    w2, b2 = linear(ks[1], internal_d, internal_d)      # f_combine_l2 (linear_layer_n=1)
    ws, bs = linear(ks[2], internal_d, 1)               # f_combine_score
    return dict(
        ln0_g=jnp.ones((1, g_feat_in), jnp.float32),
        ln0_b=jnp.zeros((1, g_feat_in), jnp.float32),
        w1=w1, b1=b1, w2=w2, b2=b2,
        ln1_g=jnp.ones((1, internal_d), jnp.float32),
        ln1_b=jnp.zeros((1, internal_d), jnp.float32),
        ws=ws, bs=bs,
    )


@functools.partial(jax.jit, static_argnames=("spect_bin_n",))
def subsets_sample_weighted(vert_feat, vert_mask, vert_element_oh, adj_oh,
                            atom_subsets, atom_subsets_peaks, params,
                            spect_bin_n=128):
    # vert_element_oh / adj_oh feed only the (unimplemented) formula/GRU path.
    del vert_element_oh, adj_oh

    if vert_feat.ndim == 4:   # module reshapes (B, A, G_F, HW) -> (B, A, G_F*HW)
        b_, a_, gf_, hw_ = vert_feat.shape
        vert_feat = vert_feat.reshape(b_, a_, gf_ * hw_)
    vert_feat = vert_feat.astype(jnp.float32)
    vert_mask = vert_mask.astype(jnp.float32)

    B, A, G_F = vert_feat.shape
    _, S, _ = atom_subsets.shape
    NM = atom_subsets_peaks.shape[2]
    D = params["w1"].shape[1]

    # --- batch / subset tiling ----------------------------------------------
    if B <= 8:
        TB, B_pad = B, B          # single block covers the whole batch
    else:
        TB, B_pad = 8, _round_up(B, 8)
    S_pad = _round_up(S, 128)     # lane-dense probs output + fat matmul M dim

    def pad_to(x, dim, new):
        if new == x.shape[dim]:
            return x
        pad = [(0, 0)] * x.ndim
        pad[dim] = (0, new - x.shape[dim])
        return jnp.pad(x, pad)

    masses = atom_subsets_peaks[..., 0].astype(jnp.float32)    # (B, S, NM)
    intens = atom_subsets_peaks[..., 1].astype(jnp.float32)    # (B, S, NM)
    subsets_bf = atom_subsets.astype(jnp.bfloat16)             # exact for {0,1}; halves DMA

    vert_feat = pad_to(vert_feat, 0, B_pad)
    vert_mask = pad_to(vert_mask, 0, B_pad)
    subsets_bf = pad_to(pad_to(subsets_bf, 1, S_pad), 0, B_pad)
    masses = pad_to(pad_to(masses, 1, S_pad), 0, B_pad)
    intens = pad_to(pad_to(intens, 1, S_pad), 0, B_pad)

    # --- pack all small per-feature params into a single (8, DP) slab --------
    DP = _round_up(max(G_F, D), 128)
    slab = jnp.zeros((8, DP), jnp.float32)
    slab = slab.at[0, :G_F].set(params["ln0_g"].reshape(-1))
    slab = slab.at[1, :G_F].set(params["ln0_b"].reshape(-1))
    slab = slab.at[2, :D].set(params["b1"].reshape(-1))
    slab = slab.at[3, :D].set(params["b2"].reshape(-1))
    slab = slab.at[4, :D].set(params["ln1_g"].reshape(-1))
    slab = slab.at[5, :D].set(params["ln1_b"].reshape(-1))
    slab = slab.at[6, :D].set(params["ws"].reshape(-1))
    slab = slab.at[7, 0].set(params["bs"].reshape(-1)[0])

    nb = B_pad // TB
    b3 = lambda i: (i, 0, 0)
    b2 = lambda i: (i, 0)
    c2 = lambda i: (0, 0)

    in_specs = [
        pl.BlockSpec((TB, A, G_F), b3),       # vert_feat
        pl.BlockSpec((TB, A), b2),            # vert_mask
        pl.BlockSpec((TB, S_pad, A), b3),     # atom_subsets (bf16)
        pl.BlockSpec((TB, S_pad, NM), b3),    # masses
        pl.BlockSpec((TB, S_pad, NM), b3),    # intensities
        pl.BlockSpec((G_F, D), c2),           # w1
        pl.BlockSpec((D, D), c2),             # w2
        pl.BlockSpec((8, DP), c2),            # packed small params
    ]
    out_specs = (
        pl.BlockSpec((TB, spect_bin_n), b2),  # spect_out
        pl.BlockSpec((TB, S_pad), b2),        # formulae_probs (lane-dense)
    )

    kernel = functools.partial(_subsets_kernel, s_valid=S)

    spect_out, formulae_probs = pl.pallas_call(
        kernel,
        out_shape=(
            jax.ShapeDtypeStruct((B_pad, spect_bin_n), jnp.float32),
            jax.ShapeDtypeStruct((B_pad, S_pad), jnp.float32),
        ),
        grid_spec=pltpu.PrefetchScalarGridSpec(
            num_scalar_prefetch=0,
            grid=(nb,),
            in_specs=in_specs,
            out_specs=out_specs,
        ),
        compiler_params=pltpu.CompilerParams(
            dimension_semantics=("parallel",),          # batch axis -> v7x dual-TC split
            vmem_limit_bytes=32 * 1024 * 1024,          # explicit ceiling, safe on v5e/v6e/v7x
        ),
    )(vert_feat, vert_mask, subsets_bf, masses, intens,
      params["w1"], params["w2"], slab)

    return {
        "spect_out": spect_out[:B],
        "formulae_probs": formulae_probs[:B, :S],
    }


def _reference_jax(vert_feat, vert_mask, atom_subsets, peaks, params, spect_bin_n):
    """Pure-JAX reference mirroring the PyTorch forward (for verification)."""
    def ln(x, g, b, eps=1e-5):
        mu = x.mean(-1, keepdims=True)
        var = ((x - mu) ** 2).mean(-1, keepdims=True)
        return (x - mu) / jnp.sqrt(var + eps) * g + b

    masked_feat = vert_feat * vert_mask[:, :, None]
    subs_m = atom_subsets.astype(jnp.float32) * vert_mask[:, None, :]
    ssum = jnp.einsum("ijk,ilj->ilk", masked_feat, subs_m)
    size = subs_m.sum(2) + 1e-4
    mean = ssum / size[:, :, None]
    x = ln(mean, params["ln0_g"][0], params["ln0_b"][0])
    x = jax.nn.relu(x @ params["w1"] + params["b1"][0])
    x = jax.nn.relu(x @ params["w2"] + params["b2"][0])
    x = ln(x, params["ln1_g"][0], params["ln1_b"][0])
    scores = (x @ params["ws"] + params["bs"][0])[..., 0]
    probs = jax.nn.softmax(scores, axis=-1)

    masses = peaks[..., 0]
    intens = peaks[..., 1]
    bins = jnp.round(masses).astype(jnp.int32)
    onehot = (bins[..., None] == jnp.arange(spect_bin_n)).astype(jnp.float32)
    spect = jnp.einsum("bs,bsn,bsnk->bk", probs, intens, onehot)
    return spect, probs


if __name__ == "__main__":
    B, A = 2, 8                   # BATCH_N, ATOM_N
    G_F_BASE, HW = 8, 4           # module flattens (B, A, G_F, HW) -> (B, A, G_F*HW)
    G_F = G_F_BASE * HW           # 32
    S, NM = 16, 2                 # SUBSET_SAMPLES_N, NUM_MASSES
    D = 64                        # internal_d
    SPECT = 128                   # spect_bin_n

    key = jax.random.PRNGKey(0)
    k_feat, k_mask, k_sub, k_mass, k_int, k_par, k_el, k_adj = jax.random.split(key, 8)

    vert_feat4 = jax.random.normal(k_feat, (B, A, G_F_BASE, HW), jnp.float32)
    vert_mask = (jax.random.uniform(k_mask, (B, A)) > 0.2).astype(jnp.float32)
    atom_subsets = (jax.random.uniform(k_sub, (B, S, A)) > 0.5).astype(jnp.float32)
    masses = jax.random.randint(k_mass, (B, S, NM), 5, SPECT - 5).astype(jnp.float32)
    intensities = jax.random.uniform(k_int, (B, S, NM), jnp.float32)
    atom_subsets_peaks = jnp.stack([masses, intensities], axis=-1)      # (B, S, NM, 2)
    vert_element_oh = jax.random.normal(k_el, (B, A, 8), jnp.float32)   # unused by this path
    adj_oh = jax.random.normal(k_adj, (B, 4, A, A), jnp.float32)        # unused by this path

    params = init_params(k_par, G_F, D)

    out = subsets_sample_weighted(vert_feat4, vert_mask, vert_element_oh, adj_oh,
                                  atom_subsets, atom_subsets_peaks, params,
                                  spect_bin_n=SPECT)
    jax.block_until_ready(out)

    vert_feat3 = vert_feat4.reshape(B, A, G_F)
    ref_spect, ref_probs = _reference_jax(vert_feat3, vert_mask, atom_subsets,
                                          atom_subsets_peaks, params, SPECT)
    assert jnp.allclose(out["formulae_probs"], ref_probs, atol=1e-5, rtol=1e-4)
    assert jnp.allclose(out["spect_out"], ref_spect, atol=1e-5, rtol=1e-4)

    print("KERNEL_OK")
</pallas_src>

<mosaic_0001>
module attributes {stable_mosaic.version = 11 : i64} {
  func.func @_subsets_kernel(%arg0: i32, %arg1: memref<2x8x32xf32, #tpu.memory_space<vmem>>, %arg2: memref<2x8xf32, #tpu.memory_space<vmem>>, %arg3: memref<2x128x8xbf16, #tpu.memory_space<vmem>>, %arg4: memref<2x128x2xf32, #tpu.memory_space<vmem>>, %arg5: memref<2x128x2xf32, #tpu.memory_space<vmem>>, %arg6: memref<32x64xf32, #tpu.memory_space<vmem>>, %arg7: memref<64x64xf32, #tpu.memory_space<vmem>>, %arg8: memref<8x128xf32, #tpu.memory_space<vmem>>, %arg9: memref<2x128xf32, #tpu.memory_space<vmem>>, %arg10: memref<2x128xf32, #tpu.memory_space<vmem>>) attributes {dimension_semantics = [#tpu.dimension_semantics<parallel>], iteration_bounds = array<i64: 1>, scalar_prefetch = 0 : i64, scratch_operands = 0 : i64, tpu.core_type = #tpu.core_type<tc>, window_params = [{transform_indices = @transform_0, window_bounds = array<i64: 2, 8, 32>}, {transform_indices = @transform_1, window_bounds = array<i64: 2, 8>}, {transform_indices = @transform_2, window_bounds = array<i64: 2, 128, 8>}, {transform_indices = @transform_3, window_bounds = array<i64: 2, 128, 2>}, {transform_indices = @transform_4, window_bounds = array<i64: 2, 128, 2>}, {pipeline_mode = #tpu.pipeline_mode<synchronous>, transform_indices = @transform_5, window_bounds = array<i64: 32, 64>}, {pipeline_mode = #tpu.pipeline_mode<synchronous>, transform_indices = @transform_6, window_bounds = array<i64: 64, 64>}, {pipeline_mode = #tpu.pipeline_mode<synchronous>, transform_indices = @transform_7, window_bounds = array<i64: 8, 128>}, {transform_indices = @transform_8, window_bounds = array<i64: 2, 128>}, {transform_indices = @transform_9, window_bounds = array<i64: 2, 128>}]} {
    %c0 = arith.constant 0 : index
    %c0_0 = arith.constant 0 : index
    %c0_1 = arith.constant 0 : index
    %0 = vector.load %arg1[%c0, %c0_0, %c0_1] : memref<2x8x32xf32, #tpu.memory_space<vmem>>, vector<2x8x32xf32>
    %c0_2 = arith.constant 0 : index
    %c0_3 = arith.constant 0 : index
    %1 = vector.load %arg2[%c0_2, %c0_3] : memref<2x8xf32, #tpu.memory_space<vmem>>, vector<2x8xf32>
    %c0_4 = arith.constant 0 : index
    %c0_5 = arith.constant 0 : index
    %c0_6 = arith.constant 0 : index
    %2 = vector.load %arg3[%c0_4, %c0_5, %c0_6] : memref<2x128x8xbf16, #tpu.memory_space<vmem>>, vector<2x128x8xbf16>
    %3 = arith.extf %2 : vector<2x128x8xbf16> to vector<2x128x8xf32>
    %4 = vector.shape_cast %1 : vector<2x8xf32> to vector<2x1x8xf32>
    %5 = vector.broadcast %4 : vector<2x1x8xf32> to vector<2x128x8xf32>
    %6 = arith.mulf %3, %5 : vector<2x128x8xf32>
    "tpu.trace_start"() <{level = 10 : i32, message = "bsa,baf->bsf"}> : () -> ()
    %cst = arith.constant dense<0.000000e+00> : vector<2x128x32xf32>
    %7 = tpu.matmul %6, %0, %cst {dimension_numbers = #tpu.dot_dimension_numbers<[2], [1], [1], [2], [0, 0, 0, 1, 1, 2], [0], [0]>} : vector<2x128x8xf32>, vector<2x8x32xf32>, vector<2x128x32xf32> -> vector<2x128x32xf32>
    "tpu.trace_stop"() : () -> ()
    %cst_7 = arith.constant dense<0.000000e+00> : vector<2x128xf32>
    %8 = vector.multi_reduction <add>, %6, %cst_7 [2] : vector<2x128x8xf32> to vector<2x128xf32>
    %9 = vector.shape_cast %8 : vector<2x128xf32> to vector<2x128x1xf32>
    %cst_8 = arith.constant 9.99999974E-5 : f32
    %10 = vector.broadcast %cst_8 : f32 to vector<2x128x1xf32>
    %11 = arith.addf %9, %10 : vector<2x128x1xf32>
    %12 = vector.broadcast %11 : vector<2x128x1xf32> to vector<2x128x32xf32>
    %13 = arith.divf %7, %12 : vector<2x128x32xf32>
    %c0_9 = arith.constant 0 : index
    %c0_10 = arith.constant 0 : index
    %14 = vector.load %arg8[%c0_9, %c0_10] : memref<8x128xf32, #tpu.memory_space<vmem>>, vector<1x32xf32>
    %c1 = arith.constant 1 : index
    %c0_11 = arith.constant 0 : index
    %15 = vector.load %arg8[%c1, %c0_11] : memref<8x128xf32, #tpu.memory_space<vmem>>, vector<1x32xf32>
    %c2 = arith.constant 2 : index
    %c0_12 = arith.constant 0 : index
    %16 = vector.load %arg8[%c2, %c0_12] : memref<8x128xf32, #tpu.memory_space<vmem>>, vector<1x64xf32>
    %c3 = arith.constant 3 : index
    %c0_13 = arith.constant 0 : index
    %17 = vector.load %arg8[%c3, %c0_13] : memref<8x128xf32, #tpu.memory_space<vmem>>, vector<1x64xf32>
    %c4 = arith.constant 4 : index
    %c0_14 = arith.constant 0 : index
    %18 = vector.load %arg8[%c4, %c0_14] : memref<8x128xf32, #tpu.memory_space<vmem>>, vector<1x64xf32>
    %c5 = arith.constant 5 : index
    %c0_15 = arith.constant 0 : index
    %19 = vector.load %arg8[%c5, %c0_15] : memref<8x128xf32, #tpu.memory_space<vmem>>, vector<1x64xf32>
    %c6 = arith.constant 6 : index
    %c0_16 = arith.constant 0 : index
    %20 = vector.load %arg8[%c6, %c0_16] : memref<8x128xf32, #tpu.memory_space<vmem>>, vector<1x64xf32>
    %c7 = arith.constant 7 : index
    %c0_17 = arith.constant 0 : index
    %21 = vector.load %arg8[%c7, %c0_17] : memref<8x128xf32, #tpu.memory_space<vmem>>, vector<1x1xf32>
    %22 = vector.shape_cast %13 : vector<2x128x32xf32> to vector<256x32xf32>
    %cst_18 = arith.constant dense<0.000000e+00> : vector<256xf32>
    %23 = vector.multi_reduction <add>, %22, %cst_18 [1] : vector<256x32xf32> to vector<256xf32>
    %24 = vector.shape_cast %23 : vector<256xf32> to vector<256x1xf32>
    %cst_19 = arith.constant 3.200000e+01 : f32
    %25 = vector.broadcast %cst_19 : f32 to vector<256x1xf32>
    %26 = arith.divf %24, %25 : vector<256x1xf32>
    %27 = vector.broadcast %26 : vector<256x1xf32> to vector<256x32xf32>
    %28 = arith.subf %22, %27 : vector<256x32xf32>
    %29 = arith.mulf %28, %28 : vector<256x32xf32>
    %cst_20 = arith.constant dense<0.000000e+00> : vector<256xf32>
    %30 = vector.multi_reduction <add>, %29, %cst_20 [1] : vector<256x32xf32> to vector<256xf32>
    %31 = vector.shape_cast %30 : vector<256xf32> to vector<256x1xf32>
    %cst_21 = arith.constant 3.200000e+01 : f32
    %32 = vector.broadcast %cst_21 : f32 to vector<256x1xf32>
    %33 = arith.divf %31, %32 : vector<256x1xf32>
    %34 = vector.broadcast %26 : vector<256x1xf32> to vector<256x32xf32>
    %35 = arith.subf %22, %34 : vector<256x32xf32>
    %cst_22 = arith.constant 9.99999974E-6 : f32
    %36 = vector.broadcast %cst_22 : f32 to vector<256x1xf32>
    %37 = arith.addf %33, %36 : vector<256x1xf32>
    %38 = math.rsqrt %37 : vector<256x1xf32>
    %39 = vector.broadcast %38 : vector<256x1xf32> to vector<256x32xf32>
    %40 = arith.mulf %35, %39 : vector<256x32xf32>
    %41 = vector.broadcast %14 : vector<1x32xf32> to vector<256x32xf32>
    %42 = arith.mulf %40, %41 : vector<256x32xf32>
    %43 = vector.broadcast %15 : vector<1x32xf32> to vector<256x32xf32>
    %44 = arith.addf %42, %43 : vector<256x32xf32>
    %c0_23 = arith.constant 0 : index
    %c0_24 = arith.constant 0 : index
    %45 = vector.load %arg6[%c0_23, %c0_24] : memref<32x64xf32, #tpu.memory_space<vmem>>, vector<32x64xf32>
    %cst_25 = arith.constant dense<0.000000e+00> : vector<256x64xf32>
    %46 = tpu.matmul %44, %45, %cst_25 {dimension_numbers = #tpu.dot_dimension_numbers<[1], [0], [0], [1], [0, 0, 1, 1], [], []>} : vector<256x32xf32>, vector<32x64xf32>, vector<256x64xf32> -> vector<256x64xf32>
    %47 = vector.broadcast %16 : vector<1x64xf32> to vector<256x64xf32>
    %48 = arith.addf %46, %47 : vector<256x64xf32>
    %cst_26 = arith.constant 0.000000e+00 : f32
    %49 = vector.broadcast %cst_26 : f32 to vector<256x64xf32>
    %50 = arith.maximumf %48, %49 : vector<256x64xf32>
    %c0_27 = arith.constant 0 : index
    %c0_28 = arith.constant 0 : index
    %51 = vector.load %arg7[%c0_27, %c0_28] : memref<64x64xf32, #tpu.memory_space<vmem>>, vector<64x64xf32>
    %cst_29 = arith.constant dense<0.000000e+00> : vector<256x64xf32>
    %52 = tpu.matmul %50, %51, %cst_29 {dimension_numbers = #tpu.dot_dimension_numbers<[1], [0], [0], [1], [0, 0, 1, 1], [], []>} : vector<256x64xf32>, vector<64x64xf32>, vector<256x64xf32> -> vector<256x64xf32>
    %53 = vector.broadcast %17 : vector<1x64xf32> to vector<256x64xf32>
    %54 = arith.addf %52, %53 : vector<256x64xf32>
    %cst_30 = arith.constant 0.000000e+00 : f32
    %55 = vector.broadcast %cst_30 : f32 to vector<256x64xf32>
    %56 = arith.maximumf %54, %55 : vector<256x64xf32>
    %cst_31 = arith.constant dense<0.000000e+00> : vector<256xf32>
    %57 = vector.multi_reduction <add>, %56, %cst_31 [1] : vector<256x64xf32> to vector<256xf32>
    %58 = vector.shape_cast %57 : vector<256xf32> to vector<256x1xf32>
    %cst_32 = arith.constant 6.400000e+01 : f32
    %59 = vector.broadcast %cst_32 : f32 to vector<256x1xf32>
    %60 = arith.divf %58, %59 : vector<256x1xf32>
    %61 = vector.broadcast %60 : vector<256x1xf32> to vector<256x64xf32>
    %62 = arith.subf %56, %61 : vector<256x64xf32>
    %63 = arith.mulf %62, %62 : vector<256x64xf32>
    %cst_33 = arith.constant dense<0.000000e+00> : vector<256xf32>
    %64 = vector.multi_reduction <add>, %63, %cst_33 [1] : vector<256x64xf32> to vector<256xf32>
    %65 = vector.shape_cast %64 : vector<256xf32> to vector<256x1xf32>
    %cst_34 = arith.constant 6.400000e+01 : f32
    %66 = vector.broadcast %cst_34 : f32 to vector<256x1xf32>
    %67 = arith.divf %65, %66 : vector<256x1xf32>
    %68 = vector.broadcast %60 : vector<256x1xf32> to vector<256x64xf32>
    %69 = arith.subf %56, %68 : vector<256x64xf32>
    %cst_35 = arith.constant 9.99999974E-6 : f32
    %70 = vector.broadcast %cst_35 : f32 to vector<256x1xf32>
    %71 = arith.addf %67, %70 : vector<256x1xf32>
    %72 = math.rsqrt %71 : vector<256x1xf32>
    %73 = vector.broadcast %72 : vector<256x1xf32> to vector<256x64xf32>
    %74 = arith.mulf %69, %73 : vector<256x64xf32>
    %75 = vector.broadcast %18 : vector<1x64xf32> to vector<256x64xf32>
    %76 = arith.mulf %74, %75 : vector<256x64xf32>
    %77 = vector.broadcast %19 : vector<1x64xf32> to vector<256x64xf32>
    %78 = arith.addf %76, %77 : vector<256x64xf32>
    %79 = vector.shape_cast %78 : vector<256x64xf32> to vector<2x128x64xf32>
    %80 = vector.shape_cast %20 : vector<1x64xf32> to vector<1x1x64xf32>
    %81 = vector.broadcast %80 : vector<1x1x64xf32> to vector<2x128x64xf32>
    %82 = arith.mulf %79, %81 : vector<2x128x64xf32>
    %cst_36 = arith.constant dense<0.000000e+00> : vector<2x128xf32>
    %83 = vector.multi_reduction <add>, %82, %cst_36 [2] : vector<2x128x64xf32> to vector<2x128xf32>
    %84 = vector.broadcast %21 : vector<1x1xf32> to vector<2x128xf32>
    %85 = arith.addf %83, %84 : vector<2x128xf32>
    %86 = tpu.iota {dimensions = array<i32: 1>} : vector<2x128xi32>
    %c16_i32 = arith.constant 16 : i32
    %87 = vector.broadcast %c16_i32 : i32 to vector<2x128xi32>
    %88 = arith.cmpi slt, %86, %87 : vector<2x128xi32>
    %cst_37 = arith.constant -1.000000e+30 : f32
    %89 = vector.broadcast %cst_37 : f32 to vector<2x128xf32>
    %90 = arith.select %88, %85, %89 : vector<2x128xi1>, vector<2x128xf32>
    %cst_38 = arith.constant dense<0xFF800000> : vector<2xf32>
    %91 = vector.multi_reduction <maximumf>, %90, %cst_38 [1] : vector<2x128xf32> to vector<2xf32>
    %92 = vector.shape_cast %91 : vector<2xf32> to vector<2x1xf32>
    %93 = vector.broadcast %92 : vector<2x1xf32> to vector<2x128xf32>
    %94 = arith.subf %90, %93 : vector<2x128xf32>
    %95 = math.exp %94 : vector<2x128xf32>
    %cst_39 = arith.constant dense<0.000000e+00> : vector<2xf32>
    %96 = vector.multi_reduction <add>, %95, %cst_39 [1] : vector<2x128xf32> to vector<2xf32>
    %97 = vector.shape_cast %96 : vector<2xf32> to vector<2x1xf32>
    %98 = vector.broadcast %97 : vector<2x1xf32> to vector<2x128xf32>
    %99 = arith.divf %95, %98 : vector<2x128xf32>
    %c0_40 = arith.constant 0 : index
    %c0_41 = arith.constant 0 : index
    %100 = vector.load %arg10[%c0_40, %c0_41] : memref<2x128xf32, #tpu.memory_space<vmem>>, vector<2x128xf32>
    tpu.vector_store %arg10[%c0_40, %c0_41], %99 {strides = array<i32>} : memref<2x128xf32, #tpu.memory_space<vmem>>, vector<2x128xf32>,
    %101 = vector.shape_cast %99 : vector<2x128xf32> to vector<2x128x1xf32>
    %c0_42 = arith.constant 0 : index
    %c0_43 = arith.constant 0 : index
    %c0_44 = arith.constant 0 : index
    %102 = vector.load %arg5[%c0_42, %c0_43, %c0_44] : memref<2x128x2xf32, #tpu.memory_space<vmem>>, vector<2x128x2xf32>
    %103 = vector.broadcast %101 : vector<2x128x1xf32> to vector<2x128x2xf32>
    %104 = arith.mulf %103, %102 : vector<2x128x2xf32>
    %c0_45 = arith.constant 0 : index
    %c0_46 = arith.constant 0 : index
    %c0_47 = arith.constant 0 : index
    %105 = vector.load %arg4[%c0_45, %c0_46, %c0_47] : memref<2x128x2xf32, #tpu.memory_space<vmem>>, vector<2x128x2xf32>
    %106 = math.roundeven %105 : vector<2x128x2xf32>
    %107 = arith.fptosi %106 : vector<2x128x2xf32> to vector<2x128x2xi32>
    %108 = tpu.iota {dimensions = array<i32: 2>} : vector<2x128x128xi32>
    %cst_48 = arith.constant 0.000000e+00 : f32
    %109 = vector.broadcast %cst_48 : f32 to vector<2x128xf32>
    %110 = vector.extract_strided_slice %107 {offsets = [0, 0, 0], sizes = [2, 128, 1], strides = [1, 1, 1]} : vector<2x128x2xi32> to vector<2x128x1xi32>
    %111 = vector.shape_cast %110 : vector<2x128x1xi32> to vector<2x128xi32>
    %112 = vector.shape_cast %111 : vector<2x128xi32> to vector<2x128x1xi32>
    %113 = vector.broadcast %112 : vector<2x128x1xi32> to vector<2x128x128xi32>
    %114 = arith.cmpi eq, %108, %113 : vector<2x128x128xi32>
    %115 = vector.extract_strided_slice %104 {offsets = [0, 0, 0], sizes = [2, 128, 1], strides = [1, 1, 1]} : vector<2x128x2xf32> to vector<2x128x1xf32>
    %116 = vector.shape_cast %115 : vector<2x128x1xf32> to vector<2x128xf32>
    %117 = vector.shape_cast %116 : vector<2x128xf32> to vector<2x128x1xf32>
    %cst_49 = arith.constant 0.000000e+00 : f32
    %118 = vector.shape_cast %117 : vector<2x128x1xf32> to vector<2x128x1xf32>
    %119 = vector.broadcast %118 : vector<2x128x1xf32> to vector<2x128x128xf32>
    %120 = vector.broadcast %cst_49 : f32 to vector<2x128x128xf32>
    %121 = arith.select %114, %119, %120 : vector<2x128x128xi1>, vector<2x128x128xf32>
    %cst_50 = arith.constant dense<0.000000e+00> : vector<2x128xf32>
    %122 = vector.multi_reduction <add>, %121, %cst_50 [1] : vector<2x128x128xf32> to vector<2x128xf32>
    %123 = arith.addf %109, %122 : vector<2x128xf32>
    %124 = vector.extract_strided_slice %107 {offsets = [0, 0, 1], sizes = [2, 128, 1], strides = [1, 1, 1]} : vector<2x128x2xi32> to vector<2x128x1xi32>
    %125 = vector.shape_cast %124 : vector<2x128x1xi32> to vector<2x128xi32>
    %126 = vector.shape_cast %125 : vector<2x128xi32> to vector<2x128x1xi32>
    %127 = vector.broadcast %126 : vector<2x128x1xi32> to vector<2x128x128xi32>
    %128 = arith.cmpi eq, %108, %127 : vector<2x128x128xi32>
    %129 = vector.extract_strided_slice %104 {offsets = [0, 0, 1], sizes = [2, 128, 1], strides = [1, 1, 1]} : vector<2x128x2xf32> to vector<2x128x1xf32>
    %130 = vector.shape_cast %129 : vector<2x128x1xf32> to vector<2x128xf32>
    %131 = vector.shape_cast %130 : vector<2x128xf32> to vector<2x128x1xf32>
    %cst_51 = arith.constant 0.000000e+00 : f32
    %132 = vector.shape_cast %131 : vector<2x128x1xf32> to vector<2x128x1xf32>
    %133 = vector.broadcast %132 : vector<2x128x1xf32> to vector<2x128x128xf32>
    %134 = vector.broadcast %cst_51 : f32 to vector<2x128x128xf32>
    %135 = arith.select %128, %133, %134 : vector<2x128x128xi1>, vector<2x128x128xf32>
    %cst_52 = arith.constant dense<0.000000e+00> : vector<2x128xf32>
    %136 = vector.multi_reduction <add>, %135, %cst_52 [1] : vector<2x128x128xf32> to vector<2x128xf32>
    %137 = arith.addf %123, %136 : vector<2x128xf32>
    %c0_53 = arith.constant 0 : index
    %c0_54 = arith.constant 0 : index
    %138 = vector.load %arg9[%c0_53, %c0_54] : memref<2x128xf32, #tpu.memory_space<vmem>>, vector<2x128xf32>
    tpu.vector_store %arg9[%c0_53, %c0_54], %137 {strides = array<i32>} : memref<2x128xf32, #tpu.memory_space<vmem>>, vector<2x128xf32>,
    return
  }
  func.func @transform_0(%arg0: i32) -> (i32, i32, i32) {
    %c0_i32 = arith.constant 0 : i32
    %c0_i32_0 = arith.constant 0 : i32
    %c0_i32_1 = arith.constant 0 : i32
    return %arg0, %c0_i32, %c0_i32_0 : i32, i32, i32
  }
  func.func @transform_1(%arg0: i32) -> (i32, i32) {
    %c0_i32 = arith.constant 0 : i32
    %c0_i32_0 = arith.constant 0 : i32
    return %arg0, %c0_i32 : i32, i32
  }
  func.func @transform_2(%arg0: i32) -> (i32, i32, i32) {
    %c0_i32 = arith.constant 0 : i32
    %c0_i32_0 = arith.constant 0 : i32
    %c0_i32_1 = arith.constant 0 : i32
    return %arg0, %c0_i32, %c0_i32_0 : i32, i32, i32
  }
  func.func @transform_3(%arg0: i32) -> (i32, i32, i32) {
    %c0_i32 = arith.constant 0 : i32
    %c0_i32_0 = arith.constant 0 : i32
    %c0_i32_1 = arith.constant 0 : i32
    return %arg0, %c0_i32, %c0_i32_0 : i32, i32, i32
  }
  func.func @transform_4(%arg0: i32) -> (i32, i32, i32) {
    %c0_i32 = arith.constant 0 : i32
    %c0_i32_0 = arith.constant 0 : i32
    %c0_i32_1 = arith.constant 0 : i32
    return %arg0, %c0_i32, %c0_i32_0 : i32, i32, i32
  }
  func.func @transform_5(%arg0: i32) -> (i32, i32) {
    %c0_i32 = arith.constant 0 : i32
    %c0_i32_0 = arith.constant 0 : i32
    %c0_i32_1 = arith.constant 0 : i32
    return %c0_i32, %c0_i32_0 : i32, i32
  }
  func.func @transform_6(%arg0: i32) -> (i32, i32) {
    %c0_i32 = arith.constant 0 : i32
    %c0_i32_0 = arith.constant 0 : i32
    %c0_i32_1 = arith.constant 0 : i32
    return %c0_i32, %c0_i32_0 : i32, i32
  }
  func.func @transform_7(%arg0: i32) -> (i32, i32) {
    %c0_i32 = arith.constant 0 : i32
    %c0_i32_0 = arith.constant 0 : i32
    %c0_i32_1 = arith.constant 0 : i32
    return %c0_i32, %c0_i32_0 : i32, i32
  }
  func.func @transform_8(%arg0: i32) -> (i32, i32) {
    %c0_i32 = arith.constant 0 : i32
    %c0_i32_0 = arith.constant 0 : i32
    return %arg0, %c0_i32 : i32, i32
  }
  func.func @transform_9(%arg0: i32) -> (i32, i32) {
    %c0_i32 = arith.constant 0 : i32
    %c0_i32_0 = arith.constant 0 : i32
    return %arg0, %c0_i32 : i32, i32
  }
}

</mosaic_0001>

<bundles_post_ra>
// kernel: subsets_sample_weighted.1
= control target key start
LH: loop header
LB: loop body
LE: loop exit
PB: predicated region body
PF: predicated region fallthrough
CT: control target
= control target key end

     0   :  { %15 = vsyncpa [#allocation3], 0  ;;  %v7086_v1 = vlaneseq  ;;  %v4672_v2 = vmov 1966171168   ;;  %s7076_s0 = inlined_call_operand.vmem [shape: f32[2,8,32], index: 0, kind: input, shape index: {}]   ;;  %s7077_s1 = inlined_call_operand.vmem [shape: f32[2,8], index: 1, kind: input, shape index: {}]   ;;  %s7078_s2 = inlined_call_operand.vmem [shape: bf16[2,128,8], index: 2, kind: input, shape index: {}]   ;;  %s7079_s3 = inlined_call_operand.vmem [shape: f32[2,128,2], index: 3, kind: input, shape index: {}]   ;;  %s7080_s4 = inlined_call_operand.vmem [shape: f32[2,128,2], index: 4, kind: input, shape index: {}]   ;;  %s7081_s5 = inlined_call_operand.vmem [shape: f32[32,64], index: 5, kind: input, shape index: {}]   ;;  %s7082_s6 = inlined_call_operand.vmem [shape: f32[64,64], index: 6, kind: input, shape index: {}]   ;;  %s7083_s7 = inlined_call_operand.vmem [shape: f32[8,128], index: 7, kind: input, shape index: {}]   ;;  %s7084_s8 = inlined_call_operand.hbm [shape: f32[2,128], index: 8, kind: output, shape index: {0}]   ;;  %s7085_s9 = inlined_call_operand.hbm [shape: f32[2,128], index: 9, kind: output, shape index: {1}]  }
   0x1   :  { %v33_v0 = vld [vmem:[%s7076_s0] sm:$0xff]  ;;  %v110_v3 = vunpack.c.l.s4 %v4672_v2  ;;  %v34_v5 = vld [vmem:[%s7076_s0 + $0x8] sm:$0xff] }
   0x2   :  { %4150 = vmatprep.subr.mxu0 %v33_v0  ;;  %v4731_v4 = vshrl.u32 %v7086_v1, 7  ;;  %4176 = vmatprep.subr.mxu1 %v34_v5  ;;  %v3857_v7 = vld.sshfl [vmem:[%s7077_s1] sm:$0x11 pattern:$0x75316420]  ;;  %v4025_v9 = vld [vmem:[%s7078_s2 + $0x8] sm:$0xff]  }
   0x3   :  { %4151 = vmatpush3.msra.mxu0 %v33_v0  ;;  %v111_v6 = vunpack.c.0.s8 %v110_v3  ;;  %v3962_v8 = vld [vmem:[%s7078_s2] sm:$0xff]   ;;  %4177 = vmatpush3.msra.mxu1 %v34_v5 }
   0x4   :  { %7159 = vst [vmem:[#allocation8_spill] sm:$0xff] %v4731_v4  ;;  %v4747_v11 = vsub.s32 0, %v4731_v4 }
   0x5   :  { %v114_v10 = vsub.s32 %v111_v6, %v4731_v4 }
   0x6   :  { %7160 = vst [vmem:[#allocation9_spill] sm:$0xff] %v4747_v11 }
   0x7   :  { %16 = vsyncpa [#allocation5], 0  ;;  %v108_v12 = vcombine.high %v3857_v7, %v3857_v7  ;;  %v3963_v13 = vunpack.c.l.bf16 %v3962_v8  ;;  %v3964_v14 = vunpack.c.h.bf16 %v3962_v8  ;;  %v115_v15 = vrot.slane %v3857_v7, %v114_v10  ;;  %v4026_v17 = vld [vmem:[%s7078_s2 + $0x10] sm:$0xff]   ;;  %v4032_v18 = vld [vmem:[%s7078_s2 + $0x40] sm:$0xff]  }
   0x8   :  { %v3967_v16 = vunpack.c.l.bf16 %v4025_v9  ;;  %v4033_v19 = vld [vmem:[%s7078_s2 + $0x48] sm:$0xff]   ;;  %vm165_vm0 = vcmask 64512   ;;  %v3968_v22 = vunpack.c.h.bf16 %v4025_v9  ;;  %v3971_v23 = vunpack.c.l.bf16 %v4026_v17  ;;  %v4027_v30 = vld [vmem:[%s7078_s2 + $0x18] sm:$0xff]   ;;  %v4034_v32 = vld [vmem:[%s7078_s2 + $0x50] sm:$0xff]  }
   0x9   :  { %v122_v20 = vrot.slane %v108_v12, %v114_v10  ;;  %v4759_v21 = vrot.slane %v115_v15, %v4747_v11  ;;  %v3995_v24 = vunpack.c.l.bf16 %v4032_v18  ;;  %v3996_v25 = vunpack.c.h.bf16 %v4032_v18  ;;  %v4028_v42 = vld [vmem:[%s7078_s2 + $0x20] sm:$0xff]   ;;  %v4035_v44 = vld [vmem:[%s7078_s2 + $0x58] sm:$0xff]   ;;  %v4029_v55 = vld [vmem:[%s7078_s2 + $0x28] sm:$0xff]  }
   0xa   :  { %v3999_v26 = vunpack.c.l.bf16 %v4033_v19  ;;  %v3972_v33 = vunpack.c.h.bf16 %v4026_v17  ;;  %v3975_v35 = vunpack.c.l.bf16 %v4027_v30  ;;  %v4000_v36 = vunpack.c.h.bf16 %v4033_v19  ;;  %v4036_v56 = vld [vmem:[%s7078_s2 + $0x60] sm:$0xff]   ;;  %v4030_v5 = vld [vmem:[%s7078_s2 + $0x30] sm:$0xff]   ;;  %v4037_v6 = vld [vmem:[%s7078_s2 + $0x68] sm:$0xff]  }
   0xb   :  { %v133_v27 = vmul.f32 %v3963_v13, %v4759_v21  ;;  %v134_v28 = vmul.f32 %v3964_v14, %v4759_v21  ;;  %v135_v29 = vmul.f32 %v3967_v16, %v4759_v21  ;;  %v4768_v31 = vrot.slane %v122_v20, %v4747_v11  ;;  %v4031_v18 = vld [vmem:[%s7078_s2 + $0x38] sm:$0xff]   ;;  %v4038_v19 = vld [vmem:[%s7078_s2 + $0x70] sm:$0xff]  }
   0xc   :  { %v136_v34 = vmul.f32 %v3968_v22, %v4759_v21  ;;  %v4003_v37 = vunpack.c.l.bf16 %v4034_v32  ;;  %v137_v38 = vmul.f32 %v3971_v23, %v4759_v21  ;;  %v3976_v45 = vunpack.c.h.bf16 %v4027_v30 }
   0xd   :  { %4152 = vmatprep.mubr.msk.f32.mxu0 %vm165_vm0, %v133_v27  ;;  %v4779_v39 = vmul.f32 %v3995_v24, %v4768_v31  ;;  %v4782_v40 = vmul.f32 %v3996_v25, %v4768_v31  ;;  %v4785_v41 = vmul.f32 %v3999_v26, %v4768_v31  ;;  %v552_v43 = vsel %vm165_vm0, %v133_v27, 0.0 }
   0xe   :  { %4153 = vmatmul.mubr.msk.f32.vlgmr.msra.gmra.mxu0 %vm165_vm0, %v134_v28  ;;  %553 = vadd.xlane.f32.xlu0 %v552_v43  ;;  %v558_v46 = vsel %vm165_vm0, %v135_v29, 0.0  ;;  %v138_v47 = vmul.f32 %v3972_v33, %v4759_v21  ;;  %v4802_v48 = vmul.f32 %v4000_v36, %v4768_v31  ;;  %v4004_v49 = vunpack.c.h.bf16 %v4034_v32  ;;  %v4039_v32 = vld [vmem:[%s7078_s2 + $0x78] sm:$0xff]  }
   0xf   :  { %4155 = vmatprep.mubr.msk.f32.mxu0 %vm165_vm0, %v135_v29  ;;  %4178 = vmatprep.mubr.msk.f32.mxu1 %vm165_vm0, %v4779_v39  ;;  %v555_v50 = vsel %vm165_vm0, %v134_v28, 0.0  ;;  %v139_v51 = vmul.f32 %v3975_v35, %v4759_v21  ;;  %v3979_v52 = vunpack.c.l.bf16 %v4028_v42  ;;  %v4810_v53 = vmul.f32 %v4003_v37, %v4768_v31 }
  0x10   :  { %4179 = vmatmul.mubr.msk.f32.vlgmr.msra.gmra.mxu1 %vm165_vm0, %v4782_v40  ;;  %v4007_v54 = vunpack.c.l.bf16 %v4035_v44  ;;  %559 = vadd.xlane.f32.xlu1 %v558_v46  ;;  %v3980_v57 = vunpack.c.h.bf16 %v4028_v42  ;;  %v561_v58 = vsel %vm165_vm0, %v136_v34, 0.0  ;;  %v140_v59 = vmul.f32 %v3976_v45, %v4759_v21 }
  0x11   :  { %4181 = vmatprep.mubr.msk.f32.mxu1 %vm165_vm0, %v4785_v41  ;;  %v4824_v60 = vmul.f32 %v4004_v49, %v4768_v31  ;;  %v4008_v61 = vunpack.c.h.bf16 %v4035_v44  ;;  %v564_v62 = vsel %vm165_vm0, %v137_v38, 0.0  ;;  %v141_v63 = vmul.f32 %v3979_v52, %v4759_v21 }
  0x12   :  { %4156 = vmatmul.mubr.msk.f32.gmra.mxu0 %vm165_vm0, %v136_v34  ;;  %556 = vadd.xlane.f32.xlu0 %v555_v50  ;;  %v3983_v0 = vunpack.c.l.bf16 %v4029_v55  ;;  %v4832_v2 = vmul.f32 %v4007_v54, %v4768_v31  ;;  %v4011_v3 = vunpack.c.l.bf16 %v4036_v56  ;;  %v3984_v7 = vunpack.c.h.bf16 %v4029_v55 }
  0x13   :  { %4158 = vmatprep.mubr.msk.f32.mxu0 %vm165_vm0, %v137_v38  ;;  %v567_v8 = vsel %vm165_vm0, %v138_v47, 0.0  ;;  %v142_v9 = vmul.f32 %v3980_v57, %v4759_v21  ;;  %v4846_v10 = vmul.f32 %v4008_v61, %v4768_v31  ;;  %v4012_v12 = vunpack.c.h.bf16 %v4036_v56 }
  0x14   :  { %4182 = vmatmul.mubr.msk.f32.gmra.mxu1 %vm165_vm0, %v4802_v48  ;;  %562 = vadd.xlane.f32.xlu1 %v561_v58  ;;  %v570_v13 = vsel %vm165_vm0, %v139_v51, 0.0  ;;  %v143_v14 = vmul.f32 %v3983_v0, %v4759_v21  ;;  %v3987_v15 = vunpack.c.l.bf16 %v4030_v5  ;;  %v4854_v16 = vmul.f32 %v4011_v3, %v4768_v31 }
  0x15   :  { %4184 = vmatprep.mubr.msk.f32.mxu1 %vm165_vm0, %v4810_v53  ;;  %v4015_v17 = vunpack.c.l.bf16 %v4037_v6  ;;  %v3988_v20 = vunpack.c.h.bf16 %v4030_v5  ;;  %v573_v22 = vsel %vm165_vm0, %v140_v59, 0.0  ;;  %v144_v23 = vmul.f32 %v3984_v7, %v4759_v21 }
  0x16   :  { %4159 = vmatmul.mubr.msk.f32.gmra.mxu0 %vm165_vm0, %v138_v47  ;;  %565 = vadd.xlane.f32.xlu0 %v564_v62  ;;  %v4868_v24 = vmul.f32 %v4012_v12, %v4768_v31  ;;  %v4016_v25 = vunpack.c.h.bf16 %v4037_v6  ;;  %v576_v26 = vsel %vm165_vm0, %v141_v63, 0.0  ;;  %v145_v27 = vmul.f32 %v3987_v15, %v4759_v21 }
  0x17   :  { %4161 = vmatprep.mubr.msk.f32.mxu0 %vm165_vm0, %v139_v51  ;;  %v3991_v28 = vunpack.c.l.bf16 %v4031_v18  ;;  %v159_v29 = vmul.f32 %v4015_v17, %v4768_v31  ;;  %v4019_v30 = vunpack.c.l.bf16 %v4038_v19  ;;  %v3992_v33 = vunpack.c.h.bf16 %v4031_v18 }
  0x18   :  { %4185 = vmatmul.mubr.msk.f32.gmra.mxu1 %vm165_vm0, %v4824_v60  ;;  %568 = vadd.xlane.f32.xlu1 %v567_v8  ;;  %v579_v34 = vsel %vm165_vm0, %v142_v9, 0.0  ;;  %v146_v35 = vmul.f32 %v3988_v20, %v4759_v21  ;;  %v160_v36 = vmul.f32 %v4016_v25, %v4768_v31  ;;  %v4020_v37 = vunpack.c.h.bf16 %v4038_v19 }
  0x19   :  { %4187 = vmatprep.mubr.msk.f32.mxu1 %vm165_vm0, %v4832_v2  ;;  %v582_v38 = vsel %vm165_vm0, %v143_v14, 0.0  ;;  %v147_v42 = vmul.f32 %v3991_v28, %v4759_v21  ;;  %v161_v43 = vmul.f32 %v4019_v30, %v4768_v31  ;;  %v4023_v44 = vunpack.c.l.bf16 %v4039_v32 }
  0x1a   :  { %4162 = vmatmul.mubr.msk.f32.gmra.mxu0 %vm165_vm0, %v140_v59  ;;  %571 = vadd.xlane.f32.xlu0 %v570_v13  ;;  %v585_v45 = vsel %vm165_vm0, %v144_v23, 0.0  ;;  %v148_v46 = vmul.f32 %v3992_v33, %v4759_v21  ;;  %v162_v47 = vmul.f32 %v4020_v37, %v4768_v31  ;;  %v4024_v49 = vunpack.c.h.bf16 %v4039_v32 }
  0x1b   :  { %4164 = vmatprep.mubr.msk.f32.mxu0 %vm165_vm0, %v141_v63  ;;  %v588_v50 = vsel %vm165_vm0, %v145_v27, 0.0  ;;  %v163_v51 = vmul.f32 %v4023_v44, %v4768_v31  ;;  %v591_v52 = vsel %vm165_vm0, %v146_v35, 0.0  ;;  %v594_v54 = vsel %vm165_vm0, %v147_v42, 0.0 }
  0x1c   :  { %4188 = vmatmul.mubr.msk.f32.gmra.mxu1 %vm165_vm0, %v4846_v10  ;;  %574 = vadd.xlane.f32.xlu1 %v573_v22  ;;  %v164_v21 = vmul.f32 %v4024_v49, %v4768_v31  ;;  %v597_v55 = vsel %vm165_vm0, %v148_v46, 0.0  ;;  %v600_v56 = vsel %vm165_vm0, %v4779_v39, 0.0  ;;  %v603_v57 = vsel %vm165_vm0, %v4782_v40, 0.0 }
  0x1d   :  { %4190 = vmatprep.mubr.msk.f32.mxu1 %vm165_vm0, %v4854_v16  ;;  %v606_v31 = vsel %vm165_vm0, %v4785_v41, 0.0  ;;  %v609_v58 = vsel %vm165_vm0, %v4802_v48, 0.0  ;;  %v612_v59 = vsel %vm165_vm0, %v4810_v53, 0.0  ;;  %v615_v39 = vsel %vm165_vm0, %v4824_v60, 0.0 }
  0x1e   :  { %4165 = vmatmul.mubr.msk.f32.gmra.mxu0 %vm165_vm0, %v142_v9  ;;  %577 = vadd.xlane.f32.xlu0 %v576_v26  ;;  %v618_v40 = vsel %vm165_vm0, %v4832_v2, 0.0  ;;  %v621_v41 = vsel %vm165_vm0, %v4846_v10, 0.0  ;;  %v624_v48 = vsel %vm165_vm0, %v4854_v16, 0.0  ;;  %v627_v53 = vsel %vm165_vm0, %v4868_v24, 0.0 }
  0x1f   :  { %4167 = vmatprep.mubr.msk.f32.mxu0 %vm165_vm0, %v143_v14  ;;  %v630_v61 = vsel %vm165_vm0, %v159_v29, 0.0  ;;  %v633_v60 = vsel %vm165_vm0, %v160_v36, 0.0  ;;  %v636_v62 = vsel %vm165_vm0, %v161_v43, 0.0  ;;  %v639_v63 = vsel %vm165_vm0, %v162_v47, 0.0 }
  0x20   :  { %4191 = vmatmul.mubr.msk.f32.gmra.mxu1 %vm165_vm0, %v4868_v24  ;;  %580 = vadd.xlane.f32.xlu1 %v579_v34  ;;  %v642_v0 = vsel %vm165_vm0, %v163_v51, 0.0  ;;  %v645_v2 = vsel %vm165_vm0, %v164_v21, 0.0  ;;  %vm752_vm1 = vcmask 261120   ;;  %vm1615_vm2 = vcmask 523264  }
  0x21   :  { %4193 = vmatprep.mubr.msk.f32.mxu1 %vm165_vm0, %v159_v29  ;;  %vm2670_vm3 = vcmask 130112   ;;  %vm2677_vm4 = vcmask 195712   ;;  %vm2684_vm5 = vcmask 261312   ;;  %vm2691_vm6 = vcmask 326912  }
  0x22   :  { %4168 = vmatmul.mubr.msk.f32.gmra.mxu0 %vm165_vm0, %v144_v23  ;;  %583 = vadd.xlane.f32.xlu0 %v582_v38  ;;  %vm2698_vm7 = vcmask 392512   ;;  %vm2705_vm8 = vcmask 458112   ;;  %vm2712_vm9 = vcmask 523712   ;;  %vm2719_vm10 = vcmask 589312  }
  0x23   :  { %4170 = vmatprep.mubr.msk.f32.mxu0 %vm165_vm0, %v145_v27  ;;  %vm2726_vm11 = vcmask 654912   ;;  %vm2733_vm12 = vcmask 720512   ;;  %vm2740_vm13 = vcmask 786112   ;;  %vm2747_vm14 = vcmask 851712  }
  0x24   :  { %4194 = vmatmul.mubr.msk.f32.gmra.mxu1 %vm165_vm0, %v160_v36  ;;  %586 = vadd.xlane.f32.xlu1 %v585_v45  ;;  %vm2754_vm15 = vcmask 917312  }
  0x25   :  { %4196 = vmatprep.mubr.msk.f32.mxu1 %vm165_vm0, %v161_v43 }
  0x26   :  { %4171 = vmatmul.mubr.msk.f32.gmra.mxu0 %vm165_vm0, %v146_v35  ;;  %589 = vadd.xlane.f32.xlu0 %v588_v50 }
  0x27   :  { %4173 = vmatprep.mubr.msk.f32.mxu0 %vm165_vm0, %v147_v42 }
  0x28   :  { %4197 = vmatmul.mubr.msk.f32.gmra.mxu1 %vm165_vm0, %v162_v47  ;;  %592 = vadd.xlane.f32.xlu1 %v591_v52 }
  0x29   :  { %4199 = vmatprep.mubr.msk.f32.mxu1 %vm165_vm0, %v163_v51 }
  0x2a   :  { %4174 = vmatmul.mubr.msk.f32.gmra.mxu0 %vm165_vm0, %v148_v46  ;;  %595 = vadd.xlane.f32.xlu0 %v594_v54 }
  0x2c   :  { %4200 = vmatmul.mubr.msk.f32.gmra.mxu1 %vm165_vm0, %v164_v21  ;;  %598 = vadd.xlane.f32.xlu1 %v597_v55  ;;  %vm2761_vm0 = vcmask 982912  }
  0x2e   :  { %601 = vadd.xlane.f32.xlu0 %v600_v56 }
  0x30   :  { %604 = vadd.xlane.f32.xlu1 %v603_v57 }
  0x32   :  { %607 = vadd.xlane.f32.xlu0 %v606_v31 }
  0x34   :  { %610 = vadd.xlane.f32.xlu1 %v609_v58 }
  0x36   :  { %613 = vadd.xlane.f32.xlu0 %v612_v59 }
  0x38   :  { %616 = vadd.xlane.f32.xlu1 %v615_v39 }
  0x3a   :  { %619 = vadd.xlane.f32.xlu0 %v618_v40 }
  0x3c   :  { %622 = vadd.xlane.f32.xlu1 %v621_v41 }
  0x3e   :  { %625 = vadd.xlane.f32.xlu0 %v624_v48 }
  0x40   :  { %628 = vadd.xlane.f32.xlu1 %v627_v53 }
  0x42   :  { %631 = vadd.xlane.f32.xlu0 %v630_v61 }
  0x44   :  { %634 = vadd.xlane.f32.xlu1 %v633_v60 }
  0x46   :  { %637 = vadd.xlane.f32.xlu0 %v636_v62 }
  0x48   :  { %640 = vadd.xlane.f32.xlu1 %v639_v63 }
  0x4a   :  { %643 = vadd.xlane.f32.xlu0 %v642_v0 }
  0x4c   :  { %646 = vadd.xlane.f32.xlu1 %v645_v2 }
  0x97   :  { %v554_v3 = vpop.xlane.xlu0 %553 }
  0x98   :  { %v648_v20 = vadd.f32 0.0001, %v554_v3 }
  0x99   :  { %v560_v5 = vpop.xlane.xlu1 %559 }
  0x9a   :  { %v650_v24 = vadd.f32 0.0001, %v560_v5 }
  0x9b   :  { %v557_v6 = vpop.xlane.xlu0 %556 }
  0x9c   :  { %v649_v18 = vadd.f32 0.0001, %v557_v6 }
  0x9d   :  { %v563_v7 = vpop.xlane.xlu1 %562 }
  0x9e   :  { %4432 = vrcp.f32 %v649_v18  ;;  %v651_v22 = vadd.f32 0.0001, %v563_v7 }
  0x9f   :  { %v566_v9 = vpop.xlane.xlu0 %565  ;;  %4434 = vrcp.f32 %v648_v20 }
  0xa0   :  { %4436 = vrcp.f32 %v651_v22  ;;  %v652_v27 = vadd.f32 0.0001, %v566_v9 }
  0xa1   :  { %v569_v8 = vpop.xlane.xlu1 %568  ;;  %4438 = vrcp.f32 %v650_v24 }
  0xa2   :  { %v653_v25 = vadd.f32 0.0001, %v569_v8 }
  0xa3   :  { %v572_v12 = vpop.xlane.xlu0 %571 }
  0xa4   :  { %4440 = vrcp.f32 %v653_v25  ;;  %v654_v30 = vadd.f32 0.0001, %v572_v12 }
  0xa5   :  { %v575_v10 = vpop.xlane.xlu1 %574  ;;  %4442 = vrcp.f32 %v652_v27 }
  0xa6   :  { %v655_v29 = vadd.f32 0.0001, %v575_v10 }
  0xa7   :  { %v578_v14 = vpop.xlane.xlu0 %577 }
  0xa8   :  { %4444 = vrcp.f32 %v655_v29  ;;  %v656_v36 = vadd.f32 0.0001, %v578_v14 }
  0xa9   :  { %v581_v13 = vpop.xlane.xlu1 %580  ;;  %4446 = vrcp.f32 %v654_v30 }
  0xaa   :  { %v657_v33 = vadd.f32 0.0001, %v581_v13 }
  0xab   :  { %v584_v16 = vpop.xlane.xlu0 %583  ;;  %v4433_v35 = vpop.eup %4432 }
  0xac   :  { %v4435_v38 = vpop.eup %4434  ;;  %4448 = vrcp.f32 %v657_v33  ;;  %v658_v49 = vadd.f32 0.0001, %v584_v16 }
  0xad   :  { %v587_v15 = vpop.xlane.xlu1 %586  ;;  %v4437_v45 = vpop.eup %4436  ;;  %4450 = vrcp.f32 %v656_v36 }
  0xae   :  { %v659_v43 = vadd.f32 0.0001, %v587_v15  ;;  %v4439_v54 = vpop.eup %4438 }
  0xaf   :  { %v590_v19 = vpop.xlane.xlu0 %589 }
  0xb0   :  { %4452 = vrcp.f32 %v659_v43  ;;  %v660_v40 = vadd.f32 0.0001, %v590_v19 }
  0xb1   :  { %v593_v17 = vpop.xlane.xlu1 %592  ;;  %v4441_v31 = vpop.eup %4440  ;;  %4454 = vrcp.f32 %v658_v49 }
  0xb2   :  { %v661_v57 = vadd.f32 0.0001, %v593_v17  ;;  %v4443_v53 = vpop.eup %4442 }
  0xb3   :  { %v596_v26 = vpop.xlane.xlu0 %595 }
  0xb4   :  { %4456 = vrcp.f32 %v661_v57  ;;  %v662_v9 = vadd.f32 0.0001, %v596_v26 }
  0xb5   :  { %v599_v23 = vpop.xlane.xlu1 %598  ;;  %v4445_v5 = vpop.eup %4444  ;;  %4458 = vrcp.f32 %v660_v40 }
  0xb6   :  { %v663_v60 = vadd.f32 0.0001, %v599_v23  ;;  %v4447_v12 = vpop.eup %4446 }
  0xb7   :  { %v602_v32 = vpop.xlane.xlu0 %601 }
  0xb8   :  { %4460 = vrcp.f32 %v663_v60  ;;  %v664_v14 = vadd.f32 0.0001, %v602_v32 }
  0xb9   :  { %v605_v28 = vpop.xlane.xlu1 %604  ;;  %v4449_v19 = vpop.eup %4448 }
  0xba   :  { %v665_v2 = vadd.f32 0.0001, %v605_v28  ;;  %v4451_v26 = vpop.eup %4450 }
  0xbb   :  { %v4935_v44 = vpop.xlane.xlu0 %607 }
  0xbc   :  { %4462 = vrcp.f32 %v665_v2  ;;  %v666_v28 = vadd.f32 0.0001, %v4935_v44 }
  0xbd   :  { %v611_v34 = vpop.xlane.xlu1 %610  ;;  %4464 = vrcp.f32 %v662_v9  ;;  %v4453_v33 = vpop.eup %4452 }
  0xbe   :  { %v667_v17 = vadd.f32 0.0001, %v611_v34  ;;  %4466 = vrcp.f32 %v664_v14  ;;  %v4455_v43 = vpop.eup %4454 }
  0xbf   :  { %v614_v48 = vpop.xlane.xlu0 %613 }
  0xc0   :  { %4468 = vrcp.f32 %v667_v17 }
  0xc1   :  { %v617_v51 = vpop.xlane.xlu1 %616  ;;  %4470 = vrcp.f32 %v666_v28 }
  0xc2   :  { %v669_v32 = vadd.f32 0.0001, %v617_v51 }
  0xc3   :  { %v620_v18 = vpop.xlane.xlu0 %619 }
  0xc4   :  { %4472 = vrcp.f32 %v669_v32 }
  0xc5   :  { %v623_v3 = vpop.xlane.xlu1 %622 }
  0xc9   :  { %v629_v25 = vpop.xlane.xlu1 %628 }
  0xca   :  { %v673_v60 = vadd.f32 0.0001, %v629_v25 }
  0xcd   :  { %v635_v51 = vpop.xlane.xlu1 %634 }
  0xce   :  { %v4154_v37 = vpop.f32.mrf.mxu0  ;;  %v675_v14 = vadd.f32 0.0001, %v635_v51 }
  0xcf   :  { %v4933_v42 = vmul.f32 %v4433_v35, %v4154_v37 }
  0xd0   :  { %v280_v46 = vpop.f32.mrf.mxu0  ;;  %v4941_v21 = vpop.f32.mrf.mxu1 }
  0xd1   :  { %v4937_v47 = vmul.f32 %v4435_v38, %v280_v46  ;;  %v756_v50 = vsel %vm752_vm1, %v4933_v42, 0.0  ;;  %v626_v38 = vpop.xlane.xlu0 %625 }
  0xd2   :  { %757 = vadd.xlane.f32.xlu1 %v756_v50  ;;  %v4157_v52 = vpop.f32.mrf.mxu0  ;;  %v4947_v59 = vpop.f32.mrf.mxu1  ;;  %v671_v50 = vadd.f32 0.0001, %v623_v3 }
  0xd3   :  { %v4943_v55 = vmul.f32 %v4437_v45, %v4157_v52  ;;  %v753_v56 = vsel %vm752_vm1, %v4937_v47, 0.0  ;;  %v668_v45 = vadd.f32 0.0001, %v614_v48  ;;  %v4457_v52 = vpop.eup %4456 }
  0xd4   :  { %754 = vadd.xlane.f32.xlu0 %v753_v56  ;;  %v290_v58 = vpop.f32.mrf.mxu0  ;;  %v4953_v62 = vpop.f32.mrf.mxu1 }
  0xd5   :  { %v4949_v39 = vmul.f32 %v4439_v54, %v290_v58  ;;  %v762_v41 = vsel %vm752_vm1, %v4943_v55, 0.0  ;;  %v4459_v58 = vpop.eup %4458  ;;  %4474 = vrcp.f32 %v668_v45 }
  0xd6   :  { %763 = vadd.xlane.f32.xlu1 %v762_v41  ;;  %v4160_v61 = vpop.f32.mrf.mxu0  ;;  %v4959_v7 = vpop.f32.mrf.mxu1  ;;  %v670_v41 = vadd.f32 0.0001, %v620_v18  ;;  %4476 = vrcp.f32 %v671_v50 }
  0xd7   :  { %v4955_v63 = vmul.f32 %v4441_v31, %v4160_v61  ;;  %v759_v0 = vsel %vm752_vm1, %v4949_v39, 0.0  ;;  %v4461_v48 = vpop.eup %4460 }
  0xd8   :  { %760 = vadd.xlane.f32.xlu0 %v759_v0  ;;  %v300_v6 = vpop.f32.mrf.mxu0  ;;  %v4969_v22 = vpop.f32.mrf.mxu1  ;;  %4478 = vrcp.f32 %v670_v41 }
  0xd9   :  { %v4961_v8 = vmul.f32 %v4443_v53, %v300_v6  ;;  %v768_v10 = vsel %vm752_vm1, %v4955_v63, 0.0  ;;  %v632_v0 = vpop.xlane.xlu0 %631  ;;  %v4463_v2 = vpop.eup %4462  ;;  %4480 = vrcp.f32 %v673_v60 }
  0xda   :  { %769 = vadd.xlane.f32.xlu1 %v768_v10  ;;  %v4163_v13 = vpop.f32.mrf.mxu0  ;;  %v4980_v35 = vpop.f32.mrf.mxu1  ;;  %v672_v10 = vadd.f32 0.0001, %v626_v38 }
  0xdb   :  { %v4965_v15 = vmul.f32 %v4445_v5, %v4163_v13  ;;  %v765_v16 = vsel %vm752_vm1, %v4961_v8, 0.0 }
  0xdc   :  { %766 = vadd.xlane.f32.xlu0 %v765_v16  ;;  %v310_v20 = vpop.f32.mrf.mxu0  ;;  %v4990_v56 = vpop.f32.mrf.mxu1  ;;  %4482 = vrcp.f32 %v672_v10 }
  0xdd   :  { %v4971_v23 = vmul.f32 %v4447_v12, %v310_v20  ;;  %v774_v24 = vsel %vm752_vm1, %v4965_v15, 0.0  ;;  %v4465_v12 = vpop.eup %4464  ;;  %v641_v16 = vpop.xlane.xlu1 %640  ;;  %4484 = vrcp.f32 %v675_v14 }
  0xde   :  { %775 = vadd.xlane.f32.xlu1 %v774_v24  ;;  %v4166_v27 = vpop.f32.mrf.mxu0  ;;  %v5000_v5 = vpop.f32.mrf.mxu1 }
  0xdf   :  { %v4976_v29 = vmul.f32 %v4449_v19, %v4166_v27  ;;  %v771_v30 = vsel %vm752_vm1, %v4971_v23, 0.0  ;;  %v4467_v17 = vpop.eup %4466  ;;  %v5009_v19 = vmul.f32 %v4463_v2, %v4941_v21  ;;  %v674_v21 = vadd.f32 0.0001, %v632_v0  ;;  %v638_v32 = vpop.xlane.xlu0 %637 }
  0xe0   :  { %772 = vadd.xlane.f32.xlu0 %v771_v30  ;;  %v320_v34 = vpop.f32.mrf.mxu0  ;;  %v4469_v24 = vpop.eup %4468  ;;  %v5018_v30 = vmul.f32 %v4467_v17, %v4947_v59  ;;  %v676_v50 = vadd.f32 0.0001, %v638_v32 }
  0xe1   :  { %v4982_v36 = vmul.f32 %v4451_v26, %v320_v34  ;;  %v780_v37 = vsel %vm752_vm1, %v4976_v29, 0.0  ;;  %v4192_v26 = vpop.f32.mrf.mxu1  ;;  %v5021_v34 = vmul.f32 %v4469_v24, %v4953_v62  ;;  %v804_v38 = vsel %vm752_vm1, %v5009_v19, 0.0  ;;  %v647_v45 = vpop.xlane.xlu1 %646 }
  0xe2   :  { %781 = vadd.xlane.f32.xlu1 %v780_v37  ;;  %v4169_v44 = vpop.f32.mrf.mxu0  ;;  %4486 = vrcp.f32 %v674_v21  ;;  %v801_v62 = vsel %vm752_vm1, %v5018_v30, 0.0 }
  0xe3   :  { %v4986_v46 = vmul.f32 %v4453_v33, %v4169_v44  ;;  %v777_v49 = vsel %vm752_vm1, %v4982_v36, 0.0  ;;  %v4471_v33 = vpop.eup %4470  ;;  %v513_v59 = vpop.f32.mrf.mxu1 }
  0xe4   :  { %778 = vadd.xlane.f32.xlu0 %v777_v49  ;;  %v330_v54 = vpop.f32.mrf.mxu0  ;;  %v4473_v44 = vpop.eup %4472  ;;  %v5028_v49 = vmul.f32 %v4471_v33, %v4959_v7 }
  0xe5   :  { %v4992_v57 = vmul.f32 %v4455_v43, %v330_v54  ;;  %v786_v31 = vsel %vm752_vm1, %v4986_v46, 0.0  ;;  %v677_v43 = vadd.f32 0.0001, %v641_v16  ;;  %v644_v51 = vpop.xlane.xlu0 %643  ;;  %v5033_v54 = vmul.f32 %v4473_v44, %v4969_v22  ;;  %v4195_v41 = vpop.f32.mrf.mxu1 }
  0xe6   :  { %787 = vadd.xlane.f32.xlu1 %v786_v31  ;;  %v4172_v40 = vpop.f32.mrf.mxu0  ;;  %v810_v31 = vsel %vm752_vm1, %v5021_v34, 0.0  ;;  %v678_v7 = vadd.f32 0.0001, %v644_v51 }
  0xe7   :  { %v4996_v53 = vmul.f32 %v4457_v52, %v4172_v40  ;;  %v783_v61 = vsel %vm752_vm1, %v4992_v57, 0.0  ;;  %v4475_v52 = vpop.eup %4474  ;;  %4488 = vrcp.f32 %v677_v43  ;;  %v816_v0 = vsel %vm752_vm1, %v5033_v54, 0.0 }
  0xe8   :  { %784 = vadd.xlane.f32.xlu0 %v783_v61  ;;  %v340_v3 = vpop.f32.mrf.mxu0  ;;  %v4477_v40 = vpop.eup %4476  ;;  %4490 = vrcp.f32 %v676_v50  ;;  %v5040_v60 = vmul.f32 %v4475_v52, %v4980_v35 }
  0xe9   :  { %v5002_v6 = vmul.f32 %v4459_v58, %v340_v3  ;;  %v792_v9 = vsel %vm752_vm1, %v4996_v53, 0.0  ;;  %v679_v58 = vadd.f32 0.0001, %v647_v45  ;;  %v4479_v61 = vpop.eup %4478  ;;  %v5043_v22 = vmul.f32 %v4477_v40, %v4990_v56  ;;  %v523_v3 = vpop.f32.mrf.mxu1 }
  0xea   :  { %793 = vadd.xlane.f32.xlu1 %v792_v9  ;;  %v4175_v13 = vpop.f32.mrf.mxu0  ;;  %v4481_v2 = vpop.eup %4480  ;;  %v813_v35 = vsel %vm752_vm1, %v5040_v60, 0.0 }
  0xeb   :  { %v5006_v18 = vmul.f32 %v4461_v48, %v4175_v13  ;;  %v789_v20 = vsel %vm752_vm1, %v5002_v6, 0.0  ;;  %v807_v48 = vsel %vm752_vm1, %v5028_v49, 0.0  ;;  %4492 = vrcp.f32 %v679_v58  ;;  %v4483_v9 = vpop.eup %4482  ;;  %v4198_v14 = vpop.f32.mrf.mxu1 }
  0xec   :  { %790 = vadd.xlane.f32.xlu0 %v789_v20  ;;  %v350_v25 = vpop.f32.mrf.mxu0  ;;  %4494 = vrcp.f32 %v678_v7  ;;  %v4485_v10 = vpop.eup %4484  ;;  %v5050_v13 = vmul.f32 %v4481_v2, %v4192_v26  ;;  %v822_v56 = vsel %vm752_vm1, %v5043_v22, 0.0  ;;  %v5056_v17 = vmul.f32 %v4483_v9, %v513_v59 }
  0xed   :  { %v5013_v27 = vmul.f32 %v4465_v12, %v350_v25  ;;  %v798_v28 = vsel %vm752_vm1, %v5006_v18, 0.0  ;;  %v5048_v12 = vmul.f32 %v4479_v61, %v5000_v5  ;;  %v5058_v20 = vmul.f32 %v4485_v10, %v4195_v41  ;;  %v533_v26 = vpop.f32.mrf.mxu1  ;;  %v1245_v41 = vld [vmem:[%s7081_s5 + $0x18] sm:$0xff] }
  0xee   :  { %799 = vadd.xlane.f32.xlu1 %v798_v28  ;;  %v828_v24 = vsel %vm752_vm1, %v5050_v13, 0.0  ;;  %4202 = vmatprep.subr.mxu0 %v1245_v41 }
  0xef   :  { %v795_v37 = vsel %vm752_vm1, %v5013_v27, 0.0  ;;  %v4487_v16 = vpop.eup %4486  ;;  %v819_v5 = vsel %vm752_vm1, %v5048_v12, 0.0  ;;  %v4201_v28 = vpop.f32.mrf.mxu1  ;;  %4203 = vmatpush3.msra.mxu0 %v1245_v41 }
  0xf0   :  { %796 = vadd.xlane.f32.xlu0 %v795_v37  ;;  %v5064_v32 = vmul.f32 %v4487_v16, %v523_v3  ;;  %v825_v37 = vsel %vm752_vm1, %v5056_v17, 0.0 }
  0xf1   :  { %v543_v45 = vpop.f32.mrf.mxu1 }
  0xf2   :  { %805 = vadd.xlane.f32.xlu1 %v804_v38  ;;  %v834_v38 = vsel %vm752_vm1, %v5058_v20, 0.0 }
  0xf4   :  { %802 = vadd.xlane.f32.xlu0 %v801_v62  ;;  %v4489_v25 = vpop.eup %4488  ;;  %v831_v62 = vsel %vm752_vm1, %v5064_v32, 0.0 }
  0xf5   :  { %v4491_v21 = vpop.eup %4490  ;;  %v5066_v33 = vmul.f32 %v4489_v25, %v4198_v14 }
  0xf6   :  { %811 = vadd.xlane.f32.xlu1 %v810_v31  ;;  %v5072_v59 = vmul.f32 %v4491_v21, %v533_v26 }
  0xf7   :  { %v840_v51 = vsel %vm752_vm1, %v5066_v33, 0.0 }
  0xf8   :  { %808 = vadd.xlane.f32.xlu0 %v807_v48  ;;  %v4493_v43 = vpop.eup %4492  ;;  %v837_v31 = vsel %vm752_vm1, %v5072_v59, 0.0 }
  0xf9   :  { %v4495_v44 = vpop.eup %4494  ;;  %v5076_v50 = vmul.f32 %v4493_v43, %v4201_v28 }
  0xfa   :  { %817 = vadd.xlane.f32.xlu1 %v816_v0  ;;  %v5080_v52 = vmul.f32 %v4495_v44, %v543_v45 }
  0xfb   :  { %v846_v58 = vsel %vm752_vm1, %v5076_v50, 0.0 }
  0xfc   :  { %814 = vadd.xlane.f32.xlu0 %v813_v35  ;;  %v843_v40 = vsel %vm752_vm1, %v5080_v52, 0.0 }
  0xfe   :  { %823 = vadd.xlane.f32.xlu1 %v822_v56 }
 0x100   :  { %820 = vadd.xlane.f32.xlu0 %v819_v5 }
 0x102   :  { %829 = vadd.xlane.f32.xlu1 %v828_v24 }
 0x104   :  { %826 = vadd.xlane.f32.xlu0 %v825_v37 }
 0x106   :  { %835 = vadd.xlane.f32.xlu1 %v834_v38 }
 0x108   :  { %832 = vadd.xlane.f32.xlu0 %v831_v62 }
 0x10a   :  { %841 = vadd.xlane.f32.xlu1 %v840_v51 }
 0x10c   :  { %838 = vadd.xlane.f32.xlu0 %v837_v31 }
 0x10e   :  { %847 = vadd.xlane.f32.xlu1 %v846_v58 }
 0x110   :  { %844 = vadd.xlane.f32.xlu0 %v843_v40 }
 0x15b   :  { %v758_v7 = vpop.xlane.xlu1 %757 }
 0x15c   :  { %v851_v48 = vmul.f32 0.03125, %v758_v7 }
 0x15d   :  { %v755_v61 = vpop.xlane.xlu0 %754 }
 0x15e   :  { %v5092_v0 = vsub.f32 %v4933_v42, %v851_v48  ;;  %v850_v2 = vmul.f32 0.03125, %v755_v61 }
 0x15f   :  { %v764_v3 = vpop.xlane.xlu1 %763 }
 0x160   :  { %v5095_v9 = vsub.f32 %v4937_v47, %v850_v2  ;;  %v853_v10 = vmul.f32 0.03125, %v764_v3  ;;  %v915_v35 = vmul.f32 %v5092_v0, %v5092_v0 }
 0x161   :  { %v761_v56 = vpop.xlane.xlu0 %760 }
 0x162   :  { %v5100_v14 = vsub.f32 %v4943_v55, %v853_v10  ;;  %v852_v16 = vmul.f32 0.03125, %v761_v56  ;;  %v949_v5 = vsel %vm752_vm1, %v915_v35, 0.0  ;;  %v914_v42 = vmul.f32 %v5095_v9, %v5095_v9 }
 0x163   :  { %v770_v24 = vpop.xlane.xlu1 %769  ;;  %950 = vadd.xlane.f32.xlu1 %v949_v5 }
 0x164   :  { %v5106_v25 = vsub.f32 %v4949_v39, %v852_v16  ;;  %v855_v47 = vmul.f32 0.03125, %v770_v24  ;;  %v946_v26 = vsel %vm752_vm1, %v914_v42, 0.0  ;;  %v917_v28 = vmul.f32 %v5100_v14, %v5100_v14 }
 0x165   :  { %v767_v21 = vpop.xlane.xlu0 %766  ;;  %947 = vadd.xlane.f32.xlu0 %v946_v26 }
 0x166   :  { %v5112_v55 = vsub.f32 %v4955_v63, %v855_v47  ;;  %v854_v37 = vmul.f32 0.03125, %v767_v21  ;;  %v955_v38 = vsel %vm752_vm1, %v917_v28, 0.0  ;;  %v916_v43 = vmul.f32 %v5106_v25, %v5106_v25 }
 0x167   :  { %v776_v44 = vpop.xlane.xlu1 %775  ;;  %956 = vadd.xlane.f32.xlu1 %v955_v38 }
 0x168   :  { %v5118_v39 = vsub.f32 %v4961_v8, %v854_v37  ;;  %v857_v45 = vmul.f32 0.03125, %v776_v44  ;;  %v952_v62 = vsel %vm752_vm1, %v916_v43, 0.0  ;;  %v919_v51 = vmul.f32 %v5112_v55, %v5112_v55 }
 0x169   :  { %v773_v31 = vpop.xlane.xlu0 %772  ;;  %953 = vadd.xlane.f32.xlu0 %v952_v62 }
 0x16a   :  { %v5124_v63 = vsub.f32 %v4965_v15, %v857_v45  ;;  %v856_v58 = vmul.f32 0.03125, %v773_v31  ;;  %v961_v40 = vsel %vm752_vm1, %v919_v51, 0.0  ;;  %v918_v41 = vmul.f32 %v5118_v39, %v5118_v39 }
 0x16b   :  { %v782_v7 = vpop.xlane.xlu1 %781  ;;  %962 = vadd.xlane.f32.xlu1 %v961_v40 }
 0x16c   :  { %v5130_v8 = vsub.f32 %v4971_v23, %v856_v58  ;;  %v859_v48 = vmul.f32 0.03125, %v782_v7  ;;  %v958_v61 = vsel %vm752_vm1, %v918_v41, 0.0  ;;  %v921_v2 = vmul.f32 %v5124_v63, %v5124_v63 }
 0x16d   :  { %v779_v3 = vpop.xlane.xlu0 %778  ;;  %959 = vadd.xlane.f32.xlu0 %v958_v61 }
 0x16e   :  { %v5136_v15 = vsub.f32 %v4976_v29, %v859_v48  ;;  %v858_v10 = vmul.f32 0.03125, %v779_v3  ;;  %v967_v35 = vsel %vm752_vm1, %v921_v2, 0.0  ;;  %v920_v56 = vmul.f32 %v5130_v8, %v5130_v8 }
 0x16f   :  { %v788_v16 = vpop.xlane.xlu1 %787  ;;  %968 = vadd.xlane.f32.xlu1 %v967_v35 }
 0x170   :  { %v5142_v23 = vsub.f32 %v4982_v36, %v858_v10  ;;  %v861_v5 = vmul.f32 0.03125, %v788_v16  ;;  %v964_v42 = vsel %vm752_vm1, %v920_v56, 0.0  ;;  %v923_v24 = vmul.f32 %v5136_v15, %v5136_v15 }
 0x171   :  { %v785_v47 = vpop.xlane.xlu0 %784  ;;  %965 = vadd.xlane.f32.xlu0 %v964_v42 }
 0x172   :  { %v5148_v29 = vsub.f32 %v4986_v46, %v861_v5  ;;  %v860_v26 = vmul.f32 0.03125, %v785_v47  ;;  %v973_v28 = vsel %vm752_vm1, %v923_v24, 0.0  ;;  %v922_v21 = vmul.f32 %v5142_v23, %v5142_v23 }
 0x173   :  { %v794_v37 = vpop.xlane.xlu1 %793  ;;  %974 = vadd.xlane.f32.xlu1 %v973_v28 }
 0x174   :  { %v5154_v36 = vsub.f32 %v4992_v57, %v860_v26  ;;  %v863_v38 = vmul.f32 0.03125, %v794_v37  ;;  %v970_v43 = vsel %vm752_vm1, %v922_v21, 0.0  ;;  %v925_v44 = vmul.f32 %v5148_v29, %v5148_v29 }
 0x175   :  { %v791_v45 = vpop.xlane.xlu0 %790  ;;  %971 = vadd.xlane.f32.xlu0 %v970_v43  ;;  %v1243_v43 = vld [vmem:[%s7081_s5 + $0x8] sm:$0xff] }
 0x176   :  { %v5160_v46 = vsub.f32 %v4996_v53, %v863_v38  ;;  %v862_v62 = vmul.f32 0.03125, %v791_v45  ;;  %v979_v51 = vsel %vm752_vm1, %v925_v44, 0.0  ;;  %v924_v31 = vmul.f32 %v5154_v36, %v5154_v36  ;;  %v1244_v38 = vld [vmem:[%s7081_s5 + $0x10] sm:$0xff] }
 0x177   :  { %980 = vadd.xlane.f32.xlu1 %v979_v51  ;;  %v800_v57 = vpop.xlane.xlu1 %799  ;;  %4204 = vmatprep.subr.mxu0 %v1244_v38 }
 0x178   :  { %v5166_v58 = vsub.f32 %v5002_v6, %v862_v62  ;;  %v865_v40 = vmul.f32 0.03125, %v800_v57  ;;  %v976_v41 = vsel %vm752_vm1, %v924_v31, 0.0  ;;  %v927_v7 = vmul.f32 %v5160_v46, %v5160_v46  ;;  %4205 = vmatpush3.msra.mxu0 %v1244_v38  ;;  %v1242_v31 = vld [vmem:[%s7081_s5] sm:$0xff] }
 0x179   :  { %977 = vadd.xlane.f32.xlu0 %v976_v41  ;;  %v797_v53 = vpop.xlane.xlu0 %796  ;;  %4206 = vmatprep.subr.mxu0 %v1243_v43 }
 0x17a   :  { %v5172_v48 = vsub.f32 %v5006_v18, %v865_v40  ;;  %v864_v61 = vmul.f32 0.03125, %v797_v53  ;;  %v985_v2 = vsel %vm752_vm1, %v927_v7, 0.0  ;;  %v926_v3 = vmul.f32 %v5166_v58, %v5166_v58  ;;  %4207 = vmatpush3.msra.mxu0 %v1243_v43 }
 0x17b   :  { %986 = vadd.xlane.f32.xlu1 %v985_v2  ;;  %v806_v6 = vpop.xlane.xlu1 %805  ;;  %4208 = vmatprep.subr.mxu0 %v1242_v31 }
 0x17c   :  { %v5178_v10 = vsub.f32 %v5013_v27, %v864_v61  ;;  %v867_v35 = vmul.f32 0.03125, %v806_v6  ;;  %v982_v56 = vsel %vm752_vm1, %v926_v3, 0.0  ;;  %v929_v16 = vmul.f32 %v5172_v48, %v5172_v48  ;;  %4209 = vmatpush3.msra.mxu0 %v1242_v31 }
 0x17d   :  { %983 = vadd.xlane.f32.xlu0 %v982_v56  ;;  %v803_v18 = vpop.xlane.xlu0 %802 }
 0x17e   :  { %v5184_v5 = vsub.f32 %v5009_v19, %v867_v35  ;;  %v866_v42 = vmul.f32 0.03125, %v803_v18  ;;  %v991_v24 = vsel %vm752_vm1, %v929_v16, 0.0  ;;  %v928_v47 = vmul.f32 %v5178_v10, %v5178_v10 }
 0x17f   :  { %992 = vadd.xlane.f32.xlu1 %v991_v24  ;;  %v812_v27 = vpop.xlane.xlu1 %811 }
 0x180   :  { %v5190_v26 = vsub.f32 %v5018_v30, %v866_v42  ;;  %v869_v28 = vmul.f32 0.03125, %v812_v27  ;;  %v988_v21 = vsel %vm752_vm1, %v928_v47, 0.0  ;;  %v931_v37 = vmul.f32 %v5184_v5, %v5184_v5 }
 0x181   :  { %989 = vadd.xlane.f32.xlu0 %v988_v21  ;;  %v809_v19 = vpop.xlane.xlu0 %808 }
 0x182   :  { %v5202_v44 = vsub.f32 %v5021_v34, %v869_v28  ;;  %v868_v30 = vmul.f32 0.03125, %v809_v19  ;;  %v997_v45 = vsel %vm752_vm1, %v931_v37, 0.0  ;;  %v930_v62 = vmul.f32 %v5190_v26, %v5190_v26 }
 0x183   :  { %998 = vadd.xlane.f32.xlu1 %v997_v45  ;;  %v818_v51 = vpop.xlane.xlu1 %817 }
 0x184   :  { %v5211_v57 = vsub.f32 %v5028_v49, %v868_v30  ;;  %v871_v40 = vmul.f32 0.03125, %v818_v51  ;;  %v994_v34 = vsel %vm752_vm1, %v930_v62, 0.0  ;;  %v933_v41 = vmul.f32 %v5202_v44, %v5202_v44 }
 0x185   :  { %995 = vadd.xlane.f32.xlu0 %v994_v34  ;;  %v815_v7 = vpop.xlane.xlu0 %814 }
 0x186   :  { %v5217_v53 = vsub.f32 %v5033_v54, %v871_v40  ;;  %v870_v61 = vmul.f32 0.03125, %v815_v7  ;;  %v1003_v2 = vsel %vm752_vm1, %v933_v41, 0.0  ;;  %v932_v49 = vmul.f32 %v5211_v57, %v5211_v57 }
 0x187   :  { %1004 = vadd.xlane.f32.xlu1 %v1003_v2  ;;  %v824_v3 = vpop.xlane.xlu1 %823 }
 0x188   :  { %v5223_v6 = vsub.f32 %v5040_v60, %v870_v61  ;;  %v873_v35 = vmul.f32 0.03125, %v824_v3  ;;  %v1000_v56 = vsel %vm752_vm1, %v932_v49, 0.0  ;;  %v935_v54 = vmul.f32 %v5217_v53, %v5217_v53 }
 0x189   :  { %1001 = vadd.xlane.f32.xlu0 %v1000_v56  ;;  %v821_v16 = vpop.xlane.xlu0 %820 }
 0x18a   :  { %v5229_v18 = vsub.f32 %v5043_v22, %v873_v35  ;;  %v872_v42 = vmul.f32 0.03125, %v821_v16  ;;  %v1009_v24 = vsel %vm752_vm1, %v935_v54, 0.0  ;;  %v934_v47 = vmul.f32 %v5223_v6, %v5223_v6 }
 0x18b   :  { %1010 = vadd.xlane.f32.xlu1 %v1009_v24  ;;  %v830_v60 = vpop.xlane.xlu1 %829 }
 0x18c   :  { %v5235_v27 = vsub.f32 %v5048_v12, %v872_v42  ;;  %v875_v28 = vmul.f32 0.03125, %v830_v60  ;;  %v1006_v21 = vsel %vm752_vm1, %v934_v47, 0.0  ;;  %v937_v37 = vmul.f32 %v5229_v18, %v5229_v18 }
 0x18d   :  { %1007 = vadd.xlane.f32.xlu0 %v1006_v21  ;;  %v827_v22 = vpop.xlane.xlu0 %826 }
 0x18e   :  { %v5241_v19 = vsub.f32 %v5050_v13, %v875_v28  ;;  %v874_v38 = vmul.f32 0.03125, %v827_v22  ;;  %v1015_v43 = vsel %vm752_vm1, %v937_v37, 0.0  ;;  %v936_v30 = vmul.f32 %v5235_v27, %v5235_v27 }
 0x18f   :  { %1016 = vadd.xlane.f32.xlu1 %v1015_v43  ;;  %v836_v12 = vpop.xlane.xlu1 %835 }
 0x190   :  { %v5247_v45 = vsub.f32 %v5056_v17, %v874_v38  ;;  %v877_v62 = vmul.f32 0.03125, %v836_v12  ;;  %v1012_v51 = vsel %vm752_vm1, %v936_v30, 0.0  ;;  %v939_v31 = vmul.f32 %v5241_v19, %v5241_v19 }
 0x191   :  { %1013 = vadd.xlane.f32.xlu0 %v1012_v51  ;;  %v833_v13 = vpop.xlane.xlu0 %832  ;;  %v1608_v51 = vld [vmem:[%s7082_s6 + $0x28] sm:$0xff] }
 0x192   :  { %v5253_v40 = vsub.f32 %v5058_v20, %v877_v62  ;;  %v876_v34 = vmul.f32 0.03125, %v833_v13  ;;  %v1021_v41 = vsel %vm752_vm1, %v939_v31, 0.0  ;;  %v938_v7 = vmul.f32 %v5247_v45, %v5247_v45  ;;  %v1609_v62 = vld [vmem:[%s7082_s6 + $0x30] sm:$0xff]  ;;  %v1607_v31 = vld [vmem:[%s7082_s6 + $0x20] sm:$0xff]  ;;  %v1606_v13 = vld [vmem:[%s7082_s6 + $0x18] sm:$0xff] }
 0x193   :  { %1022 = vadd.xlane.f32.xlu1 %v1021_v41  ;;  %v842_v17 = vpop.xlane.xlu1 %841  ;;  %v1604_v41 = vld [vmem:[%s7082_s6 + $0x8] sm:$0xff] }
 0x194   :  { %v5259_v61 = vsub.f32 %v5064_v32, %v876_v34  ;;  %v879_v2 = vmul.f32 0.03125, %v842_v17  ;;  %v1018_v49 = vsel %vm752_vm1, %v938_v7, 0.0  ;;  %v941_v3 = vmul.f32 %v5253_v40, %v5253_v40  ;;  %v1605_v34 = vld [vmem:[%s7082_s6 + $0x10] sm:$0xff] }
 0x195   :  { %1019 = vadd.xlane.f32.xlu0 %v1018_v49  ;;  %v839_v20 = vpop.xlane.xlu0 %838 }
 0x196   :  { %v5265_v35 = vsub.f32 %v5066_v33, %v879_v2  ;;  %v878_v56 = vmul.f32 0.03125, %v839_v20  ;;  %v1027_v54 = vsel %vm752_vm1, %v941_v3, 0.0  ;;  %v940_v16 = vmul.f32 %v5259_v61, %v5259_v61 }
 0x197   :  { %1028 = vadd.xlane.f32.xlu1 %v1027_v54  ;;  %v848_v32 = vpop.xlane.xlu1 %847 }
 0x198   :  { %v5271_v42 = vsub.f32 %v5072_v59, %v878_v56  ;;  %v881_v24 = vmul.f32 0.03125, %v848_v32  ;;  %v1024_v47 = vsel %vm752_vm1, %v940_v16, 0.0  ;;  %v943_v60 = vmul.f32 %v5265_v35, %v5265_v35 }
 0x199   :  { %1025 = vadd.xlane.f32.xlu0 %v1024_v47  ;;  %v845_v33 = vpop.xlane.xlu0 %844 }
 0x19a   :  { %v5277_v28 = vsub.f32 %v5076_v50, %v881_v24  ;;  %v880_v21 = vmul.f32 0.03125, %v845_v33  ;;  %v1033_v37 = vsel %vm752_vm1, %v943_v60, 0.0  ;;  %v942_v22 = vmul.f32 %v5271_v42, %v5271_v42 }
 0x19b   :  { %1034 = vadd.xlane.f32.xlu1 %v1033_v37 }
 0x19c   :  { %v5283_v59 = vsub.f32 %v5080_v52, %v880_v21  ;;  %v1030_v38 = vsel %vm752_vm1, %v942_v22, 0.0  ;;  %v945_v43 = vmul.f32 %v5277_v28, %v5277_v28  ;;  %v1610_v52 = vld [vmem:[%s7082_s6 + $0x38] sm:$0xff] }
 0x19d   :  { %1031 = vadd.xlane.f32.xlu0 %v1030_v38  ;;  %4258 = vmatprep.subr.mxu1 %v1610_v52 }
 0x19e   :  { %v1039_v30 = vsel %vm752_vm1, %v945_v43, 0.0  ;;  %v944_v50 = vmul.f32 %v5283_v59, %v5283_v59  ;;  %4259 = vmatpush3.msra.mxu1 %v1610_v52 }
 0x19f   :  { %1040 = vadd.xlane.f32.xlu1 %v1039_v30  ;;  %4260 = vmatprep.subr.mxu1 %v1609_v62 }
 0x1a0   :  { %v1036_v12 = vsel %vm752_vm1, %v944_v50, 0.0  ;;  %4261 = vmatpush3.msra.mxu1 %v1609_v62 }
 0x1a1   :  { %1037 = vadd.xlane.f32.xlu0 %v1036_v12  ;;  %4262 = vmatprep.subr.mxu1 %v1608_v51 }
 0x1a2   :  { %4263 = vmatpush3.msra.mxu1 %v1608_v51 }
 0x1a3   :  { %4264 = vmatprep.subr.mxu1 %v1607_v31 }
 0x1a4   :  { %4265 = vmatpush3.msra.mxu1 %v1607_v31 }
 0x1a5   :  { %4266 = vmatprep.subr.mxu1 %v1606_v13 }
 0x1a6   :  { %4267 = vmatpush3.msra.mxu1 %v1606_v13 }
 0x1a7   :  { %4268 = vmatprep.subr.mxu1 %v1605_v34 }
 0x1a8   :  { %4269 = vmatpush3.msra.mxu1 %v1605_v34 }
 0x1a9   :  { %4270 = vmatprep.subr.mxu1 %v1604_v41 }
 0x1aa   :  { %4271 = vmatpush3.msra.mxu1 %v1604_v41  ;;  %v5316_v41 = vld [vmem:[%s7083_s7] ss:$0 sm:$0xff] }
 0x1ec   :  { %v951_v7 = vpop.xlane.xlu1 %950 }
 0x1ed   :  { %v1043_v17 = vmul.f32 0.03125, %v951_v7 }
 0x1ee   :  { %v948_v2 = vpop.xlane.xlu0 %947 }
 0x1ef   :  { %v1075_v49 = vadd.f32 1e-05, %v1043_v17  ;;  %v1042_v3 = vmul.f32 0.03125, %v948_v2 }
 0x1f0   :  { %v957_v20 = vpop.xlane.xlu1 %956 }
 0x1f1   :  { %4496 = vrsqrt.f32 %v1075_v49  ;;  %v1074_v56 = vadd.f32 1e-05, %v1042_v3  ;;  %v1045_v54 = vmul.f32 0.03125, %v957_v20 }
 0x1f2   :  { %v954_v16 = vpop.xlane.xlu0 %953 }
 0x1f3   :  { %4498 = vrsqrt.f32 %v1074_v56  ;;  %v1077_v32 = vadd.f32 1e-05, %v1045_v54  ;;  %v1044_v24 = vmul.f32 0.03125, %v954_v16 }
 0x1f4   :  { %v963_v47 = vpop.xlane.xlu1 %962 }
 0x1f5   :  { %4500 = vrsqrt.f32 %v1077_v32  ;;  %v1076_v60 = vadd.f32 1e-05, %v1044_v24  ;;  %v1047_v33 = vmul.f32 0.03125, %v963_v47 }
 0x1f6   :  { %v960_v21 = vpop.xlane.xlu0 %959 }
 0x1f7   :  { %4502 = vrsqrt.f32 %v1076_v60  ;;  %v1079_v37 = vadd.f32 1e-05, %v1047_v33  ;;  %v1046_v22 = vmul.f32 0.03125, %v960_v21 }
 0x1f8   :  { %v969_v38 = vpop.xlane.xlu1 %968 }
 0x1f9   :  { %4504 = vrsqrt.f32 %v1079_v37  ;;  %v1078_v43 = vadd.f32 1e-05, %v1046_v22  ;;  %v1049_v30 = vmul.f32 0.03125, %v969_v38 }
 0x1fa   :  { %v966_v50 = vpop.xlane.xlu0 %965 }
 0x1fb   :  { %4506 = vrsqrt.f32 %v1078_v43  ;;  %v1081_v12 = vadd.f32 1e-05, %v1049_v30  ;;  %v1048_v52 = vmul.f32 0.03125, %v966_v50 }
 0x1fc   :  { %v975_v62 = vpop.xlane.xlu1 %974 }
 0x1fd   :  { %4508 = vrsqrt.f32 %v1081_v12  ;;  %v1080_v51 = vadd.f32 1e-05, %v1048_v52  ;;  %v1051_v31 = vmul.f32 0.03125, %v975_v62 }
 0x1fe   :  { %v4497_v13 = vpop.eup %4496  ;;  %v972_v34 = vpop.xlane.xlu0 %971 }
 0x1ff   :  { %v1139_v7 = vmul.f32 %v4497_v13, %v5092_v0  ;;  %4510 = vrsqrt.f32 %v1080_v51  ;;  %v1083_v17 = vadd.f32 1e-05, %v1051_v31  ;;  %v1050_v2 = vmul.f32 0.03125, %v972_v34  ;;  %v5324_v0 = vld [vmem:[%s7083_s7 + $0x1] ss:$0 sm:$0xff] }
 0x200   :  { %v4499_v49 = vpop.eup %4498  ;;  %v981_v3 = vpop.xlane.xlu1 %980 }
 0x201   :  { %4512 = vrsqrt.f32 %v1083_v17  ;;  %v1082_v20 = vadd.f32 1e-05, %v1050_v2  ;;  %v1053_v56 = vmul.f32 0.03125, %v981_v3  ;;  %v1175_v16 = vmul.f32 %v5316_v41, %v1139_v7 }
 0x202   :  { %v4501_v54 = vpop.eup %4500  ;;  %v978_v32 = vpop.xlane.xlu0 %977  ;;  %v1138_v24 = vmul.f32 %v4499_v49, %v5095_v9 }
 0x203   :  { %4514 = vrsqrt.f32 %v1082_v20  ;;  %v1085_v47 = vadd.f32 1e-05, %v1053_v56  ;;  %v1052_v60 = vmul.f32 0.03125, %v978_v32  ;;  %v1141_v22 = vmul.f32 %v4501_v54, %v5100_v14 }
 0x204   :  { %v4503_v33 = vpop.eup %4502  ;;  %v987_v21 = vpop.xlane.xlu1 %986  ;;  %v1174_v37 = vmul.f32 %v5316_v41, %v1138_v24  ;;  %v1211_v52 = vadd.f32 %v5324_v0, %v1175_v16 }
 0x205   :  { %4516 = vrsqrt.f32 %v1085_v47  ;;  %v1084_v38 = vadd.f32 1e-05, %v1052_v60  ;;  %v1055_v43 = vmul.f32 0.03125, %v987_v21  ;;  %v1140_v30 = vmul.f32 %v4503_v33, %v5106_v25 }
 0x206   :  { %v4505_v9 = vpop.eup %4504  ;;  %v984_v50 = vpop.xlane.xlu0 %983  ;;  %v1210_v12 = vadd.f32 %v5324_v0, %v1174_v37  ;;  %v1177_v62 = vmul.f32 %v5316_v41, %v1141_v22 }
 0x207   :  { %4518 = vrsqrt.f32 %v1084_v38  ;;  %v1087_v51 = vadd.f32 1e-05, %v1055_v43  ;;  %v1054_v31 = vmul.f32 0.03125, %v984_v50  ;;  %v1176_v13 = vmul.f32 %v5316_v41, %v1140_v30 }
 0x208   :  { %v4507_v34 = vpop.eup %4506  ;;  %4210 = vmatprep.mubr.msk.f32.mxu0 %vm752_vm1, %v1210_v12  ;;  %v993_v14 = vpop.xlane.xlu1 %992  ;;  %v1143_v7 = vmul.f32 %v4505_v9, %v5112_v55  ;;  %v1213_v20 = vadd.f32 %v5324_v0, %v1177_v62 }
 0x209   :  { %4520 = vrsqrt.f32 %v1087_v51  ;;  %v1086_v25 = vadd.f32 1e-05, %v1054_v31  ;;  %v1057_v17 = vmul.f32 0.03125, %v993_v14  ;;  %4211 = vmatmul.mubr.msk.f32.vlgmr.msra.gmra.mxu0 %vm752_vm1, %v1211_v52  ;;  %v1212_v2 = vadd.f32 %v5324_v0, %v1176_v13 }
 0x20a   :  { %v4509_v49 = vpop.eup %4508  ;;  %v990_v3 = vpop.xlane.xlu0 %989  ;;  %v1142_v56 = vmul.f32 %v4507_v34, %v5118_v39  ;;  %v1179_v54 = vmul.f32 %v5316_v41, %v1143_v7 }
 0x20b   :  { %4522 = vrsqrt.f32 %v1086_v25  ;;  %v1089_v16 = vadd.f32 1e-05, %v1057_v17  ;;  %v1056_v32 = vmul.f32 0.03125, %v990_v3  ;;  %4213 = vmatprep.mubr.msk.f32.mxu0 %vm752_vm1, %v1212_v2  ;;  %v1145_v55 = vmul.f32 %v4509_v49, %v5124_v63 }
 0x20c   :  { %v4511_v24 = vpop.eup %4510  ;;  %v999_v47 = vpop.xlane.xlu1 %998  ;;  %v1178_v60 = vmul.f32 %v5316_v41, %v1142_v56  ;;  %v1215_v43 = vadd.f32 %v5324_v0, %v1179_v54 }
 0x20d   :  { %4524 = vrsqrt.f32 %v1089_v16  ;;  %v1088_v33 = vadd.f32 1e-05, %v1056_v32  ;;  %v1059_v21 = vmul.f32 0.03125, %v999_v47  ;;  %4214 = vmatmul.mubr.msk.f32.gmra.mxu0 %vm752_vm1, %v1213_v20  ;;  %v1144_v39 = vmul.f32 %v4511_v24, %v5130_v8 }
 0x20e   :  { %v4513_v37 = vpop.eup %4512  ;;  %v996_v22 = vpop.xlane.xlu0 %995  ;;  %v1214_v38 = vadd.f32 %v5324_v0, %v1178_v60  ;;  %v1181_v30 = vmul.f32 %v5316_v41, %v1145_v55 }
 0x20f   :  { %4526 = vrsqrt.f32 %v1088_v33  ;;  %v1091_v63 = vadd.f32 1e-05, %v1059_v21  ;;  %v1058_v9 = vmul.f32 0.03125, %v996_v22  ;;  %v1180_v50 = vmul.f32 %v5316_v41, %v1144_v39 }
 0x210   :  { %v4515_v12 = vpop.eup %4514  ;;  %4216 = vmatprep.mubr.msk.f32.mxu0 %vm752_vm1, %v1214_v38  ;;  %v1005_v52 = vpop.xlane.xlu1 %1004  ;;  %v1147_v62 = vmul.f32 %v4513_v37, %v5136_v15  ;;  %v1217_v14 = vadd.f32 %v5324_v0, %v1181_v30 }
 0x211   :  { %4528 = vrsqrt.f32 %v1091_v63  ;;  %v1090_v8 = vadd.f32 1e-05, %v1058_v9  ;;  %v1061_v51 = vmul.f32 0.03125, %v1005_v52  ;;  %4217 = vmatmul.mubr.msk.f32.gmra.mxu0 %vm752_vm1, %v1215_v43  ;;  %v1216_v31 = vadd.f32 %v5324_v0, %v1180_v50 }
 0x212   :  { %v4517_v13 = vpop.eup %4516  ;;  %v1002_v34 = vpop.xlane.xlu0 %1001  ;;  %v1146_v7 = vmul.f32 %v4515_v12, %v5142_v23  ;;  %v1183_v25 = vmul.f32 %v5316_v41, %v1147_v62 }
 0x213   :  { %4530 = vrsqrt.f32 %v1090_v8  ;;  %v1093_v17 = vadd.f32 1e-05, %v1061_v51  ;;  %v1060_v2 = vmul.f32 0.03125, %v1002_v34  ;;  %4219 = vmatprep.mubr.msk.f32.mxu0 %vm752_vm1, %v1216_v31  ;;  %v1149_v15 = vmul.f32 %v4517_v13, %v5148_v29 }
 0x214   :  { %v4519_v49 = vpop.eup %4518  ;;  %v1011_v3 = vpop.xlane.xlu1 %1010  ;;  %v1182_v20 = vmul.f32 %v5316_v41, %v1146_v7  ;;  %v1219_v24 = vadd.f32 %v5324_v0, %v1183_v25 }
 0x215   :  { %4532 = vrsqrt.f32 %v1093_v17  ;;  %v1092_v56 = vadd.f32 1e-05, %v1060_v2  ;;  %v1063_v54 = vmul.f32 0.03125, %v1011_v3  ;;  %4220 = vmatmul.mubr.msk.f32.gmra.mxu0 %vm752_vm1, %v1217_v14  ;;  %v1148_v23 = vmul.f32 %v4519_v49, %v5154_v36 }
 0x216   :  { %v4521_v16 = vpop.eup %4520  ;;  %v1008_v32 = vpop.xlane.xlu0 %1007  ;;  %v1218_v55 = vadd.f32 %v5324_v0, %v1182_v20  ;;  %v1185_v47 = vmul.f32 %v5316_v41, %v1149_v15 }
 0x217   :  { %4534 = vrsqrt.f32 %v1092_v56  ;;  %v1095_v29 = vadd.f32 1e-05, %v1063_v54  ;;  %v1062_v60 = vmul.f32 0.03125, %v1008_v32  ;;  %v1184_v33 = vmul.f32 %v5316_v41, %v1148_v23 }
 0x218   :  { %v4523_v21 = vpop.eup %4522  ;;  %4222 = vmatprep.mubr.msk.f32.mxu0 %vm752_vm1, %v1218_v55  ;;  %v1017_v39 = vpop.xlane.xlu1 %1016  ;;  %v1151_v37 = vmul.f32 %v4521_v16, %v5160_v46  ;;  %v1221_v63 = vadd.f32 %v5324_v0, %v1185_v47 }
 0x219   :  { %4536 = vrsqrt.f32 %v1095_v29  ;;  %v1094_v36 = vadd.f32 1e-05, %v1062_v60  ;;  %v1065_v22 = vmul.f32 0.03125, %v1017_v39  ;;  %4223 = vmatmul.mubr.msk.f32.gmra.mxu0 %vm752_vm1, %v1219_v24  ;;  %v1220_v38 = vadd.f32 %v5324_v0, %v1184_v33 }
 0x21a   :  { %v4525_v43 = vpop.eup %4524  ;;  %v1014_v30 = vpop.xlane.xlu0 %1013  ;;  %v1150_v9 = vmul.f32 %v4523_v21, %v5166_v58  ;;  %v1187_v50 = vmul.f32 %v5316_v41, %v1151_v37 }
 0x21b   :  { %4538 = vrsqrt.f32 %v1094_v36  ;;  %v1097_v12 = vadd.f32 1e-05, %v1065_v22  ;;  %v1064_v52 = vmul.f32 0.03125, %v1014_v30  ;;  %4225 = vmatprep.mubr.msk.f32.mxu0 %vm752_vm1, %v1220_v38  ;;  %v1153_v46 = vmul.f32 %v4525_v43, %v5172_v48 }
 0x21c   :  { %v4527_v62 = vpop.eup %4526  ;;  %v1023_v8 = vpop.xlane.xlu1 %1022  ;;  %v1186_v51 = vmul.f32 %v5316_v41, %v1150_v9  ;;  %v1223_v25 = vadd.f32 %v5324_v0, %v1187_v50 }
 0x21d   :  { %4540 = vrsqrt.f32 %v1097_v12  ;;  %v1096_v31 = vadd.f32 1e-05, %v1064_v52  ;;  %v1067_v13 = vmul.f32 0.03125, %v1023_v8  ;;  %4226 = vmatmul.mubr.msk.f32.gmra.mxu0 %vm752_vm1, %v1221_v63  ;;  %v1152_v58 = vmul.f32 %v4527_v62, %v5178_v10 }
 0x21e   :  { %v4529_v34 = vpop.eup %4528  ;;  %v1020_v14 = vpop.xlane.xlu0 %1019  ;;  %v1222_v7 = vadd.f32 %v5324_v0, %v1186_v51  ;;  %v1189_v17 = vmul.f32 %v5316_v41, %v1153_v46 }
 0x21f   :  { %4542 = vrsqrt.f32 %v1096_v31  ;;  %v1099_v48 = vadd.f32 1e-05, %v1067_v13  ;;  %v1066_v2 = vmul.f32 0.03125, %v1020_v14  ;;  %v1188_v15 = vmul.f32 %v5316_v41, %v1152_v58 }
 0x220   :  { %v4531_v49 = vpop.eup %4530  ;;  %4228 = vmatprep.mubr.msk.f32.mxu0 %vm752_vm1, %v1222_v7  ;;  %v1029_v3 = vpop.xlane.xlu1 %1028  ;;  %v1155_v20 = vmul.f32 %v4529_v34, %v5184_v5  ;;  %v1225_v32 = vadd.f32 %v5324_v0, %v1189_v17 }
 0x221   :  { %4544 = vrsqrt.f32 %v1099_v48  ;;  %v1098_v10 = vadd.f32 1e-05, %v1066_v2  ;;  %v1069_v56 = vmul.f32 0.03125, %v1029_v3  ;;  %4229 = vmatmul.mubr.msk.f32.gmra.mxu0 %vm752_vm1, %v1223_v25  ;;  %v1224_v54 = vadd.f32 %v5324_v0, %v1188_v15 }
 0x222   :  { %v4533_v23 = vpop.eup %4532  ;;  %v1026_v16 = vpop.xlane.xlu0 %1025  ;;  %v1154_v55 = vmul.f32 %v4531_v49, %v5190_v26  ;;  %v1191_v24 = vmul.f32 %v5316_v41, %v1155_v20 }
 0x223   :  { %4546 = vrsqrt.f32 %v1098_v10  ;;  %v1101_v47 = vadd.f32 1e-05, %v1069_v56  ;;  %v1068_v29 = vmul.f32 0.03125, %v1026_v16  ;;  %4231 = vmatprep.mubr.msk.f32.mxu0 %vm752_vm1, %v1224_v54  ;;  %v1157_v5 = vmul.f32 %v4533_v23, %v5202_v44 }
 0x224   :  { %v4535_v60 = vpop.eup %4534  ;;  %v1035_v33 = vpop.xlane.xlu1 %1034  ;;  %v1190_v21 = vmul.f32 %v5316_v41, %v1154_v55  ;;  %v1227_v43 = vadd.f32 %v5324_v0, %v1191_v24 }
 0x225   :  { %4548 = vrsqrt.f32 %v1101_v47  ;;  %v1100_v39 = vadd.f32 1e-05, %v1068_v29  ;;  %v1071_v37 = vmul.f32 0.03125, %v1035_v33  ;;  %4232 = vmatmul.mubr.msk.f32.gmra.mxu0 %vm752_vm1, %v1225_v32  ;;  %v1156_v26 = vmul.f32 %v4535_v60, %v5211_v57 }
 0x226   :  { %v4537_v36 = vpop.eup %4536  ;;  %v1032_v22 = vpop.xlane.xlu0 %1031  ;;  %v1226_v38 = vadd.f32 %v5324_v0, %v1190_v21  ;;  %v1193_v30 = vmul.f32 %v5316_v41, %v1157_v5 }
 0x227   :  { %4550 = vrsqrt.f32 %v1100_v39  ;;  %v1103_v44 = vadd.f32 1e-05, %v1071_v37  ;;  %v1070_v63 = vmul.f32 0.03125, %v1032_v22  ;;  %v1192_v9 = vmul.f32 %v5316_v41, %v1156_v26 }
 0x228   :  { %v4539_v50 = vpop.eup %4538  ;;  %4234 = vmatprep.mubr.msk.f32.mxu0 %vm752_vm1, %v1226_v38  ;;  %v1041_v12 = vpop.xlane.xlu1 %1040  ;;  %v1159_v52 = vmul.f32 %v4537_v36, %v5217_v53  ;;  %v1229_v31 = vadd.f32 %v5324_v0, %v1193_v30 }
 0x229   :  { %4552 = vrsqrt.f32 %v1103_v44  ;;  %v1102_v57 = vadd.f32 1e-05, %v1070_v63  ;;  %v1073_v46 = vmul.f32 0.03125, %v1041_v12  ;;  %4235 = vmatmul.mubr.msk.f32.gmra.mxu0 %vm752_vm1, %v1227_v43  ;;  %v1228_v62 = vadd.f32 %v5324_v0, %v1192_v9  ;;  %v5462_v63 = vld [vmem:[%s7079_s3 + $0x10] sm:$0xff]  ;;  %v5472_v12 = vld [vmem:[%s7079_s3 + $0x20] sm:$0xff] }
 0x22a   :  { %v4541_v8 = vpop.eup %4540  ;;  %v1038_v51 = vpop.xlane.xlu0 %1037  ;;  %v1158_v13 = vmul.f32 %v4539_v50, %v5223_v6  ;;  %v1195_v58 = vmul.f32 %v5316_v41, %v1159_v52  ;;  %7161 = vst [vmem:[#allocation10_spill] sm:$0xff] %v5462_v63  ;;  %v7087_v9 = vmov 0   ;;  %v7091_v50 = vcvt.f32.s32 %v5462_v63 }
 0x22b   :  { %4554 = vrsqrt.f32 %v1102_v57  ;;  %v1105_v34 = vadd.f32 1e-05, %v1073_v46  ;;  %v1072_v14 = vmul.f32 0.03125, %v1038_v51  ;;  %4237 = vmatprep.mubr.msk.f32.mxu0 %vm752_vm1, %v1228_v62  ;;  %v1161_v53 = vmul.f32 %v4541_v8, %v5229_v18  ;;  %4425 = vset.pattern.permute.xlu1 %v7087_v9  ;;  %v5480_v57 = vld [vmem:[%s7079_s3 + $0x30] sm:$0xff]  ;;  %v5488_v62 = vld [vmem:[%s7079_s3 + $0x40] sm:$0xff] }
 0x22c   :  { %v4543_v7 = vpop.eup %4542  ;;  %v1194_v25 = vmul.f32 %v5316_v41, %v1158_v13  ;;  %v1231_v15 = vadd.f32 %v5324_v0, %v1195_v58  ;;  %v7102_v52 = vcvt.f32.s32 %v5472_v12  ;;  %v7101_v46 = vcvt.f32.s32 %v5480_v57  ;;  %v5496_v51 = vld [vmem:[%s7079_s3 + $0x50] sm:$0xff]  ;;  %v5504_v13 = vld [vmem:[%s7079_s3 + $0x60] sm:$0xff] }
 0x22d   :  { %4556 = vrsqrt.f32 %v1105_v34  ;;  %v1104_v17 = vadd.f32 1e-05, %v1072_v14  ;;  %4238 = vmatmul.mubr.msk.f32.gmra.mxu0 %vm752_vm1, %v1229_v31  ;;  %v1160_v48 = vmul.f32 %v4543_v7, %v5235_v27  ;;  %v1197_v3 = vmul.f32 %v5316_v41, %v1161_v53  ;;  %v5512_v34 = vld [vmem:[%s7079_s3 + $0x70] sm:$0xff]  ;;  %v5520_v53 = vld [vmem:[%s7079_s3 + $0x80] sm:$0xff] }
 0x22e   :  { %v4545_v2 = vpop.eup %4544  ;;  %v1230_v6 = vadd.f32 %v5324_v0, %v1194_v25  ;;  %v7100_v8 = vcvt.f32.s32 %v5488_v62  ;;  %v7099_v31 = vcvt.f32.s32 %v5496_v51  ;;  %v7098_v58 = vcvt.f32.s32 %v5504_v13  ;;  %v5528_v25 = vld [vmem:[%s7079_s3 + $0x90] sm:$0xff] }
 0x22f   :  { %4558 = vrsqrt.f32 %v1104_v17  ;;  %v1196_v49 = vmul.f32 %v5316_v41, %v1160_v48  ;;  %v1163_v18 = vmul.f32 %v4545_v2, %v5241_v19  ;;  %v1233_v54 = vadd.f32 %v5324_v0, %v1197_v3  ;;  %v5536_v48 = vld [vmem:[%s7079_s3 + $0xa0] sm:$0xff] }
 0x230   :  { %v4547_v20 = vpop.eup %4546  ;;  %4240 = vmatprep.mubr.msk.f32.mxu0 %vm752_vm1, %v1230_v6  ;;  %v7097_v14 = vcvt.f32.s32 %v5512_v34  ;;  %v7096_v7 = vcvt.f32.s32 %v5520_v53  ;;  %v7095_v17 = vcvt.f32.s32 %v5528_v25  ;;  %v7094_v2 = vcvt.f32.s32 %v5536_v48  ;;  %v5544_v6 = vld [vmem:[%s7079_s3 + $0xb0] sm:$0xff] }
 0x231   :  { %4241 = vmatmul.mubr.msk.f32.gmra.mxu0 %vm752_vm1, %v1231_v15  ;;  %v1232_v10 = vadd.f32 %v5324_v0, %v1196_v49  ;;  %v1162_v27 = vmul.f32 %v4547_v20, %v5247_v45  ;;  %v1199_v16 = vmul.f32 %v5316_v41, %v1163_v18  ;;  %v7093_v15 = vcvt.f32.s32 %v5544_v6  ;;  %v5552_v49 = vld [vmem:[%s7079_s3 + $0xc0] sm:$0xff]  ;;  %v5560_v18 = vld [vmem:[%s7079_s3 + $0xd0] sm:$0xff] }
 0x232   :  { %v4549_v56 = vpop.eup %4548  ;;  %v7092_v3 = vcvt.f32.s32 %v5552_v49  ;;  %7162 = vst [vmem:[#allocation11_spill] sm:$0xff] %v5560_v18  ;;  %v7090_v20 = vcvt.f32.s32 %v5560_v18 }
 0x233   :  { %4243 = vmatprep.mubr.msk.f32.mxu0 %vm752_vm1, %v1232_v10  ;;  %v1198_v23 = vmul.f32 %v5316_v41, %v1162_v27  ;;  %v1165_v19 = vmul.f32 %v4549_v56, %v5253_v40  ;;  %v1235_v45 = vadd.f32 %v5324_v0, %v1199_v16  ;;  %v5568_v10 = vld [vmem:[%s7079_s3 + $0xe0] sm:$0xff] }
 0x234   :  { %v4551_v32 = vpop.eup %4550  ;;  %7163 = vst [vmem:[#allocation12_spill] sm:$0xff] %v5568_v10  ;;  %v7089_v27 = vcvt.f32.s32 %v5568_v10  ;;  %v5576_v56 = vld [vmem:[%s7083_s7 + $0x2] ss:$0 sm:$0xff] }
 0x235   :  { %4244 = vmatmul.mubr.msk.f32.gmra.mxu0 %vm752_vm1, %v1233_v54  ;;  %v1234_v55 = vadd.f32 %v5324_v0, %v1198_v23  ;;  %v1164_v24 = vmul.f32 %v4551_v32, %v5259_v61  ;;  %v1201_v5 = vmul.f32 %v5316_v41, %v1165_v19 }
 0x236   :  { %v4553_v47 = vpop.eup %4552 }
 0x237   :  { %4246 = vmatprep.mubr.msk.f32.mxu0 %vm752_vm1, %v1234_v55  ;;  %v1200_v29 = vmul.f32 %v5316_v41, %v1164_v24  ;;  %v1167_v60 = vmul.f32 %v4553_v47, %v5265_v35  ;;  %v1237_v61 = vadd.f32 %v5324_v0, %v1201_v5 }
 0x238   :  { %v4555_v33 = vpop.eup %4554 }
 0x239   :  { %4247 = vmatmul.mubr.msk.f32.gmra.mxu0 %vm752_vm1, %v1235_v45  ;;  %v1236_v40 = vadd.f32 %v5324_v0, %v1200_v29  ;;  %v1166_v21 = vmul.f32 %v4555_v33, %v5271_v42  ;;  %v1203_v26 = vmul.f32 %v5316_v41, %v1167_v60 }
 0x23a   :  { %v4557_v39 = vpop.eup %4556 }
 0x23b   :  { %4249 = vmatprep.mubr.msk.f32.mxu0 %vm752_vm1, %v1236_v40  ;;  %v1202_v37 = vmul.f32 %v5316_v41, %v1166_v21  ;;  %v1169_v36 = vmul.f32 %v4557_v39, %v5277_v28  ;;  %v1239_v42 = vadd.f32 %v5324_v0, %v1203_v26 }
 0x23c   :  { %v4559_v22 = vpop.eup %4558 }
 0x23d   :  { %4250 = vmatmul.mubr.msk.f32.gmra.mxu0 %vm752_vm1, %v1237_v61  ;;  %v1238_v35 = vadd.f32 %v5324_v0, %v1202_v37  ;;  %v1168_v38 = vmul.f32 %v4559_v22, %v5283_v59  ;;  %v1205_v30 = vmul.f32 %v5316_v41, %v1169_v36  ;;  %v1603_v59 = vld [vmem:[%s7082_s6] sm:$0xff] }
 0x23e   :  { %4272 = vmatprep.subr.mxu1 %v1603_v59 }
 0x23f   :  { %4252 = vmatprep.mubr.msk.f32.mxu0 %vm752_vm1, %v1238_v35  ;;  %v1204_v43 = vmul.f32 %v5316_v41, %v1168_v38  ;;  %v1241_v28 = vadd.f32 %v5324_v0, %v1205_v30  ;;  %4273 = vmatpush3.msra.mxu1 %v1603_v59  ;;  %v5457_v41 = vld [vmem:[%s7079_s3 + $0x8] sm:$0xff] }
 0x241   :  { %4253 = vmatmul.mubr.msk.f32.gmra.mxu0 %vm752_vm1, %v1239_v42  ;;  %v1240_v44 = vadd.f32 %v5324_v0, %v1204_v43  ;;  %v7103_v0 = vcvt.f32.s32 %v5457_v41 }
 0x243   :  { %4255 = vmatprep.mubr.msk.f32.mxu0 %vm752_vm1, %v1240_v44  ;;  %3132 = vperm.xlu1 %4425, %v7103_v0  }
 0x245   :  { %4256 = vmatmul.mubr.msk.f32.gmra.mxu0 %vm752_vm1, %v1241_v28  ;;  %vm2768_vm1 = vcmask 1048512  }
 0x247   :  { %3135 = vperm.xlu1 %4425, %v7091_v50  }
 0x24b   :  { %3141 = vperm.xlu1 %4425, %v7102_v52  }
 0x24f   :  { %3147 = vperm.xlu1 %4425, %v7101_v46  }
 0x253   :  { %3153 = vperm.xlu1 %4425, %v7100_v8  }
 0x257   :  { %3159 = vperm.xlu1 %4425, %v7099_v31  }
 0x25b   :  { %3165 = vperm.xlu1 %4425, %v7098_v58  }
 0x25f   :  { %3171 = vperm.xlu1 %4425, %v7097_v14  }
 0x263   :  { %3177 = vperm.xlu1 %4425, %v7096_v7  }
 0x267   :  { %3183 = vperm.xlu1 %4425, %v7095_v17  }
 0x26b   :  { %3189 = vperm.xlu1 %4425, %v7094_v2  }
 0x26f   :  { %3195 = vperm.xlu1 %4425, %v7093_v15  }
 0x273   :  { %3201 = vperm.xlu1 %4425, %v7092_v3  }
 0x277   :  { %3207 = vperm.xlu1 %4425, %v7090_v20  }
 0x27b   :  { %3213 = vperm.xlu1 %4425, %v7089_v27  }
 0x2c9   :  { %v4212_v54 = vpop.f32.mrf.mxu0 }
 0x2ca   :  { %v1418_v23 = vadd.f32 %v4212_v54, %v5576_v56 }
 0x2cb   :  { %v1412_v16 = vpop.f32.mrf.mxu0 }
 0x2cc   :  { %v1413_v19 = vadd.f32 %v5576_v56, %v1412_v16  ;;  %v1572_v24 = vmax.f32 %v1418_v23, 0.0 }
 0x2cd   :  { %v4215_v32 = vpop.f32.mrf.mxu0 }
 0x2ce   :  { %v1571_v55 = vmax.f32 %v1413_v19, 0.0  ;;  %v1428_v47 = vadd.f32 %v4215_v32, %v5576_v56 }
 0x2cf   :  { %v1422_v45 = vpop.f32.mrf.mxu0 }
 0x2d0   :  { %v1423_v29 = vadd.f32 %v5576_v56, %v1422_v45  ;;  %4274 = vmatprep.mubr.msk.f32.mxu1 %vm1615_vm2, %v1571_v55  ;;  %v1574_v33 = vmax.f32 %v1428_v47, 0.0 }
 0x2d1   :  { %v4218_v5 = vpop.f32.mrf.mxu0  ;;  %4275 = vmatmul.mubr.msk.f32.vlgmr.msra.gmra.mxu1 %vm1615_vm2, %v1572_v24 }
 0x2d2   :  { %v1573_v60 = vmax.f32 %v1423_v29, 0.0  ;;  %v1438_v40 = vadd.f32 %v4218_v5, %v5576_v56 }
 0x2d3   :  { %v1432_v21 = vpop.f32.mrf.mxu0 }
 0x2d4   :  { %v1433_v39 = vadd.f32 %v5576_v56, %v1432_v21  ;;  %4277 = vmatprep.mubr.msk.f32.mxu1 %vm1615_vm2, %v1573_v60  ;;  %v1576_v26 = vmax.f32 %v1438_v40, 0.0 }
 0x2d5   :  { %v4221_v61 = vpop.f32.mrf.mxu0  ;;  %4278 = vmatmul.mubr.msk.f32.gmra.mxu1 %vm1615_vm2, %v1574_v33 }
 0x2d6   :  { %v1575_v37 = vmax.f32 %v1433_v39, 0.0  ;;  %v1448_v36 = vadd.f32 %v4221_v61, %v5576_v56 }
 0x2d7   :  { %v1442_v22 = vpop.f32.mrf.mxu0 }
 0x2d8   :  { %v1443_v35 = vadd.f32 %v5576_v56, %v1442_v22  ;;  %4280 = vmatprep.mubr.msk.f32.mxu1 %vm1615_vm2, %v1575_v37  ;;  %v1578_v43 = vmax.f32 %v1448_v36, 0.0 }
 0x2d9   :  { %v4224_v38 = vpop.f32.mrf.mxu0  ;;  %4281 = vmatmul.mubr.msk.f32.gmra.mxu1 %vm1615_vm2, %v1576_v26 }
 0x2da   :  { %v1577_v42 = vmax.f32 %v1443_v35, 0.0  ;;  %v1458_v30 = vadd.f32 %v4224_v38, %v5576_v56 }
 0x2db   :  { %v1452_v44 = vpop.f32.mrf.mxu0 }
 0x2dc   :  { %v1453_v28 = vadd.f32 %v5576_v56, %v1452_v44  ;;  %4283 = vmatprep.mubr.msk.f32.mxu1 %vm1615_vm2, %v1577_v42  ;;  %v1580_v23 = vmax.f32 %v1458_v30, 0.0 }
 0x2dd   :  { %v4227_v59 = vpop.f32.mrf.mxu0  ;;  %4284 = vmatmul.mubr.msk.f32.gmra.mxu1 %vm1615_vm2, %v1578_v43 }
 0x2de   :  { %v1579_v54 = vmax.f32 %v1453_v28, 0.0  ;;  %v1468_v16 = vadd.f32 %v4227_v59, %v5576_v56 }
 0x2df   :  { %v1462_v19 = vpop.f32.mrf.mxu0 }
 0x2e0   :  { %v1463_v32 = vadd.f32 %v5576_v56, %v1462_v19  ;;  %4286 = vmatprep.mubr.msk.f32.mxu1 %vm1615_vm2, %v1579_v54  ;;  %v1582_v47 = vmax.f32 %v1468_v16, 0.0 }
 0x2e1   :  { %v4230_v55 = vpop.f32.mrf.mxu0  ;;  %4287 = vmatmul.mubr.msk.f32.gmra.mxu1 %vm1615_vm2, %v1580_v23 }
 0x2e2   :  { %v1581_v24 = vmax.f32 %v1463_v32, 0.0  ;;  %v1478_v45 = vadd.f32 %v4230_v55, %v5576_v56 }
 0x2e3   :  { %v1472_v29 = vpop.f32.mrf.mxu0 }
 0x2e4   :  { %v1473_v5 = vadd.f32 %v5576_v56, %v1472_v29  ;;  %4289 = vmatprep.mubr.msk.f32.mxu1 %vm1615_vm2, %v1581_v24  ;;  %v1584_v40 = vmax.f32 %v1478_v45, 0.0 }
 0x2e5   :  { %v4233_v60 = vpop.f32.mrf.mxu0  ;;  %4290 = vmatmul.mubr.msk.f32.gmra.mxu1 %vm1615_vm2, %v1582_v47 }
 0x2e6   :  { %v1583_v33 = vmax.f32 %v1473_v5, 0.0  ;;  %v1488_v21 = vadd.f32 %v4233_v60, %v5576_v56 }
 0x2e7   :  { %v1482_v39 = vpop.f32.mrf.mxu0 }
 0x2e8   :  { %v1483_v61 = vadd.f32 %v5576_v56, %v1482_v39  ;;  %4292 = vmatprep.mubr.msk.f32.mxu1 %vm1615_vm2, %v1583_v33  ;;  %v1586_v36 = vmax.f32 %v1488_v21, 0.0 }
 0x2e9   :  { %v4236_v37 = vpop.f32.mrf.mxu0  ;;  %4293 = vmatmul.mubr.msk.f32.gmra.mxu1 %vm1615_vm2, %v1584_v40 }
 0x2ea   :  { %v1585_v26 = vmax.f32 %v1483_v61, 0.0  ;;  %v1498_v22 = vadd.f32 %v4236_v37, %v5576_v56 }
 0x2eb   :  { %v1492_v35 = vpop.f32.mrf.mxu0 }
 0x2ec   :  { %v1493_v38 = vadd.f32 %v5576_v56, %v1492_v35  ;;  %4295 = vmatprep.mubr.msk.f32.mxu1 %vm1615_vm2, %v1585_v26  ;;  %v1588_v30 = vmax.f32 %v1498_v22, 0.0 }
 0x2ed   :  { %v4239_v42 = vpop.f32.mrf.mxu0  ;;  %4296 = vmatmul.mubr.msk.f32.gmra.mxu1 %vm1615_vm2, %v1586_v36 }
 0x2ee   :  { %v1587_v43 = vmax.f32 %v1493_v38, 0.0  ;;  %v1508_v44 = vadd.f32 %v4239_v42, %v5576_v56 }
 0x2ef   :  { %v1502_v28 = vpop.f32.mrf.mxu0 }
 0x2f0   :  { %v1503_v59 = vadd.f32 %v5576_v56, %v1502_v28  ;;  %4298 = vmatprep.mubr.msk.f32.mxu1 %vm1615_vm2, %v1587_v43  ;;  %v1590_v16 = vmax.f32 %v1508_v44, 0.0 }
 0x2f1   :  { %v4242_v54 = vpop.f32.mrf.mxu0  ;;  %4299 = vmatmul.mubr.msk.f32.gmra.mxu1 %vm1615_vm2, %v1588_v30 }
 0x2f2   :  { %v1589_v23 = vmax.f32 %v1503_v59, 0.0  ;;  %v1518_v19 = vadd.f32 %v4242_v54, %v5576_v56 }
 0x2f3   :  { %v1512_v32 = vpop.f32.mrf.mxu0 }
 0x2f4   :  { %v1513_v55 = vadd.f32 %v5576_v56, %v1512_v32  ;;  %4301 = vmatprep.mubr.msk.f32.mxu1 %vm1615_vm2, %v1589_v23  ;;  %v1592_v45 = vmax.f32 %v1518_v19, 0.0 }
 0x2f5   :  { %v4245_v24 = vpop.f32.mrf.mxu0  ;;  %4302 = vmatmul.mubr.msk.f32.gmra.mxu1 %vm1615_vm2, %v1590_v16 }
 0x2f6   :  { %v1591_v47 = vmax.f32 %v1513_v55, 0.0  ;;  %v1528_v29 = vadd.f32 %v4245_v24, %v5576_v56 }
 0x2f7   :  { %v1522_v5 = vpop.f32.mrf.mxu0 }
 0x2f8   :  { %v1523_v60 = vadd.f32 %v5576_v56, %v1522_v5  ;;  %4304 = vmatprep.mubr.msk.f32.mxu1 %vm1615_vm2, %v1591_v47  ;;  %v1594_v21 = vmax.f32 %v1528_v29, 0.0  ;;  %v5647_v29 = vld [vmem:[%s7083_s7 + $0x3] ss:$0 sm:$0xff] }
 0x2f9   :  { %v4248_v33 = vpop.f32.mrf.mxu0  ;;  %4305 = vmatmul.mubr.msk.f32.gmra.mxu1 %vm1615_vm2, %v1592_v45 }
 0x2fa   :  { %v1593_v40 = vmax.f32 %v1523_v60, 0.0  ;;  %v1538_v39 = vadd.f32 %v4248_v33, %v5576_v56 }
 0x2fb   :  { %v1532_v61 = vpop.f32.mrf.mxu0 }
 0x2fc   :  { %v1533_v37 = vadd.f32 %v5576_v56, %v1532_v61  ;;  %4307 = vmatprep.mubr.msk.f32.mxu1 %vm1615_vm2, %v1593_v40  ;;  %v1596_v22 = vmax.f32 %v1538_v39, 0.0 }
 0x2fd   :  { %v4251_v26 = vpop.f32.mrf.mxu0  ;;  %4308 = vmatmul.mubr.msk.f32.gmra.mxu1 %vm1615_vm2, %v1594_v21 }
 0x2fe   :  { %v1595_v36 = vmax.f32 %v1533_v37, 0.0  ;;  %v1548_v35 = vadd.f32 %v4251_v26, %v5576_v56 }
 0x2ff   :  { %v1542_v38 = vpop.f32.mrf.mxu0 }
 0x300   :  { %v1543_v42 = vadd.f32 %v5576_v56, %v1542_v38  ;;  %4310 = vmatprep.mubr.msk.f32.mxu1 %vm1615_vm2, %v1595_v36  ;;  %v1598_v44 = vmax.f32 %v1548_v35, 0.0 }
 0x301   :  { %v4254_v43 = vpop.f32.mrf.mxu0  ;;  %4311 = vmatmul.mubr.msk.f32.gmra.mxu1 %vm1615_vm2, %v1596_v22 }
 0x302   :  { %v1597_v30 = vmax.f32 %v1543_v42, 0.0  ;;  %v1558_v28 = vadd.f32 %v4254_v43, %v5576_v56 }
 0x303   :  { %v1552_v59 = vpop.f32.mrf.mxu0 }
 0x304   :  { %v1553_v54 = vadd.f32 %v5576_v56, %v1552_v59  ;;  %4313 = vmatprep.mubr.msk.f32.mxu1 %vm1615_vm2, %v1597_v30  ;;  %v1600_v19 = vmax.f32 %v1558_v28, 0.0 }
 0x305   :  { %v4257_v23 = vpop.f32.mrf.mxu0  ;;  %4314 = vmatmul.mubr.msk.f32.gmra.mxu1 %vm1615_vm2, %v1598_v44 }
 0x306   :  { %v1599_v16 = vmax.f32 %v1553_v54, 0.0  ;;  %v1568_v32 = vadd.f32 %v4257_v23, %v5576_v56 }
 0x307   :  { %v1562_v55 = vpop.f32.mrf.mxu0 }
 0x308   :  { %v1563_v24 = vadd.f32 %v5576_v56, %v1562_v55  ;;  %4316 = vmatprep.mubr.msk.f32.mxu1 %vm1615_vm2, %v1599_v16  ;;  %v1602_v45 = vmax.f32 %v1568_v32, 0.0 }
 0x309   :  { %4317 = vmatmul.mubr.msk.f32.gmra.mxu1 %vm1615_vm2, %v1600_v19 }
 0x30a   :  { %v1601_v47 = vmax.f32 %v1563_v24, 0.0 }
 0x30c   :  { %4319 = vmatprep.mubr.msk.f32.mxu1 %vm1615_vm2, %v1601_v47 }
 0x30d   :  { %4320 = vmatmul.mubr.msk.f32.gmra.mxu1 %vm1615_vm2, %v1602_v45 }
 0x391   :  { %v4276_v5 = vpop.f32.mrf.mxu1 }
 0x392   :  { %v5650_v60 = vadd.f32 %v4276_v5, %v5647_v29 }
 0x393   :  { %v1778_v56 = vpop.f32.mrf.mxu1 }
 0x394   :  { %v7135_v33 = vmax.f32 %v5650_v60, 0.0  ;;  %v5654_v40 = vadd.f32 %v5647_v29, %v1778_v56 }
 0x395   :  { %v4279_v21 = vpop.f32.mrf.mxu1 }
 0x396   :  { %v7134_v39 = vmax.f32 %v5654_v40, 0.0  ;;  %v5658_v61 = vadd.f32 %v4279_v21, %v5647_v29  ;;  %v1972_v37 = vsel %vm1615_vm2, %v7135_v33, 0.0 }
 0x397   :  { %1973 = vadd.xlane.f32.xlu1 %v1972_v37  ;;  %v1788_v26 = vpop.f32.mrf.mxu1 }
 0x398   :  { %v7131_v36 = vmax.f32 %v5658_v61, 0.0  ;;  %v5665_v22 = vadd.f32 %v5647_v29, %v1788_v26  ;;  %v1969_v35 = vsel %vm1615_vm2, %v7134_v39, 0.0 }
 0x399   :  { %1970 = vadd.xlane.f32.xlu0 %v1969_v35  ;;  %v4282_v38 = vpop.f32.mrf.mxu1 }
 0x39a   :  { %v7130_v42 = vmax.f32 %v5665_v22, 0.0  ;;  %v5672_v43 = vadd.f32 %v4282_v38, %v5647_v29  ;;  %v1978_v30 = vsel %vm1615_vm2, %v7131_v36, 0.0 }
 0x39b   :  { %1979 = vadd.xlane.f32.xlu1 %v1978_v30  ;;  %v1798_v44 = vpop.f32.mrf.mxu1 }
 0x39c   :  { %v7126_v28 = vmax.f32 %v5672_v43, 0.0  ;;  %v5679_v59 = vadd.f32 %v5647_v29, %v1798_v44  ;;  %v1975_v54 = vsel %vm1615_vm2, %v7130_v42, 0.0 }
 0x39d   :  { %1976 = vadd.xlane.f32.xlu0 %v1975_v54  ;;  %v4285_v23 = vpop.f32.mrf.mxu1 }
 0x39e   :  { %v7125_v16 = vmax.f32 %v5679_v59, 0.0  ;;  %v5686_v19 = vadd.f32 %v4285_v23, %v5647_v29  ;;  %v1984_v32 = vsel %vm1615_vm2, %v7126_v28, 0.0 }
 0x39f   :  { %1985 = vadd.xlane.f32.xlu1 %v1984_v32  ;;  %v1808_v55 = vpop.f32.mrf.mxu1 }
 0x3a0   :  { %v7123_v24 = vmax.f32 %v5686_v19, 0.0  ;;  %v5693_v47 = vadd.f32 %v5647_v29, %v1808_v55  ;;  %v1981_v45 = vsel %vm1615_vm2, %v7125_v16, 0.0 }
 0x3a1   :  { %1982 = vadd.xlane.f32.xlu0 %v1981_v45  ;;  %v4288_v5 = vpop.f32.mrf.mxu1 }
 0x3a2   :  { %v7121_v56 = vmax.f32 %v5693_v47, 0.0  ;;  %v5700_v21 = vadd.f32 %v4288_v5, %v5647_v29  ;;  %v1990_v37 = vsel %vm1615_vm2, %v7123_v24, 0.0 }
 0x3a3   :  { %1991 = vadd.xlane.f32.xlu1 %v1990_v37  ;;  %v1818_v26 = vpop.f32.mrf.mxu1 }
 0x3a4   :  { %v7119_v35 = vmax.f32 %v5700_v21, 0.0  ;;  %v5707_v38 = vadd.f32 %v5647_v29, %v1818_v26  ;;  %v1987_v30 = vsel %vm1615_vm2, %v7121_v56, 0.0 }
 0x3a5   :  { %1988 = vadd.xlane.f32.xlu0 %v1987_v30  ;;  %v4291_v44 = vpop.f32.mrf.mxu1 }
 0x3a6   :  { %v7118_v54 = vmax.f32 %v5707_v38, 0.0  ;;  %v5714_v23 = vadd.f32 %v4291_v44, %v5647_v29  ;;  %v1996_v32 = vsel %vm1615_vm2, %v7119_v35, 0.0 }
 0x3a7   :  { %1997 = vadd.xlane.f32.xlu1 %v1996_v32  ;;  %v1828_v55 = vpop.f32.mrf.mxu1 }
 0x3a8   :  { %v7116_v45 = vmax.f32 %v5714_v23, 0.0  ;;  %v5721_v5 = vadd.f32 %v5647_v29, %v1828_v55  ;;  %v1993_v37 = vsel %vm1615_vm2, %v7118_v54, 0.0 }
 0x3a9   :  { %1994 = vadd.xlane.f32.xlu0 %v1993_v37  ;;  %v4294_v26 = vpop.f32.mrf.mxu1 }
 0x3aa   :  { %v7114_v30 = vmax.f32 %v5721_v5, 0.0  ;;  %v5728_v44 = vadd.f32 %v4294_v26, %v5647_v29  ;;  %v2002_v32 = vsel %vm1615_vm2, %v7116_v45, 0.0 }
 0x3ab   :  { %2003 = vadd.xlane.f32.xlu1 %v2002_v32  ;;  %v1838_v1 = vpop.f32.mrf.mxu1 }
 0x3ac   :  { %v7112_v55 = vmax.f32 %v5728_v44, 0.0  ;;  %v5735_v9 = vadd.f32 %v5647_v29, %v1838_v1  ;;  %v1999_v37 = vsel %vm1615_vm2, %v7114_v30, 0.0 }
 0x3ad   :  { %2000 = vadd.xlane.f32.xlu0 %v1999_v37  ;;  %v4297_v27 = vpop.f32.mrf.mxu1 }
 0x3ae   :  { %v7110_v26 = vmax.f32 %v5735_v9, 0.0  ;;  %v5742_v20 = vadd.f32 %v4297_v27, %v5647_v29  ;;  %v2008_v32 = vsel %vm1615_vm2, %v7112_v55, 0.0 }
 0x3af   :  { %2009 = vadd.xlane.f32.xlu1 %v2008_v32  ;;  %v1848_v50 = vpop.f32.mrf.mxu1 }
 0x3b0   :  { %v7108_v1 = vmax.f32 %v5742_v20, 0.0  ;;  %v5749_v3 = vadd.f32 %v5647_v29, %v1848_v50  ;;  %v2005_v37 = vsel %vm1615_vm2, %v7110_v26, 0.0 }
 0x3b1   :  { %2006 = vadd.xlane.f32.xlu0 %v2005_v37  ;;  %v4300_v15 = vpop.f32.mrf.mxu1 }
 0x3b2   :  { %v7106_v27 = vmax.f32 %v5749_v3, 0.0  ;;  %v5756_v2 = vadd.f32 %v4300_v15, %v5647_v29  ;;  %v2014_v32 = vsel %vm1615_vm2, %v7108_v1, 0.0 }
 0x3b3   :  { %2015 = vadd.xlane.f32.xlu1 %v2014_v32  ;;  %v1858_v17 = vpop.f32.mrf.mxu1 }
 0x3b4   :  { %v7104_v50 = vmax.f32 %v5756_v2, 0.0  ;;  %v5763_v7 = vadd.f32 %v5647_v29, %v1858_v17  ;;  %v2011_v37 = vsel %vm1615_vm2, %v7106_v27, 0.0 }
 0x3b5   :  { %2012 = vadd.xlane.f32.xlu0 %v2011_v37  ;;  %v4303_v14 = vpop.f32.mrf.mxu1 }
 0x3b6   :  { %v7105_v15 = vmax.f32 %v5763_v7, 0.0  ;;  %v5770_v58 = vadd.f32 %v4303_v14, %v5647_v29  ;;  %v2020_v32 = vsel %vm1615_vm2, %v7104_v50, 0.0 }
 0x3b7   :  { %2021 = vadd.xlane.f32.xlu1 %v2020_v32  ;;  %v1868_v31 = vpop.f32.mrf.mxu1 }
 0x3b8   :  { %v7107_v17 = vmax.f32 %v5770_v58, 0.0  ;;  %v5777_v8 = vadd.f32 %v5647_v29, %v1868_v31  ;;  %v2017_v37 = vsel %vm1615_vm2, %v7105_v15, 0.0 }
 0x3b9   :  { %2018 = vadd.xlane.f32.xlu0 %v2017_v37  ;;  %v4306_v46 = vpop.f32.mrf.mxu1 }
 0x3ba   :  { %v7109_v14 = vmax.f32 %v5777_v8, 0.0  ;;  %v5784_v52 = vadd.f32 %v4306_v46, %v5647_v29  ;;  %v2026_v32 = vsel %vm1615_vm2, %v7107_v17, 0.0 }
 0x3bb   :  { %2027 = vadd.xlane.f32.xlu1 %v2026_v32  ;;  %v1878_v0 = vpop.f32.mrf.mxu1 }
 0x3bc   :  { %v7111_v31 = vmax.f32 %v5784_v52, 0.0  ;;  %v5791_v50 = vadd.f32 %v5647_v29, %v1878_v0  ;;  %v2023_v37 = vsel %vm1615_vm2, %v7109_v14, 0.0 }
 0x3bd   :  { %2024 = vadd.xlane.f32.xlu0 %v2023_v37  ;;  %v4309_v15 = vpop.f32.mrf.mxu1 }
 0x3be   :  { %v7113_v46 = vmax.f32 %v5791_v50, 0.0  ;;  %v5798_v27 = vadd.f32 %v4309_v15, %v5647_v29  ;;  %v2032_v32 = vsel %vm1615_vm2, %v7111_v31, 0.0 }
 0x3bf   :  { %2033 = vadd.xlane.f32.xlu1 %v2032_v32  ;;  %v1888_v17 = vpop.f32.mrf.mxu1 }
 0x3c0   :  { %v7115_v0 = vmax.f32 %v5798_v27, 0.0  ;;  %v5805_v1 = vadd.f32 %v5647_v29, %v1888_v17  ;;  %v2029_v37 = vsel %vm1615_vm2, %v7113_v46, 0.0 }
 0x3c1   :  { %2030 = vadd.xlane.f32.xlu0 %v2029_v37  ;;  %v4312_v14 = vpop.f32.mrf.mxu1 }
 0x3c2   :  { %v7117_v15 = vmax.f32 %v5805_v1, 0.0  ;;  %v5812_v26 = vadd.f32 %v4312_v14, %v5647_v29  ;;  %v2038_v32 = vsel %vm1615_vm2, %v7115_v0, 0.0 }
 0x3c3   :  { %2039 = vadd.xlane.f32.xlu1 %v2038_v32  ;;  %v1898_v31 = vpop.f32.mrf.mxu1 }
 0x3c4   :  { %v7120_v17 = vmax.f32 %v5812_v26, 0.0  ;;  %v5819_v55 = vadd.f32 %v5647_v29, %v1898_v31  ;;  %v2035_v37 = vsel %vm1615_vm2, %v7117_v15, 0.0  ;;  %v5838_v15 = vpop.permute.xlu1 %3132 }
 0x3c5   :  { %2036 = vadd.xlane.f32.xlu0 %v2035_v37  ;;  %v4315_v46 = vpop.f32.mrf.mxu1  ;;  %7164 = vst [vmem:[#allocation13_spill] sm:$0xff] %v5838_v15 }
 0x3c6   :  { %v7122_v14 = vmax.f32 %v5819_v55, 0.0  ;;  %v5826_v30 = vadd.f32 %v4315_v46, %v5647_v29  ;;  %v2044_v32 = vsel %vm1615_vm2, %v7120_v17, 0.0 }
 0x3c7   :  { %2045 = vadd.xlane.f32.xlu1 %v2044_v32  ;;  %v1908_v0 = vpop.f32.mrf.mxu1 }
 0x3c8   :  { %v7124_v31 = vmax.f32 %v5826_v30, 0.0  ;;  %v5833_v45 = vadd.f32 %v5647_v29, %v1908_v0  ;;  %v2041_v37 = vsel %vm1615_vm2, %v7122_v14, 0.0 }
 0x3c9   :  { %2042 = vadd.xlane.f32.xlu0 %v2041_v37  ;;  %v4318_v46 = vpop.f32.mrf.mxu1 }
 0x3ca   :  { %v7128_v54 = vmax.f32 %v5833_v45, 0.0  ;;  %v5842_v35 = vadd.f32 %v4318_v46, %v5647_v29  ;;  %v2050_v32 = vsel %vm1615_vm2, %v7124_v31, 0.0  ;;  %v5861_v31 = vpop.permute.xlu1 %3135 }
 0x3cb   :  { %2051 = vadd.xlane.f32.xlu1 %v2050_v32  ;;  %v1918_v0 = vpop.f32.mrf.mxu1  ;;  %7165 = vst [vmem:[#allocation14_spill] sm:$0xff] %v5861_v31 }
 0x3cc   :  { %v7127_v17 = vmax.f32 %v5842_v35, 0.0  ;;  %v5849_v56 = vadd.f32 %v5647_v29, %v1918_v0  ;;  %v2047_v37 = vsel %vm1615_vm2, %v7128_v54, 0.0 }
 0x3cd   :  { %2048 = vadd.xlane.f32.xlu0 %v2047_v37  ;;  %v4321_v14 = vpop.f32.mrf.mxu1 }
 0x3ce   :  { %v7129_v46 = vmax.f32 %v5849_v56, 0.0  ;;  %v5856_v24 = vadd.f32 %v4321_v14, %v5647_v29  ;;  %v2056_v32 = vsel %vm1615_vm2, %v7127_v17, 0.0  ;;  %v5877_v54 = vpop.permute.xlu1 %3141 }
 0x3cf   :  { %2057 = vadd.xlane.f32.xlu1 %v2056_v32  ;;  %v1928_v0 = vpop.f32.mrf.mxu1  ;;  %7166 = vst [vmem:[#allocation15_spill] sm:$0xff] %v5877_v54 }
 0x3d0   :  { %v7132_v16 = vmax.f32 %v5856_v24, 0.0  ;;  %v5865_v28 = vadd.f32 %v5647_v29, %v1928_v0  ;;  %v2053_v37 = vsel %vm1615_vm2, %v7129_v46, 0.0 }
 0x3d1   :  { %2054 = vadd.xlane.f32.xlu0 %v2053_v37 }
 0x3d2   :  { %v7133_v14 = vmax.f32 %v5865_v28, 0.0  ;;  %v2062_v17 = vsel %vm1615_vm2, %v7132_v16, 0.0  ;;  %v5879_v29 = vpop.permute.xlu1 %3147 }
 0x3d3   :  { %2063 = vadd.xlane.f32.xlu1 %v2062_v17  ;;  %7167 = vst [vmem:[#allocation16_spill] sm:$0xff] %v5879_v29 }
 0x3d4   :  { %v2059_v32 = vsel %vm1615_vm2, %v7133_v14, 0.0 }
 0x3d5   :  { %2060 = vadd.xlane.f32.xlu0 %v2059_v32 }
 0x3d6   :  { %v5881_v0 = vpop.permute.xlu1 %3153 }
 0x3d7   :  { %7168 = vst [vmem:[#allocation17_spill] sm:$0xff] %v5881_v0 }
 0x3da   :  { %v5883_v46 = vpop.permute.xlu1 %3159 }
 0x3db   :  { %7169 = vst [vmem:[#allocation18_spill] sm:$0xff] %v5883_v46 }
 0x3de   :  { %v5885_v37 = vpop.permute.xlu1 %3165 }
 0x3df   :  { %7170 = vst [vmem:[#allocation19_spill] sm:$0xff] %v5885_v37  ;;  %v7179_v37 = vmax.f32 %v5650_v60, 0.0 }
 0x3e2   :  { %v5887_v42 = vpop.permute.xlu1 %3171 }
 0x3e3   :  { %7171 = vst [vmem:[#allocation20_spill] sm:$0xff] %v5887_v42 }
 0x3e6   :  { %v5889_v36 = vpop.permute.xlu1 %3177 }
 0x3e7   :  { %7172 = vst [vmem:[#allocation21_spill] sm:$0xff] %v5889_v36 }
 0x3ea   :  { %v5891_v17 = vpop.permute.xlu1 %3183 }
 0x3eb   :  { %7173 = vst [vmem:[#allocation22_spill] sm:$0xff] %v5891_v17  ;;  %v7180_v17 = vmax.f32 %v5654_v40, 0.0  ;;  %v7182_v40 = vmax.f32 %v5665_v22, 0.0 }
 0x3ee   :  { %v5893_v16 = vpop.permute.xlu1 %3189 }
 0x3ef   :  { %7174 = vst [vmem:[#allocation23_spill] sm:$0xff] %v5893_v16 }
 0x3f2   :  { %v5895_v14 = vpop.permute.xlu1 %3195 }
 0x3f3   :  { %7175 = vst [vmem:[#allocation24_spill] sm:$0xff] %v5895_v14 }
 0x3f6   :  { %v5897_v39 = vpop.permute.xlu1 %3201 }
 0x3f7   :  { %7176 = vst [vmem:[#allocation25_spill] sm:$0xff] %v5897_v39 }
 0x3fa   :  { %v5899_v32 = vpop.permute.xlu1 %3207 }
 0x3fb   :  { %7177 = vst [vmem:[#allocation26_spill] sm:$0xff] %v5899_v32 }
 0x3fe   :  { %v5901_v33 = vpop.permute.xlu1 %3213 }
 0x3ff   :  { %7178 = vst [vmem:[#allocation27_spill] sm:$0xff] %v5901_v33  ;;  %v7181_v33 = vmax.f32 %v5658_v61, 0.0 }
 0x420   :  { %v1974_v0 = vpop.xlane.xlu1 %1973 }
 0x421   :  { %v2067_v46 = vmul.f32 0.015625, %v1974_v0 }
 0x422   :  { %v1971_v29 = vpop.xlane.xlu0 %1970 }
 0x423   :  { %v5905_v42 = vsub.f32 %v7179_v37, %v2067_v46  ;;  %v2066_v36 = vmul.f32 0.015625, %v1971_v29 }
 0x424   :  { %v1980_v54 = vpop.xlane.xlu1 %1979 }
 0x425   :  { %v5909_v16 = vsub.f32 %v7180_v17, %v2066_v36  ;;  %v2069_v14 = vmul.f32 0.015625, %v1980_v54  ;;  %v2131_v39 = vmul.f32 %v5905_v42, %v5905_v42 }
 0x426   :  { %v1977_v32 = vpop.xlane.xlu0 %1976 }
 0x427   :  { %v5915_v31 = vsub.f32 %v7181_v33, %v2069_v14  ;;  %v2068_v0 = vmul.f32 0.015625, %v1977_v32  ;;  %v2165_v60 = vsel %vm1615_vm2, %v2131_v39, 0.0  ;;  %v2130_v46 = vmul.f32 %v5909_v16, %v5909_v16 }
 0x428   :  { %v1986_v29 = vpop.xlane.xlu1 %1985  ;;  %2166 = vadd.xlane.f32.xlu1 %v2165_v60  ;;  %v7183_v14 = vmax.f32 %v5672_v43, 0.0  ;;  %v7184_v60 = vmax.f32 %v5679_v59, 0.0 }
 0x429   :  { %v5922_v36 = vsub.f32 %v7182_v40, %v2068_v0  ;;  %v2071_v54 = vmul.f32 0.015625, %v1986_v29  ;;  %v2162_v37 = vsel %vm1615_vm2, %v2130_v46, 0.0  ;;  %v2133_v61 = vmul.f32 %v5915_v31, %v5915_v31 }
 0x42a   :  { %2163 = vadd.xlane.f32.xlu0 %v2162_v37  ;;  %v1983_v33 = vpop.xlane.xlu0 %1982  ;;  %v7185_v37 = vmax.f32 %v5686_v19, 0.0 }
 0x42b   :  { %v5929_v39 = vsub.f32 %v7183_v14, %v2071_v54  ;;  %v2070_v17 = vmul.f32 0.015625, %v1983_v33  ;;  %v2171_v32 = vsel %vm1615_vm2, %v2133_v61, 0.0  ;;  %v2132_v22 = vmul.f32 %v5922_v36, %v5922_v36 }
 0x42c   :  { %v1992_v0 = vpop.xlane.xlu1 %1991  ;;  %2172 = vadd.xlane.f32.xlu1 %v2171_v32  ;;  %v7186_v32 = vmax.f32 %v5693_v47, 0.0 }
 0x42d   :  { %v5936_v46 = vsub.f32 %v7184_v60, %v2070_v17  ;;  %v2073_v29 = vmul.f32 0.015625, %v1992_v0  ;;  %v2168_v40 = vsel %vm1615_vm2, %v2132_v22, 0.0  ;;  %v2135_v43 = vmul.f32 %v5929_v39, %v5929_v39 }
 0x42e   :  { %2169 = vadd.xlane.f32.xlu0 %v2168_v40  ;;  %v1989_v54 = vpop.xlane.xlu0 %1988  ;;  %v7187_v40 = vmax.f32 %v5700_v21, 0.0 }
 0x42f   :  { %v5943_v61 = vsub.f32 %v7185_v37, %v2073_v29  ;;  %v2072_v33 = vmul.f32 0.015625, %v1989_v54  ;;  %v2177_v14 = vsel %vm1615_vm2, %v2135_v43, 0.0  ;;  %v2134_v59 = vmul.f32 %v5936_v46, %v5936_v46 }
 0x430   :  { %v1998_v17 = vpop.xlane.xlu1 %1997  ;;  %2178 = vadd.xlane.f32.xlu1 %v2177_v14  ;;  %v7188_v14 = vmax.f32 %v5707_v38, 0.0 }
 0x431   :  { %v5950_v22 = vsub.f32 %v7186_v32, %v2072_v33  ;;  %v2075_v0 = vmul.f32 0.015625, %v1998_v17  ;;  %v2174_v60 = vsel %vm1615_vm2, %v2134_v59, 0.0  ;;  %v2137_v19 = vmul.f32 %v5943_v61, %v5943_v61 }
 0x432   :  { %2175 = vadd.xlane.f32.xlu0 %v2174_v60  ;;  %v1995_v29 = vpop.xlane.xlu0 %1994  ;;  %v7189_v60 = vmax.f32 %v5714_v23, 0.0 }
 0x433   :  { %v5957_v43 = vsub.f32 %v7187_v40, %v2075_v0  ;;  %v2074_v54 = vmul.f32 0.015625, %v1995_v29  ;;  %v2183_v37 = vsel %vm1615_vm2, %v2137_v19, 0.0  ;;  %v2136_v47 = vmul.f32 %v5950_v22, %v5950_v22 }
 0x434   :  { %v2004_v33 = vpop.xlane.xlu1 %2003  ;;  %2184 = vadd.xlane.f32.xlu1 %v2183_v37  ;;  %v7190_v37 = vmax.f32 %v5721_v5, 0.0 }
 0x435   :  { %v5964_v59 = vsub.f32 %v7188_v14, %v2074_v54  ;;  %v2077_v17 = vmul.f32 0.015625, %v2004_v33  ;;  %v2180_v32 = vsel %vm1615_vm2, %v2136_v47, 0.0  ;;  %v2139_v21 = vmul.f32 %v5957_v43, %v5957_v43 }
 0x436   :  { %2181 = vadd.xlane.f32.xlu0 %v2180_v32  ;;  %v2001_v0 = vpop.xlane.xlu0 %2000  ;;  %v7191_v32 = vmax.f32 %v5728_v44, 0.0 }
 0x437   :  { %v5971_v19 = vsub.f32 %v7189_v60, %v2077_v17  ;;  %v2076_v29 = vmul.f32 0.015625, %v2001_v0  ;;  %v2189_v40 = vsel %vm1615_vm2, %v2139_v21, 0.0  ;;  %v2138_v38 = vmul.f32 %v5964_v59, %v5964_v59 }
 0x438   :  { %v2010_v54 = vpop.xlane.xlu1 %2009  ;;  %2190 = vadd.xlane.f32.xlu1 %v2189_v40  ;;  %v7192_v40 = vmax.f32 %v5735_v9, 0.0 }
 0x439   :  { %v5978_v47 = vsub.f32 %v7190_v37, %v2076_v29  ;;  %v2079_v33 = vmul.f32 0.015625, %v2010_v54  ;;  %v2186_v14 = vsel %vm1615_vm2, %v2138_v38, 0.0  ;;  %v2141_v23 = vmul.f32 %v5971_v19, %v5971_v19 }
 0x43a   :  { %2187 = vadd.xlane.f32.xlu0 %v2186_v14  ;;  %v2007_v17 = vpop.xlane.xlu0 %2006  ;;  %v7193_v14 = vmax.f32 %v5742_v20, 0.0 }
 0x43b   :  { %v5985_v21 = vsub.f32 %v7191_v32, %v2079_v33  ;;  %v2078_v0 = vmul.f32 0.015625, %v2007_v17  ;;  %v2195_v60 = vsel %vm1615_vm2, %v2141_v23, 0.0  ;;  %v2140_v5 = vmul.f32 %v5978_v47, %v5978_v47 }
 0x43c   :  { %v2016_v29 = vpop.xlane.xlu1 %2015  ;;  %2196 = vadd.xlane.f32.xlu1 %v2195_v60  ;;  %v7194_v60 = vmax.f32 %v5749_v3, 0.0 }
 0x43d   :  { %v5992_v38 = vsub.f32 %v7192_v40, %v2078_v0  ;;  %v2081_v54 = vmul.f32 0.015625, %v2016_v29  ;;  %v2192_v37 = vsel %vm1615_vm2, %v2140_v5, 0.0  ;;  %v2143_v44 = vmul.f32 %v5985_v21, %v5985_v21 }
 0x43e   :  { %2193 = vadd.xlane.f32.xlu0 %v2192_v37  ;;  %v2013_v33 = vpop.xlane.xlu0 %2012  ;;  %v7195_v37 = vmax.f32 %v5756_v2, 0.0 }
 0x43f   :  { %v5999_v23 = vsub.f32 %v7193_v14, %v2081_v54  ;;  %v2080_v17 = vmul.f32 0.015625, %v2013_v33  ;;  %v2201_v32 = vsel %vm1615_vm2, %v2143_v44, 0.0  ;;  %v2142_v9 = vmul.f32 %v5992_v38, %v5992_v38 }
 0x440   :  { %v2022_v0 = vpop.xlane.xlu1 %2021  ;;  %2202 = vadd.xlane.f32.xlu1 %v2201_v32  ;;  %v7196_v32 = vmax.f32 %v5763_v7, 0.0 }
 0x441   :  { %v6006_v5 = vsub.f32 %v7194_v60, %v2080_v17  ;;  %v2083_v29 = vmul.f32 0.015625, %v2022_v0  ;;  %v2198_v40 = vsel %vm1615_vm2, %v2142_v9, 0.0  ;;  %v2145_v20 = vmul.f32 %v5999_v23, %v5999_v23 }
 0x442   :  { %2199 = vadd.xlane.f32.xlu0 %v2198_v40  ;;  %v2019_v54 = vpop.xlane.xlu0 %2018  ;;  %v7197_v40 = vmax.f32 %v5770_v58, 0.0 }
 0x443   :  { %v6013_v44 = vsub.f32 %v7195_v37, %v2083_v29  ;;  %v2082_v33 = vmul.f32 0.015625, %v2019_v54  ;;  %v2207_v14 = vsel %vm1615_vm2, %v2145_v20, 0.0  ;;  %v2144_v3 = vmul.f32 %v6006_v5, %v6006_v5 }
 0x444   :  { %v2028_v17 = vpop.xlane.xlu1 %2027  ;;  %2208 = vadd.xlane.f32.xlu1 %v2207_v14  ;;  %v7198_v14 = vmax.f32 %v5777_v8, 0.0 }
 0x445   :  { %v6020_v9 = vsub.f32 %v7196_v32, %v2082_v33  ;;  %v2085_v0 = vmul.f32 0.015625, %v2028_v17  ;;  %v2204_v60 = vsel %vm1615_vm2, %v2144_v3, 0.0  ;;  %v2147_v2 = vmul.f32 %v6013_v44, %v6013_v44 }
 0x446   :  { %2205 = vadd.xlane.f32.xlu0 %v2204_v60  ;;  %v2025_v29 = vpop.xlane.xlu0 %2024  ;;  %v7199_v60 = vmax.f32 %v5784_v52, 0.0 }
 0x447   :  { %v6027_v20 = vsub.f32 %v7197_v40, %v2085_v0  ;;  %v2084_v54 = vmul.f32 0.015625, %v2025_v29  ;;  %v2213_v37 = vsel %vm1615_vm2, %v2147_v2, 0.0  ;;  %v2146_v7 = vmul.f32 %v6020_v9, %v6020_v9 }
 0x448   :  { %v2034_v33 = vpop.xlane.xlu1 %2033  ;;  %2214 = vadd.xlane.f32.xlu1 %v2213_v37  ;;  %v7200_v37 = vmax.f32 %v5791_v50, 0.0 }
 0x449   :  { %v6034_v3 = vsub.f32 %v7198_v14, %v2084_v54  ;;  %v2087_v17 = vmul.f32 0.015625, %v2034_v33  ;;  %v2210_v32 = vsel %vm1615_vm2, %v2146_v7, 0.0  ;;  %v2149_v58 = vmul.f32 %v6027_v20, %v6027_v20 }
 0x44a   :  { %2211 = vadd.xlane.f32.xlu0 %v2210_v32  ;;  %v2031_v0 = vpop.xlane.xlu0 %2030  ;;  %v7201_v32 = vmax.f32 %v5798_v27, 0.0 }
 0x44b   :  { %v6041_v2 = vsub.f32 %v7199_v60, %v2087_v17  ;;  %v2086_v29 = vmul.f32 0.015625, %v2031_v0  ;;  %v2219_v40 = vsel %vm1615_vm2, %v2149_v58, 0.0  ;;  %v2148_v8 = vmul.f32 %v6034_v3, %v6034_v3 }
 0x44c   :  { %v2040_v54 = vpop.xlane.xlu1 %2039  ;;  %2220 = vadd.xlane.f32.xlu1 %v2219_v40  ;;  %v7202_v40 = vmax.f32 %v5805_v1, 0.0 }
 0x44d   :  { %v6048_v7 = vsub.f32 %v7200_v37, %v2086_v29  ;;  %v2089_v33 = vmul.f32 0.015625, %v2040_v54  ;;  %v2216_v14 = vsel %vm1615_vm2, %v2148_v8, 0.0  ;;  %v2151_v52 = vmul.f32 %v6041_v2, %v6041_v2 }
 0x44e   :  { %2217 = vadd.xlane.f32.xlu0 %v2216_v14  ;;  %v2037_v17 = vpop.xlane.xlu0 %2036  ;;  %v7203_v14 = vmax.f32 %v5812_v26, 0.0 }
 0x44f   :  { %v6055_v58 = vsub.f32 %v7201_v32, %v2089_v33  ;;  %v2088_v0 = vmul.f32 0.015625, %v2037_v17  ;;  %v2225_v60 = vsel %vm1615_vm2, %v2151_v52, 0.0  ;;  %v2150_v50 = vmul.f32 %v6048_v7, %v6048_v7 }
 0x450   :  { %v2046_v29 = vpop.xlane.xlu1 %2045  ;;  %2226 = vadd.xlane.f32.xlu1 %v2225_v60  ;;  %v7204_v60 = vmax.f32 %v5819_v55, 0.0 }
 0x451   :  { %v6062_v8 = vsub.f32 %v7202_v40, %v2088_v0  ;;  %v2091_v54 = vmul.f32 0.015625, %v2046_v29  ;;  %v2222_v37 = vsel %vm1615_vm2, %v2150_v50, 0.0  ;;  %v2153_v27 = vmul.f32 %v6055_v58, %v6055_v58 }
 0x452   :  { %2223 = vadd.xlane.f32.xlu0 %v2222_v37  ;;  %v2043_v33 = vpop.xlane.xlu0 %2042  ;;  %v7205_v37 = vmax.f32 %v5826_v30, 0.0 }
 0x453   :  { %v6069_v52 = vsub.f32 %v7203_v14, %v2091_v54  ;;  %v2090_v17 = vmul.f32 0.015625, %v2043_v33  ;;  %v2231_v32 = vsel %vm1615_vm2, %v2153_v27, 0.0  ;;  %v2152_v1 = vmul.f32 %v6062_v8, %v6062_v8 }
 0x454   :  { %v2052_v0 = vpop.xlane.xlu1 %2051  ;;  %2232 = vadd.xlane.f32.xlu1 %v2231_v32  ;;  %v7206_v32 = vmax.f32 %v5833_v45, 0.0 }
 0x455   :  { %v6076_v50 = vsub.f32 %v7204_v60, %v2090_v17  ;;  %v2093_v29 = vmul.f32 0.015625, %v2052_v0  ;;  %v2228_v40 = vsel %vm1615_vm2, %v2152_v1, 0.0  ;;  %v2155_v26 = vmul.f32 %v6069_v52, %v6069_v52 }
 0x456   :  { %2229 = vadd.xlane.f32.xlu0 %v2228_v40  ;;  %v2049_v54 = vpop.xlane.xlu0 %2048  ;;  %v7207_v40 = vmax.f32 %v5842_v35, 0.0 }
 0x457   :  { %v6083_v27 = vsub.f32 %v7205_v37, %v2093_v29  ;;  %v2092_v33 = vmul.f32 0.015625, %v2049_v54  ;;  %v2237_v14 = vsel %vm1615_vm2, %v2155_v26, 0.0  ;;  %v2154_v55 = vmul.f32 %v6076_v50, %v6076_v50 }
 0x458   :  { %v2058_v17 = vpop.xlane.xlu1 %2057  ;;  %2238 = vadd.xlane.f32.xlu1 %v2237_v14  ;;  %v7208_v14 = vmax.f32 %v5849_v56, 0.0 }
 0x459   :  { %v6090_v1 = vsub.f32 %v7206_v32, %v2092_v33  ;;  %v2095_v0 = vmul.f32 0.015625, %v2058_v17  ;;  %v2234_v60 = vsel %vm1615_vm2, %v2154_v55, 0.0  ;;  %v2157_v30 = vmul.f32 %v6083_v27, %v6083_v27 }
 0x45a   :  { %2235 = vadd.xlane.f32.xlu0 %v2234_v60  ;;  %v2055_v29 = vpop.xlane.xlu0 %2054  ;;  %v7209_v60 = vmax.f32 %v5856_v24, 0.0 }
 0x45b   :  { %v6097_v26 = vsub.f32 %v7207_v40, %v2095_v0  ;;  %v2094_v54 = vmul.f32 0.015625, %v2055_v29  ;;  %v2243_v37 = vsel %vm1615_vm2, %v2157_v30, 0.0  ;;  %v2156_v45 = vmul.f32 %v6090_v1, %v6090_v1 }
 0x45c   :  { %2244 = vadd.xlane.f32.xlu1 %v2243_v37  ;;  %v2064_v33 = vpop.xlane.xlu1 %2063 }
 0x45d   :  { %v6104_v55 = vsub.f32 %v7208_v14, %v2094_v54  ;;  %v2097_v17 = vmul.f32 0.015625, %v2064_v33  ;;  %v2240_v32 = vsel %vm1615_vm2, %v2156_v45, 0.0  ;;  %v2159_v35 = vmul.f32 %v6097_v26, %v6097_v26 }
 0x45e   :  { %2241 = vadd.xlane.f32.xlu0 %v2240_v32  ;;  %v2061_v0 = vpop.xlane.xlu0 %2060  ;;  %v7210_v54 = vmax.f32 %v5865_v28, 0.0  ;;  %v6130_v28 = vld [vmem:[%s7079_s3 + $0xf0] sm:$0xff] }
 0x45f   :  { %v6111_v30 = vsub.f32 %v7209_v60, %v2097_v17  ;;  %v2096_v29 = vmul.f32 0.015625, %v2061_v0  ;;  %v2249_v40 = vsel %vm1615_vm2, %v2159_v35, 0.0  ;;  %v2158_v56 = vmul.f32 %v6104_v55, %v6104_v55  ;;  %7212 = vst [vmem:[#allocation29_spill] sm:$0xff] %v6130_v28  ;;  %v751_v0 = vld [vmem:[%s7083_s7 + $0x7] sm:$0x1] }
 0x460   :  { %2250 = vadd.xlane.f32.xlu1 %v2249_v40  ;;  %v7136_v32 = vcvt.f32.s32 %v6130_v28  ;;  %v7137_v35 = vmov 1   ;;  %4322 = vpush %v751_v0 }
 0x461   :  { %v6118_v37 = vsub.f32 %v7210_v54, %v2096_v29  ;;  %v2246_v45 = vsel %vm1615_vm2, %v2158_v56, 0.0  ;;  %v2161_v33 = vmul.f32 %v6111_v30, %v6111_v30  ;;  %4427 = vset.pattern.permute.xlu0 %v7137_v35 }
 0x462   :  { %2247 = vadd.xlane.f32.xlu0 %v2246_v45 }
 0x463   :  { %7211 = vst [vmem:[#allocation28_spill] sm:$0xff] %v6118_v37  ;;  %v2255_v24 = vsel %vm1615_vm2, %v2161_v33, 0.0  ;;  %v2160_v14 = vmul.f32 %v6118_v37, %v6118_v37 }
 0x464   :  { %2256 = vadd.xlane.f32.xlu1 %v2255_v24 }
 0x465   :  { %v2252_v17 = vsel %vm1615_vm2, %v2160_v14, 0.0 }
 0x466   :  { %2253 = vadd.xlane.f32.xlu0 %v2252_v17 }
 0x475   :  { %3219 = vperm.xlu1 %4425, %v7136_v32  }
 0x479   :  { %4426 = vset.pattern.permute.xlu1 %v7137_v35 }
 0x4b1   :  { %v2167_v60 = vpop.xlane.xlu1 %2166 }
 0x4b2   :  { %v2259_v29 = vmul.f32 0.015625, %v2167_v60 }
 0x4b3   :  { %v2164_v40 = vpop.xlane.xlu0 %2163 }
 0x4b4   :  { %v2291_v56 = vadd.f32 1e-05, %v2259_v29  ;;  %v2258_v54 = vmul.f32 0.015625, %v2164_v40 }
 0x4b5   :  { %v2173_v45 = vpop.xlane.xlu1 %2172 }
 0x4b6   :  { %4560 = vrsqrt.f32 %v2291_v56  ;;  %v2290_v33 = vadd.f32 1e-05, %v2258_v54  ;;  %v2261_v24 = vmul.f32 0.015625, %v2173_v45 }
 0x4b7   :  { %v2170_v14 = vpop.xlane.xlu0 %2169 }
 0x4b8   :  { %4562 = vrsqrt.f32 %v2290_v33  ;;  %v2293_v17 = vadd.f32 1e-05, %v2261_v24  ;;  %v2260_v32 = vmul.f32 0.015625, %v2170_v14 }
 0x4b9   :  { %v2179_v15 = vpop.xlane.xlu1 %2178 }
 0x4ba   :  { %4564 = vrsqrt.f32 %v2293_v17  ;;  %v2292_v35 = vadd.f32 1e-05, %v2260_v32  ;;  %v2263_v11 = vmul.f32 0.015625, %v2179_v15  ;;  %v6143_v15 = vld [vmem:[%s7083_s7 + $0x4] ss:$0 sm:$0xff] }
 0x4bb   :  { %v2176_v4 = vpop.xlane.xlu0 %2175 }
 0x4bc   :  { %4566 = vrsqrt.f32 %v2292_v35  ;;  %v2295_v0 = vadd.f32 1e-05, %v2263_v11  ;;  %v2262_v28 = vmul.f32 0.015625, %v2176_v4 }
 0x4bd   :  { %v2185_v60 = vpop.xlane.xlu1 %2184 }
 0x4be   :  { %4568 = vrsqrt.f32 %v2295_v0  ;;  %v2294_v29 = vadd.f32 1e-05, %v2262_v28  ;;  %v2265_v40 = vmul.f32 0.015625, %v2185_v60 }
 0x4bf   :  { %v2182_v10 = vpop.xlane.xlu0 %2181 }
 0x4c0   :  { %4570 = vrsqrt.f32 %v2294_v29  ;;  %v2297_v56 = vadd.f32 1e-05, %v2265_v40  ;;  %v2264_v54 = vmul.f32 0.015625, %v2182_v10  ;;  %v6149_v10 = vld [vmem:[%s7083_s7 + $0x5] ss:$0 sm:$0xff] }
 0x4c1   :  { %v2191_v45 = vpop.xlane.xlu1 %2190 }
 0x4c2   :  { %4572 = vrsqrt.f32 %v2297_v56  ;;  %v2296_v33 = vadd.f32 1e-05, %v2264_v54  ;;  %v2267_v24 = vmul.f32 0.015625, %v2191_v45  ;;  %v6155_v54 = vld [vmem:[%s7083_s7 + $0x6] ss:$0 sm:$0xff] }
 0x4c3   :  { %v4561_v14 = vpop.eup %4560  ;;  %v2188_v17 = vpop.xlane.xlu0 %2187 }
 0x4c4   :  { %4574 = vrsqrt.f32 %v2296_v33  ;;  %v2299_v4 = vadd.f32 1e-05, %v2267_v24  ;;  %v2266_v11 = vmul.f32 0.015625, %v2188_v17  ;;  %v2355_v28 = vmul.f32 %v4561_v14, %v5905_v42 }
 0x4c5   :  { %v4563_v32 = vpop.eup %4562  ;;  %v2197_v35 = vpop.xlane.xlu1 %2196 }
 0x4c6   :  { %4576 = vrsqrt.f32 %v2299_v4  ;;  %v2298_v0 = vadd.f32 1e-05, %v2266_v11  ;;  %v2269_v60 = vmul.f32 0.015625, %v2197_v35  ;;  %v2391_v29 = vmul.f32 %v6143_v15, %v2355_v28 }
 0x4c7   :  { %v4565_v40 = vpop.eup %4564  ;;  %v2194_v56 = vpop.xlane.xlu0 %2193  ;;  %v2354_v42 = vmul.f32 %v4563_v32, %v5909_v16 }
 0x4c8   :  { %4578 = vrsqrt.f32 %v2298_v0  ;;  %v2301_v45 = vadd.f32 1e-05, %v2269_v60  ;;  %v2268_v33 = vmul.f32 0.015625, %v2194_v56  ;;  %v2427_v24 = vadd.f32 %v6149_v10, %v2391_v29 }
 0x4c9   :  { %v4567_v14 = vpop.eup %4566  ;;  %v2203_v17 = vpop.xlane.xlu1 %2202  ;;  %v2390_v4 = vmul.f32 %v6143_v15, %v2354_v42  ;;  %v2357_v11 = vmul.f32 %v4565_v40, %v5915_v31 }
 0x4ca   :  { %4580 = vrsqrt.f32 %v2301_v45  ;;  %v2300_v28 = vadd.f32 1e-05, %v2268_v33  ;;  %v2271_v35 = vmul.f32 0.015625, %v2203_v17  ;;  %v2463_v37 = vmul.f32 %v6155_v54, %v2427_v24 }
 0x4cb   :  { %v4569_v18 = vpop.eup %4568  ;;  %v2200_v63 = vpop.xlane.xlu0 %2199  ;;  %v2426_v16 = vadd.f32 %v6149_v10, %v2390_v4  ;;  %v2393_v32 = vmul.f32 %v6143_v15, %v2357_v11  ;;  %v2356_v0 = vmul.f32 %v4567_v14, %v5922_v36 }
 0x4cc   :  { %4582 = vrsqrt.f32 %v2300_v28  ;;  %v2303_v60 = vadd.f32 1e-05, %v2271_v35  ;;  %v2270_v29 = vmul.f32 0.015625, %v2200_v63  ;;  %v2497_v56 = vsel %vm1615_vm2, %v2463_v37, 0.0 }
 0x4cd   :  { %v4571_v42 = vpop.eup %4570  ;;  %2498 = vadd.xlane.f32.xlu1 %v2497_v56  ;;  %v2209_v31 = vpop.xlane.xlu1 %2208  ;;  %v2462_v40 = vmul.f32 %v6155_v54, %v2426_v16  ;;  %v2429_v45 = vadd.f32 %v6149_v10, %v2393_v32  ;;  %v2392_v33 = vmul.f32 %v6143_v15, %v2356_v0  ;;  %v2359_v24 = vmul.f32 %v4569_v18, %v5929_v39 }
 0x4ce   :  { %4584 = vrsqrt.f32 %v2303_v60  ;;  %v2302_v17 = vadd.f32 1e-05, %v2270_v29  ;;  %v2273_v4 = vmul.f32 0.015625, %v2209_v31  ;;  %v2358_v36 = vmul.f32 %v4571_v42, %v5936_v46 }
 0x4cf   :  { %v4573_v14 = vpop.eup %4572  ;;  %v2494_v63 = vsel %vm1615_vm2, %v2462_v40, 0.0  ;;  %v2206_v37 = vpop.xlane.xlu0 %2205  ;;  %v2465_v11 = vmul.f32 %v6155_v54, %v2429_v45  ;;  %v2428_v28 = vadd.f32 %v6149_v10, %v2392_v33  ;;  %v2395_v35 = vmul.f32 %v6143_v15, %v2359_v24 }
 0x4d0   :  { %4586 = vrsqrt.f32 %v2302_v17  ;;  %v2305_v16 = vadd.f32 1e-05, %v2273_v4  ;;  %2495 = vadd.xlane.f32.xlu0 %v2494_v63  ;;  %v2272_v32 = vmul.f32 0.015625, %v2206_v37  ;;  %v2394_v18 = vmul.f32 %v6143_v15, %v2358_v36 }
 0x4d1   :  { %v4575_v39 = vpop.eup %4574  ;;  %v2503_v0 = vsel %vm1615_vm2, %v2465_v11, 0.0  ;;  %v2215_v46 = vpop.xlane.xlu1 %2214  ;;  %v2464_v60 = vmul.f32 %v6155_v54, %v2428_v28  ;;  %v2431_v29 = vadd.f32 %v6149_v10, %v2395_v35  ;;  %v2361_v56 = vmul.f32 %v4573_v14, %v5943_v61 }
 0x4d2   :  { %4588 = vrsqrt.f32 %v2305_v16  ;;  %v2304_v42 = vadd.f32 1e-05, %v2272_v32  ;;  %2504 = vadd.xlane.f32.xlu1 %v2503_v0  ;;  %v2275_v31 = vmul.f32 0.015625, %v2215_v46  ;;  %v2430_v40 = vadd.f32 %v6149_v10, %v2394_v18 }
 0x4d3   :  { %v4577_v45 = vpop.eup %4576  ;;  %v2500_v33 = vsel %vm1615_vm2, %v2464_v60, 0.0  ;;  %v2212_v24 = vpop.xlane.xlu0 %2211  ;;  %v2467_v17 = vmul.f32 %v6155_v54, %v2431_v29  ;;  %v2397_v4 = vmul.f32 %v6143_v15, %v2361_v56  ;;  %v2360_v36 = vmul.f32 %v4575_v39, %v5950_v22 }
 0x4d4   :  { %4590 = vrsqrt.f32 %v2304_v42  ;;  %v2307_v63 = vadd.f32 1e-05, %v2275_v31  ;;  %2501 = vadd.xlane.f32.xlu0 %v2500_v33  ;;  %v2274_v61 = vmul.f32 0.015625, %v2212_v24  ;;  %v2466_v14 = vmul.f32 %v6155_v54, %v2430_v40 }
 0x4d5   :  { %v4579_v37 = vpop.eup %4578  ;;  %v2509_v11 = vsel %vm1615_vm2, %v2467_v17, 0.0  ;;  %v2221_v28 = vpop.xlane.xlu1 %2220  ;;  %v2433_v35 = vadd.f32 %v6149_v10, %v2397_v4  ;;  %v2396_v16 = vmul.f32 %v6143_v15, %v2360_v36  ;;  %v2363_v32 = vmul.f32 %v4577_v45, %v5957_v43 }
 0x4d6   :  { %4592 = vrsqrt.f32 %v2307_v63  ;;  %v2306_v18 = vadd.f32 1e-05, %v2274_v61  ;;  %2510 = vadd.xlane.f32.xlu1 %v2509_v11  ;;  %v2277_v22 = vmul.f32 0.015625, %v2221_v28  ;;  %v2506_v39 = vsel %vm1615_vm2, %v2466_v14, 0.0 }
 0x4d7   :  { %v4581_v0 = vpop.eup %4580  ;;  %v2218_v46 = vpop.xlane.xlu0 %2217  ;;  %v2469_v60 = vmul.f32 %v6155_v54, %v2433_v35  ;;  %v2432_v29 = vadd.f32 %v6149_v10, %v2396_v16  ;;  %v2399_v56 = vmul.f32 %v6143_v15, %v2363_v32  ;;  %v2362_v42 = vmul.f32 %v4579_v37, %v5964_v59 }
 0x4d8   :  { %4594 = vrsqrt.f32 %v2306_v18  ;;  %v2309_v31 = vadd.f32 1e-05, %v2277_v22  ;;  %2507 = vadd.xlane.f32.xlu0 %v2506_v39  ;;  %v2276_v43 = vmul.f32 0.015625, %v2218_v46  ;;  %v2365_v40 = vmul.f32 %v4581_v0, %v5971_v19 }
 0x4d9   :  { %v4583_v45 = vpop.eup %4582  ;;  %v2515_v33 = vsel %vm1615_vm2, %v2469_v60, 0.0  ;;  %v2227_v24 = vpop.xlane.xlu1 %2226  ;;  %v2468_v17 = vmul.f32 %v6155_v54, %v2432_v29  ;;  %v2435_v4 = vadd.f32 %v6149_v10, %v2399_v56  ;;  %v2398_v36 = vmul.f32 %v6143_v15, %v2362_v42 }
 0x4da   :  { %4596 = vrsqrt.f32 %v2309_v31  ;;  %v2308_v63 = vadd.f32 1e-05, %v2276_v43  ;;  %2516 = vadd.xlane.f32.xlu1 %v2515_v33  ;;  %v2279_v59 = vmul.f32 0.015625, %v2227_v24  ;;  %v2401_v61 = vmul.f32 %v6143_v15, %v2365_v40 }
 0x4db   :  { %v4585_v14 = vpop.eup %4584  ;;  %v2512_v37 = vsel %vm1615_vm2, %v2468_v17, 0.0  ;;  %v2224_v19 = vpop.xlane.xlu0 %2223  ;;  %v2471_v11 = vmul.f32 %v6155_v54, %v2435_v4  ;;  %v2434_v28 = vadd.f32 %v6149_v10, %v2398_v36  ;;  %v2364_v35 = vmul.f32 %v4583_v45, %v5978_v47 }
 0x4dc   :  { %4598 = vrsqrt.f32 %v2308_v63  ;;  %v2311_v16 = vadd.f32 1e-05, %v2279_v59  ;;  %2513 = vadd.xlane.f32.xlu0 %v2512_v37  ;;  %v2278_v32 = vmul.f32 0.015625, %v2224_v19  ;;  %v2437_v18 = vadd.f32 %v6149_v10, %v2401_v61 }
 0x4dd   :  { %v4587_v22 = vpop.eup %4586  ;;  %v2521_v39 = vsel %vm1615_vm2, %v2471_v11, 0.0  ;;  %v2233_v0 = vpop.xlane.xlu1 %2232  ;;  %v2470_v46 = vmul.f32 %v6155_v54, %v2434_v28  ;;  %v2400_v60 = vmul.f32 %v6143_v15, %v2364_v35  ;;  %v2367_v29 = vmul.f32 %v4585_v14, %v5985_v21 }
 0x4de   :  { %4600 = vrsqrt.f32 %v2311_v16  ;;  %v2310_v56 = vadd.f32 1e-05, %v2278_v32  ;;  %2522 = vadd.xlane.f32.xlu1 %v2521_v39  ;;  %v2281_v47 = vmul.f32 0.015625, %v2233_v0  ;;  %v2473_v42 = vmul.f32 %v6155_v54, %v2437_v18 }
 0x4df   :  { %v4589_v31 = vpop.eup %4588  ;;  %v2518_v43 = vsel %vm1615_vm2, %v2470_v46, 0.0  ;;  %v2230_v40 = vpop.xlane.xlu0 %2229  ;;  %v2436_v45 = vadd.f32 %v6149_v10, %v2400_v60  ;;  %v2403_v33 = vmul.f32 %v6143_v15, %v2367_v29  ;;  %v2366_v24 = vmul.f32 %v4587_v22, %v5992_v38 }
 0x4e0   :  { %4602 = vrsqrt.f32 %v2310_v56  ;;  %v2313_v17 = vadd.f32 1e-05, %v2281_v47  ;;  %2519 = vadd.xlane.f32.xlu0 %v2518_v43  ;;  %v2280_v21 = vmul.f32 0.015625, %v2230_v40  ;;  %v2527_v4 = vsel %vm1615_vm2, %v2473_v42, 0.0 }
 0x4e1   :  { %v4591_v36 = vpop.eup %4590  ;;  %v2239_v63 = vpop.xlane.xlu1 %2238  ;;  %v2472_v59 = vmul.f32 %v6155_v54, %v2436_v45  ;;  %v2439_v61 = vadd.f32 %v6149_v10, %v2403_v33  ;;  %v2402_v14 = vmul.f32 %v6143_v15, %v2366_v24  ;;  %v2369_v37 = vmul.f32 %v4589_v31, %v5999_v23 }
 0x4e2   :  { %4604 = vrsqrt.f32 %v2313_v17  ;;  %v2312_v19 = vadd.f32 1e-05, %v2280_v21  ;;  %2528 = vadd.xlane.f32.xlu1 %v2527_v4  ;;  %v2283_v38 = vmul.f32 0.015625, %v2239_v63  ;;  %v2368_v11 = vmul.f32 %v4591_v36, %v6006_v5 }
 0x4e3   :  { %v4593_v28 = vpop.eup %4592  ;;  %v2524_v35 = vsel %vm1615_vm2, %v2472_v59, 0.0  ;;  %v2236_v16 = vpop.xlane.xlu0 %2235  ;;  %v2475_v32 = vmul.f32 %v6155_v54, %v2439_v61  ;;  %v2438_v18 = vadd.f32 %v6149_v10, %v2402_v14  ;;  %v2405_v22 = vmul.f32 %v6143_v15, %v2369_v37 }
 0x4e4   :  { %4606 = vrsqrt.f32 %v2312_v19  ;;  %v2315_v39 = vadd.f32 1e-05, %v2283_v38  ;;  %2525 = vadd.xlane.f32.xlu0 %v2524_v35  ;;  %v2282_v23 = vmul.f32 0.015625, %v2236_v16  ;;  %v2404_v0 = vmul.f32 %v6143_v15, %v2368_v11 }
 0x4e5   :  { %v4595_v46 = vpop.eup %4594  ;;  %v2533_v60 = vsel %vm1615_vm2, %v2475_v32, 0.0  ;;  %v2245_v5 = vpop.xlane.xlu1 %2244  ;;  %v2474_v29 = vmul.f32 %v6155_v54, %v2438_v18  ;;  %v2441_v56 = vadd.f32 %v6149_v10, %v2405_v22  ;;  %v2371_v47 = vmul.f32 %v4593_v28, %v6013_v44 }
 0x4e6   :  { %4608 = vrsqrt.f32 %v2315_v39  ;;  %v2314_v42 = vadd.f32 1e-05, %v2282_v23  ;;  %2534 = vadd.xlane.f32.xlu1 %v2533_v60  ;;  %v2285_v31 = vmul.f32 0.015625, %v2245_v5  ;;  %v2440_v43 = vadd.f32 %v6149_v10, %v2404_v0 }
 0x4e7   :  { %v4597_v40 = vpop.eup %4596  ;;  %v2530_v45 = vsel %vm1615_vm2, %v2474_v29, 0.0  ;;  %v2242_v33 = vpop.xlane.xlu0 %2241  ;;  %v2477_v24 = vmul.f32 %v6155_v54, %v2441_v56  ;;  %v2407_v17 = vmul.f32 %v6143_v15, %v2371_v47  ;;  %v2370_v21 = vmul.f32 %v4595_v46, %v6020_v9 }
 0x4e8   :  { %4610 = vrsqrt.f32 %v2314_v42  ;;  %v2317_v4 = vadd.f32 1e-05, %v2285_v31  ;;  %2531 = vadd.xlane.f32.xlu0 %v2530_v45  ;;  %v2284_v44 = vmul.f32 0.015625, %v2242_v33  ;;  %v2476_v36 = vmul.f32 %v6155_v54, %v2440_v43 }
 0x4e9   :  { %v4599_v63 = vpop.eup %4598  ;;  %v2539_v59 = vsel %vm1615_vm2, %v2477_v24, 0.0  ;;  %v2251_v61 = vpop.xlane.xlu1 %2250  ;;  %v2443_v14 = vadd.f32 %v6149_v10, %v2407_v17  ;;  %v2406_v37 = vmul.f32 %v6143_v15, %v2370_v21  ;;  %v2373_v19 = vmul.f32 %v4597_v40, %v6027_v20 }
 0x4ea   :  { %4612 = vrsqrt.f32 %v2317_v4  ;;  %v2316_v38 = vadd.f32 1e-05, %v2284_v44  ;;  %2540 = vadd.xlane.f32.xlu1 %v2539_v59  ;;  %v2287_v9 = vmul.f32 0.015625, %v2251_v61  ;;  %v2536_v11 = vsel %vm1615_vm2, %v2476_v36, 0.0 }
 0x4eb   :  { %v4601_v28 = vpop.eup %4600  ;;  %v2248_v35 = vpop.xlane.xlu0 %2247  ;;  %v2479_v16 = vmul.f32 %v6155_v54, %v2443_v14  ;;  %v2442_v32 = vadd.f32 %v6149_v10, %v2406_v37  ;;  %v2409_v18 = vmul.f32 %v6143_v15, %v2373_v19  ;;  %v2372_v22 = vmul.f32 %v4599_v63, %v6034_v3 }
 0x4ec   :  { %4614 = vrsqrt.f32 %v2316_v38  ;;  %v2319_v39 = vadd.f32 1e-05, %v2287_v9  ;;  %2537 = vadd.xlane.f32.xlu0 %v2536_v11  ;;  %v2286_v20 = vmul.f32 0.015625, %v2248_v35  ;;  %v2375_v23 = vmul.f32 %v4601_v28, %v6041_v2 }
 0x4ed   :  { %v4603_v0 = vpop.eup %4602  ;;  %v2545_v46 = vsel %vm1615_vm2, %v2479_v16, 0.0  ;;  %v2257_v60 = vpop.xlane.xlu1 %2256  ;;  %v2478_v5 = vmul.f32 %v6155_v54, %v2442_v32  ;;  %v2445_v29 = vadd.f32 %v6149_v10, %v2409_v18  ;;  %v2408_v56 = vmul.f32 %v6143_v15, %v2372_v22 }
 0x4ee   :  { %4616 = vrsqrt.f32 %v2319_v39  ;;  %v2318_v47 = vadd.f32 1e-05, %v2286_v20  ;;  %2546 = vadd.xlane.f32.xlu1 %v2545_v46  ;;  %v2289_v3 = vmul.f32 0.015625, %v2257_v60  ;;  %v2411_v42 = vmul.f32 %v6143_v15, %v2375_v23 }
 0x4ef   :  { %v4605_v31 = vpop.eup %4604  ;;  %v2542_v43 = vsel %vm1615_vm2, %v2478_v5, 0.0  ;;  %v2481_v2 = vmul.f32 %v6155_v54, %v2445_v29  ;;  %v2444_v40 = vadd.f32 %v6149_v10, %v2408_v56  ;;  %v2374_v45 = vmul.f32 %v4603_v0, %v6048_v7 }
 0x4f0   :  { %4618 = vrsqrt.f32 %v2318_v47  ;;  %v2321_v33 = vadd.f32 1e-05, %v2289_v3  ;;  %2543 = vadd.xlane.f32.xlu0 %v2542_v43  ;;  %v2447_v24 = vadd.f32 %v6149_v10, %v2411_v42  ;;  %v2377_v36 = vmul.f32 %v4605_v31, %v6055_v58 }
 0x4f1   :  { %v4607_v17 = vpop.eup %4606  ;;  %v2551_v21 = vsel %vm1615_vm2, %v2481_v2, 0.0  ;;  %v2480_v4 = vmul.f32 %v6155_v54, %v2444_v40  ;;  %v2410_v44 = vmul.f32 %v6143_v15, %v2374_v45 }
 0x4f2   :  { %4620 = vrsqrt.f32 %v2321_v33  ;;  %2552 = vadd.xlane.f32.xlu1 %v2551_v21  ;;  %v2483_v63 = vmul.f32 %v6155_v54, %v2447_v24  ;;  %v2376_v7 = vmul.f32 %v4607_v17, %v6062_v8  ;;  %v2413_v37 = vmul.f32 %v6143_v15, %v2377_v36 }
 0x4f3   :  { %v4609_v59 = vpop.eup %4608  ;;  %v2548_v61 = vsel %vm1615_vm2, %v2480_v4, 0.0  ;;  %v2446_v14 = vadd.f32 %v6149_v10, %v2410_v44 }
 0x4f4   :  { %2549 = vadd.xlane.f32.xlu0 %v2548_v61  ;;  %v2557_v19 = vsel %vm1615_vm2, %v2483_v63, 0.0  ;;  %v2412_v38 = vmul.f32 %v6143_v15, %v2376_v7  ;;  %v2379_v58 = vmul.f32 %v4609_v59, %v6069_v52  ;;  %v2449_v28 = vadd.f32 %v6149_v10, %v2413_v37 }
 0x4f5   :  { %v4611_v9 = vpop.eup %4610  ;;  %v2482_v11 = vmul.f32 %v6155_v54, %v2446_v14 }
 0x4f6   :  { %2558 = vadd.xlane.f32.xlu1 %v2557_v19  ;;  %v2448_v8 = vadd.f32 %v6149_v10, %v2412_v38  ;;  %v2415_v35 = vmul.f32 %v6143_v15, %v2379_v58  ;;  %v2378_v16 = vmul.f32 %v4611_v9, %v6076_v50  ;;  %v2485_v22 = vmul.f32 %v6155_v54, %v2449_v28 }
 0x4f7   :  { %v4613_v32 = vpop.eup %4612  ;;  %v2554_v18 = vsel %vm1615_vm2, %v2482_v11, 0.0  ;;  %v7213_v58 = vcvt.f32.s32 %v5457_v41  ;;  %v7214_v9 = vcvt.f32.s32 %v5472_v12  ;;  %v7215_v11 = vcvt.f32.s32 %v5480_v57  ;;  %v2254_v57 = vpop.xlane.xlu0 %2253 }
 0x4f8   :  { %2555 = vadd.xlane.f32.xlu0 %v2554_v18  ;;  %v2484_v52 = vmul.f32 %v6155_v54, %v2448_v8  ;;  %v2451_v39 = vadd.f32 %v6149_v10, %v2415_v35  ;;  %v2414_v20 = vmul.f32 %v6143_v15, %v2378_v16  ;;  %v2381_v23 = vmul.f32 %v4613_v32, %v6083_v27 }
 0x4f9   :  { %v4615_v0 = vpop.eup %4614  ;;  %v2563_v46 = vsel %vm1615_vm2, %v2485_v22, 0.0  ;;  %v7216_v28 = vcvt.f32.s32 %v5488_v62  ;;  %v7217_v8 = vcvt.f32.s32 %v5496_v51  ;;  %v7218_v35 = vcvt.f32.s32 %v5504_v13  ;;  %v3064_v51 = vld [vmem:[%s7079_s3] sm:$0xff] }
 0x4fa   :  { %2564 = vadd.xlane.f32.xlu1 %v2563_v46  ;;  %v2560_v50 = vsel %vm1615_vm2, %v2484_v52, 0.0  ;;  %v2487_v60 = vmul.f32 %v6155_v54, %v2451_v39  ;;  %v2450_v5 = vadd.f32 %v6149_v10, %v2414_v20  ;;  %v2417_v29 = vmul.f32 %v6143_v15, %v2381_v23  ;;  %v7227_v52 = vld [vmem:[#allocation11_spill] sm:$0xff] }
 0x4fb   :  { %v4617_v56 = vpop.eup %4616  ;;  %v2380_v47 = vmul.f32 %v4615_v0, %v6090_v1  ;;  %v7219_v16 = vcvt.f32.s32 %v5512_v34  ;;  %v7220_v41 = vcvt.f32.s32 %v5520_v53  ;;  %v7221_v12 = vcvt.f32.s32 %v5528_v25  ;;  %v3067_v25 = vld [vmem:[%s7079_s3 + $0x18] sm:$0xff] }
 0x4fc   :  { %2561 = vadd.xlane.f32.xlu0 %v2560_v50  ;;  %v2569_v3 = vsel %vm1615_vm2, %v2487_v60, 0.0  ;;  %v2486_v27 = vmul.f32 %v6155_v54, %v2450_v5  ;;  %v2453_v42 = vadd.f32 %v6149_v10, %v2417_v29  ;;  %v2383_v31 = vmul.f32 %v4617_v56, %v6097_v26  ;;  %v7229_v60 = vld [vmem:[#allocation28_spill] sm:$0xff] }
 0x4fd   :  { %v4619_v43 = vpop.eup %4618  ;;  %v2416_v2 = vmul.f32 %v6143_v15, %v2380_v47  ;;  %v7222_v32 = vcvt.f32.s32 %v5536_v48  ;;  %v2288_v62 = vmul.f32 0.015625, %v2254_v57  ;;  %v7223_v13 = vcvt.f32.s32 %v5544_v6  ;;  %v7225_v48 = vld [vmem:[#allocation10_spill] sm:$0xff]  ;;  %v3069_v6 = vld [vmem:[%s7079_s3 + $0x28] sm:$0xff] }
 0x4fe   :  { %2570 = vadd.xlane.f32.xlu1 %v2569_v3  ;;  %v2566_v40 = vsel %vm1615_vm2, %v2486_v27, 0.0  ;;  %v2489_v45 = vmul.f32 %v6155_v54, %v2453_v42  ;;  %v2419_v33 = vmul.f32 %v6143_v15, %v2383_v31  ;;  %v2382_v1 = vmul.f32 %v4619_v43, %v6104_v55 }
 0x4ff   :  { %v4621_v24 = vpop.eup %4620  ;;  %v2452_v17 = vadd.f32 %v6149_v10, %v2416_v2  ;;  %v4326_v34 = vcvt.f32.s32 %v3064_v51  ;;  %v2320_v18 = vadd.f32 1e-05, %v2288_v62  ;;  %v7224_v53 = vcvt.f32.s32 %v5552_v49  ;;  %v3071_v49 = vld [vmem:[%s7079_s3 + $0x38] sm:$0xff]  ;;  %v6467_v62 = vld [vmem:[%s7079_s3 + $0xc8] sm:$0xff] }
 0x500   :  { %2567 = vadd.xlane.f32.xlu0 %v2566_v40  ;;  %v2575_v21 = vsel %vm1615_vm2, %v2489_v45, 0.0  ;;  %v2455_v26 = vadd.f32 %v6149_v10, %v2419_v33  ;;  %v2418_v4 = vmul.f32 %v6143_v15, %v2382_v1  ;;  %v2385_v44 = vmul.f32 %v4621_v24, %v6111_v30  ;;  %v7230_v33 = vld [vmem:[#allocation12_spill] sm:$0xff] }
 0x501   :  { %v2488_v36 = vmul.f32 %v6155_v54, %v2452_v17  ;;  %4622 = vrsqrt.f32 %v2320_v18  ;;  %v7226_v22 = vcvt.f32.s32 %v7225_v48  ;;  %v7228_v39 = vcvt.f32.s32 %v7227_v52  ;;  %v6489_v48 = vld [vmem:[%s7079_s3 + $0xe8] sm:$0xff] }
 0x502   :  { %2576 = vadd.xlane.f32.xlu1 %v2575_v21  ;;  %v2491_v63 = vmul.f32 %v6155_v54, %v2455_v26  ;;  %v2454_v7 = vadd.f32 %v6149_v10, %v2418_v4  ;;  %v2421_v55 = vmul.f32 %v6143_v15, %v2385_v44  ;;  %v4335_v20 = vcvt.f32.s32 %v3067_v25  ;;  %v6392_v21 = vld [vmem:[%s7079_s3 + $0x68] sm:$0xff] }
 0x503   :  { %v2572_v59 = vsel %vm1615_vm2, %v2488_v36, 0.0  ;;  %v4341_v23 = vcvt.f32.s32 %v3069_v6  ;;  %v4347_v0 = vcvt.f32.s32 %v3071_v49  ;;  %v7231_v1 = vcvt.f32.s32 %v7230_v33  ;;  %v7232_v26 = vld [vmem:[#allocation29_spill] sm:$0xff] }
 0x504   :  { %2573 = vadd.xlane.f32.xlu0 %v2572_v59  ;;  %v2581_v61 = vsel %vm1615_vm2, %v2491_v63, 0.0  ;;  %v2490_v14 = vmul.f32 %v6155_v54, %v2454_v7  ;;  %v2457_v37 = vadd.f32 %v6149_v10, %v2421_v55  ;;  %v7233_v4 = vcvt.f32.s32 %v7232_v26  ;;  %v6408_v59 = vpop.permute.xlu1 %3219 }
 0x505   :  { %v7156_v36 = vcvt.f32.s32 %v6392_v21  ;;  %v7234_v63 = vmov 0  }
 0x506   :  { %2582 = vadd.xlane.f32.xlu1 %v2581_v61  ;;  %v2578_v30 = vsel %vm1615_vm2, %v2490_v14, 0.0  ;;  %v2493_v19 = vmul.f32 %v6155_v54, %v2457_v37  ;;  %v6413_v61 = vld [vmem:[%s7079_s3 + $0x78] sm:$0xff] }
 0x507   :  { %v7155_v14 = vcvt.f32.s32 %v6413_v61 }
 0x508   :  { %2579 = vadd.xlane.f32.xlu0 %v2578_v30  ;;  %v2587_v38 = vsel %vm1615_vm2, %v2493_v19, 0.0  ;;  %v6425_v19 = vld [vmem:[%s7079_s3 + $0x88] sm:$0xff] }
 0x50a   :  { %2588 = vadd.xlane.f32.xlu1 %v2587_v38  ;;  %v7154_v38 = vcvt.f32.s32 %v6425_v19 }
 0x50e   :  { %v4623_v46 = vpop.eup %4622 }
 0x50f   :  { %v2384_v5 = vmul.f32 %v4623_v46, %v7229_v60 }
 0x511   :  { %v2420_v56 = vmul.f32 %v6143_v15, %v2384_v5 }
 0x513   :  { %v2456_v3 = vadd.f32 %v6149_v10, %v2420_v56  ;;  %v6376_v10 = vld [vmem:[%s7079_s3 + $0x48] sm:$0xff] }
 0x514   :  { %v7158_v24 = vcvt.f32.s32 %v6376_v10 }
 0x515   :  { %v2492_v42 = vmul.f32 %v6155_v54, %v2456_v3  ;;  %v6381_v54 = vld [vmem:[%s7079_s3 + $0x58] sm:$0xff] }
 0x516   :  { %v7157_v17 = vcvt.f32.s32 %v6381_v54 }
 0x517   :  { %v2584_v43 = vsel %vm1615_vm2, %v2492_v42, 0.0  ;;  %v7242_v42 = vlaneseq  ;;  %vm2849_vm2 = vcmask 1041409  }
 0x51b   :  { %3493 = vperm.xlu1 %4426, %v4326_v34  }
 0x51e   :  { %3496 = vperm.xlu0 %4427, %v7213_v58   ;;  %v6433_v58 = vld [vmem:[%s7079_s3 + $0x98] sm:$0xff] }
 0x51f   :  { %3499 = vperm.xlu1 %4426, %v7226_v22   ;;  %v7148_v22 = vcvt.f32.s32 %v6489_v48 }
 0x522   :  { %3505 = vperm.xlu0 %4427, %v7214_v9  }
 0x523   :  { %3502 = vperm.xlu1 %4426, %v4335_v20  }
 0x526   :  { %3511 = vperm.xlu0 %4427, %v7215_v11   ;;  %v7153_v11 = vcvt.f32.s32 %v6433_v58 }
 0x527   :  { %3508 = vperm.xlu1 %4426, %v4341_v23  }
 0x52a   :  { %3517 = vperm.xlu0 %4427, %v7216_v28  }
 0x52b   :  { %3514 = vperm.xlu1 %4426, %v4347_v0  }
 0x52e   :  { %3523 = vperm.xlu0 %4427, %v7217_v8   ;;  %v6445_v8 = vld [vmem:[%s7079_s3 + $0xa8] sm:$0xff] }
 0x52f   :  { %3520 = vperm.xlu1 %4426, %v7158_v24  }
 0x532   :  { %3529 = vperm.xlu0 %4427, %v7218_v35   ;;  %v7152_v35 = vcvt.f32.s32 %v6445_v8 }
 0x533   :  { %3526 = vperm.xlu1 %4426, %v7157_v17  }
 0x536   :  { %3535 = vperm.xlu0 %4427, %v7219_v16  }
 0x537   :  { %3532 = vperm.xlu1 %4426, %v7156_v36  }
 0x53a   :  { %3541 = vperm.xlu0 %4427, %v7220_v41  }
 0x53b   :  { %3538 = vperm.xlu1 %4426, %v7155_v14  }
 0x53e   :  { %3547 = vperm.xlu0 %4427, %v7221_v12   ;;  %v6457_v12 = vld [vmem:[%s7079_s3 + $0xb8] sm:$0xff] }
 0x53f   :  { %3544 = vperm.xlu1 %4426, %v7154_v38   ;;  %v7151_v57 = vcvt.f32.s32 %v6457_v12 }
 0x542   :  { %3553 = vperm.xlu0 %4427, %v7222_v32  }
 0x543   :  { %3550 = vperm.xlu1 %4426, %v7153_v11  }
 0x546   :  { %3559 = vperm.xlu0 %4427, %v7223_v13   ;;  %v7150_v13 = vcvt.f32.s32 %v6467_v62 }
 0x547   :  { %3556 = vperm.xlu1 %4426, %v7152_v35  }
 0x54a   :  { %3565 = vperm.xlu0 %4427, %v7224_v53  }
 0x54b   :  { %3562 = vperm.xlu1 %4426, %v7151_v57  }
 0x54e   :  { %3571 = vperm.xlu0 %4427, %v7228_v39   ;;  %v6499_v39 = vld [vmem:[%s7079_s3 + $0xf8] sm:$0xff] }
 0x54f   :  { %3568 = vperm.xlu1 %4426, %v7150_v13   ;;  %v7147_v6 = vcvt.f32.s32 %v6499_v39 }
 0x556   :  { %v6416_v37 = vpop.xlane.xlu1 %2498 }
 0x559   :  { %v6350_v50 = vpop.xlane.xlu0 %2495 }
 0x55b   :  { %v6435_v9 = vpop.xlane.xlu1 %2504 }
 0x55d   :  { %v6353_v29 = vpop.xlane.xlu0 %2501 }
 0x55f   :  { %v6448_v16 = vpop.xlane.xlu1 %2510 }
 0x561   :  { %v6356_v47 = vpop.xlane.xlu0 %2507 }
 0x563   :  { %v6469_v51 = vpop.xlane.xlu1 %2516 }
 0x565   :  { %v6359_v27 = vpop.xlane.xlu0 %2513 }
 0x567   :  { %v6482_v25 = vpop.xlane.xlu1 %2522 }
 0x569   :  { %v6362_v31 = vpop.xlane.xlu0 %2519 }
 0x56d   :  { %2585 = vadd.xlane.f32.xlu0 %v2584_v43  ;;  %v6365_v2 = vpop.xlane.xlu0 %2525  ;;  %v6520_v43 = vand.u32 127, %v7242_v42 }
 0x56f   :  { %v2679_v26 = vadd.s32 4294967272, %v6520_v43  ;;  %v2686_v57 = vadd.s32 4294967264, %v6520_v43 }
 0x571   :  { %v6367_v40 = vpop.xlane.xlu0 %2531 }
 0x575   :  { %v6369_v45 = vpop.xlane.xlu0 %2537 }
 0x579   :  { %v6371_v15 = vpop.xlane.xlu0 %2543 }
 0x57d   :  { %v6396_v44 = vpop.xlane.xlu0 %2549 }
 0x581   :  { %v6404_v7 = vpop.xlane.xlu0 %2555 }
 0x583   :  { %3577 = vperm.xlu0 %4427, %v7231_v1   ;;  %v2665_v1 = vadd.s32 4294967288, %v6520_v43 }
 0x585   :  { %v6406_v55 = vpop.xlane.xlu0 %2561 }
 0x587   :  { %3583 = vperm.xlu0 %4427, %v7233_v4   ;;  %v2672_v4 = vadd.s32 4294967280, %v6520_v43 }
 0x589   :  { %v6420_v30 = vpop.xlane.xlu0 %2567 }
 0x58b   :  { %4428 = vset.pattern.permute.xlu0 %v7234_v63 }
 0x58c   :  { %3129 = vperm.xlu0 %4428, %v4326_v34   ;;  %v6477_v34 = vld [vmem:[%s7079_s3 + $0xd8] sm:$0xff]  ;;  %s4323_s3 = spop %4322 }
 0x58d   :  { %v6438_v28 = vpop.xlane.xlu0 %2573  ;;  %v7149_v18 = vcvt.f32.s32 %v6477_v34 }
 0x58f   :  { %3574 = vperm.xlu1 %4426, %v7149_v18   ;;  %v7243_v18 = vld [vmem:[#allocation8_spill] sm:$0xff] }
 0x590   :  { %3138 = vperm.xlu0 %4428, %v4335_v20   ;;  %v6501_v20 = vpop.xlane.xlu1 %2528  ;;  %v2663_v13 = vsub.s32 %v6520_v43, %v7243_v18  ;;  %v2668_v35 = vsub.s32 %v2665_v1, %v7243_v18  ;;  %v2682_v11 = vsub.s32 %v2679_v26, %v7243_v18  ;;  %v2675_v38 = vsub.s32 %v2672_v4, %v7243_v18 }
 0x591   :  { %v6452_v41 = vpop.xlane.xlu0 %2579  ;;  %v2707_v1 = vadd.s32 4294967240, %v6520_v43 }
 0x593   :  { %3580 = vperm.xlu1 %4426, %v7148_v22   ;;  %v2693_v22 = vadd.s32 4294967256, %v6520_v43 }
 0x594   :  { %3144 = vperm.xlu0 %4428, %v4341_v23   ;;  %v6508_v49 = vpop.xlane.xlu1 %2534 }
 0x595   :  { %v6547_v24 = vsub.s32 %v2693_v22, %v7243_v18  ;;  %v2721_v22 = vadd.s32 4294967224, %v6520_v43 }
 0x597   :  { %3586 = vperm.xlu1 %4426, %v7147_v6   ;;  %v6527_v6 = vstv %s4323_s3 }
 0x598   :  { %3150 = vperm.xlu0 %4428, %v4347_v0   ;;  %v6513_v46 = vpop.xlane.xlu1 %2540  ;;  %v2594_v42 = vadd.f32 %v6527_v6, %v6350_v50  ;;  %v2596_v14 = vadd.f32 %v6527_v6, %v6353_v29  ;;  %v2595_v36 = vadd.f32 %v6527_v6, %v6416_v37  ;;  %v2610_v17 = vadd.f32 %v6527_v6, %v6371_v15 }
 0x599   :  { %v6462_v32 = vpop.permute.xlu0 %3496  ;;  %v2612_v26 = vadd.f32 %v6527_v6, %v6396_v44  ;;  %v2689_v37 = vsub.s32 %v2686_v57, %v7243_v18  ;;  %v2714_v44 = vadd.s32 4294967232, %v6520_v43  ;;  %v6562_v57 = vsub.s32 %v2707_v1, %v7243_v18 }
 0x59a   :  { %7235 = vst [vmem:[#allocation10_spill] sm:$0xff] %v6462_v32  ;;  %v2664_v4 = vrot.slane %v2594_v42, %v2663_v13  ;;  %v2676_v15 = vrot.slane %v2596_v14, %v2675_v38  ;;  %v2773_v42 = vrot.slane %v2610_v17, %v2663_v13  ;;  %v2614_v14 = vadd.f32 %v6527_v6, %v6404_v7 }
 0x59b   :  { %4429 = vset.pattern.permute.xlu1 %v7234_v63  ;;  %v2600_v13 = vadd.f32 %v6527_v6, %v6359_v27  ;;  %v2616_v27 = vadd.f32 %v6527_v6, %v6406_v55 }
 0x59c   :  { %v2547_v5 = vpop.xlane.xlu1 %2546 }
 0x59d   :  { %v6480_v53 = vpop.permute.xlu0 %3505 }
 0x59e   :  { %7236 = vst [vmem:[#allocation11_spill] sm:$0xff] %v6480_v53  ;;  %v2782_v53 = vrot.slane %v2612_v26, %v2675_v38  ;;  %v6575_v38 = vsub.s32 %v2721_v22, %v7243_v18  ;;  %v2728_v22 = vadd.s32 4294967216, %v6520_v43 }
 0x5a0   :  { %v2553_v3 = vpop.xlane.xlu1 %2552 }
 0x5a1   :  { %v6494_v52 = vpop.permute.xlu0 %3511 }
 0x5a2   :  { %7237 = vst [vmem:[#allocation28_spill] sm:$0xff] %v6494_v52  ;;  %v2597_v52 = vadd.f32 %v6527_v6, %v6435_v9 }
 0x5a4   :  { %v2559_v63 = vpop.xlane.xlu1 %2558  ;;  %v2683_v1 = vrot.slane %v2597_v52, %v2682_v11 }
 0x5a5   :  { %v6506_v23 = vpop.permute.xlu0 %3517  ;;  %v2615_v52 = vadd.f32 %v6527_v6, %v2559_v63 }
 0x5a6   :  { %7238 = vst [vmem:[#allocation12_spill] sm:$0xff] %v6506_v23  ;;  %v2669_v23 = vrot.slane %v2595_v36, %v2668_v35  ;;  %v2613_v36 = vadd.f32 %v6527_v6, %v2553_v3  ;;  %v2792_v3 = vrot.slane %v2614_v14, %v2689_v37 }
 0x5a8   :  { %v2565_v29 = vpop.xlane.xlu1 %2564 }
 0x5a9   :  { %v6511_v0 = vpop.permute.xlu0 %3523 }
 0x5aa   :  { %7239 = vst [vmem:[#allocation29_spill] sm:$0xff] %v6511_v0  ;;  %v2598_v0 = vadd.f32 %v6527_v6, %v6356_v47  ;;  %v2671_v47 = vsel %vm2670_vm3, %v2669_v23, %v2664_v4  ;;  %v2599_v23 = vadd.f32 %v6527_v6, %v6448_v16  ;;  %v2787_v4 = vrot.slane %v2613_v36, %v2682_v11 }
 0x5ab   :  { %v2678_v9 = vsel %vm2677_vm4, %v2676_v15, %v2671_v47  ;;  %v2742_v36 = vadd.s32 4294967200, %v6520_v43 }
 0x5ac   :  { %v2690_v17 = vrot.slane %v2598_v0, %v2689_v37  ;;  %v2571_v7 = vpop.xlane.xlu1 %2570  ;;  %v2685_v26 = vsel %vm2684_vm5, %v2683_v1, %v2678_v9  ;;  %v2601_v37 = vadd.f32 %v6527_v6, %v6469_v51  ;;  %v2797_v51 = vrot.slane %v2615_v52, %v6547_v24 }
 0x5ad   :  { %v6515_v60 = vpop.permute.xlu0 %3529  ;;  %v2617_v9 = vadd.f32 %v6527_v6, %v2565_v29  ;;  %v2731_v1 = vsub.s32 %v2728_v22, %v7243_v18 }
 0x5ae   :  { %7240 = vst [vmem:[#allocation30_spill] sm:$0xff] %v6515_v60  ;;  %v2611_v60 = vadd.f32 %v6527_v6, %v2547_v5  ;;  %v2692_v16 = vsel %vm2691_vm6, %v2690_v17, %v2685_v26  ;;  %v2619_v26 = vadd.f32 %v6527_v6, %v2571_v7 }
 0x5b0   :  { %v2777_v32 = vrot.slane %v2611_v60, %v2668_v35  ;;  %v2717_v35 = vsub.s32 %v2714_v44, %v7243_v18  ;;  %v2577_v14 = vpop.xlane.xlu1 %2576 }
 0x5b1   :  { %v6517_v56 = vpop.permute.xlu0 %3535 }
 0x5b2   :  { %7241 = vst [vmem:[#allocation31_spill] sm:$0xff] %v6517_v56  ;;  %v2700_v56 = vadd.s32 4294967248, %v6520_v43  ;;  %v2778_v60 = vsel %vm2670_vm3, %v2777_v32, %v2773_v42  ;;  %v2602_v32 = vadd.f32 %v6527_v6, %v6362_v31  ;;  %v2618_v31 = vadd.f32 %v6527_v6, %v6420_v30 }
 0x5b3   :  { %v2783_v0 = vsel %vm2677_vm4, %v2782_v53, %v2778_v60  ;;  %v2697_v53 = vrot.slane %v2599_v23, %v6547_v24  ;;  %v2711_v23 = vrot.slane %v2601_v37, %v6562_v57  ;;  %v2603_v30 = vadd.f32 %v6527_v6, %v6482_v25 }
 0x5b4   :  { %v2703_v5 = vsub.s32 %v2700_v56, %v7243_v18  ;;  %v2735_v56 = vadd.s32 4294967208, %v6520_v43  ;;  %v2788_v55 = vsel %vm2684_vm5, %v2787_v4, %v2783_v0  ;;  %v2749_v24 = vadd.s32 4294967192, %v6520_v43 }
 0x5b5   :  { %v6522_v33 = vpop.permute.xlu0 %3541  ;;  %v2793_v63 = vsel %vm2691_vm6, %v2792_v3, %v2788_v55  ;;  %v2699_v47 = vsel %vm2698_vm7, %v2697_v53, %v2692_v16  ;;  %v2620_v0 = vadd.f32 %v6527_v6, %v6438_v28  ;;  %v2606_v16 = vadd.f32 %v6527_v6, %v6367_v40 }
 0x5b6   :  { %v2704_v15 = vrot.slane %v2600_v13, %v2703_v5  ;;  %v6598_v11 = vsub.s32 %v2735_v56, %v7243_v18  ;;  %v2802_v42 = vrot.slane %v2616_v27, %v2703_v5  ;;  %v2718_v13 = vrot.slane %v2602_v32, %v2717_v35 }
 0x5b7   :  { %v2604_v5 = vadd.f32 %v6527_v6, %v6365_v2  ;;  %v2798_v60 = vsel %vm2698_vm7, %v2797_v51, %v2793_v63  ;;  %v2812_v56 = vrot.slane %v2618_v31, %v2717_v35  ;;  %v2745_v2 = vsub.s32 %v2742_v36, %v7243_v18 }
 0x5b8   :  { %v2706_v17 = vsel %vm2705_vm8, %v2704_v15, %v2699_v47  ;;  %v2803_v29 = vsel %vm2705_vm8, %v2802_v42, %v2798_v60  ;;  %v2807_v27 = vrot.slane %v2617_v9, %v6562_v57  ;;  %v2756_v35 = vadd.s32 4294967184, %v6520_v43  ;;  %v2583_v15 = vpop.xlane.xlu1 %2582 }
 0x5b9   :  { %v6544_v50 = vpop.permute.xlu0 %3547  ;;  %v2713_v3 = vsel %vm2712_vm9, %v2711_v23, %v2706_v17  ;;  %v2732_v52 = vrot.slane %v2604_v5, %v2731_v1  ;;  %v2725_v28 = vrot.slane %v2603_v30, %v6575_v38  ;;  %v2605_v32 = vadd.f32 %v6527_v6, %v6501_v20 }
 0x5ba   :  { %7244 = vst [vmem:[#allocation8_spill] sm:$0xff] %v6544_v50  ;;  %v2720_v4 = vsel %vm2719_vm10, %v2718_v13, %v2713_v3  ;;  %v2808_v57 = vsel %vm2712_vm9, %v2807_v27, %v2803_v29  ;;  %v2752_v7 = vsub.s32 %v2749_v24, %v7243_v18  ;;  %v2822_v53 = vrot.slane %v2620_v0, %v2731_v1 }
 0x5bb   :  { %v2813_v22 = vsel %vm2719_vm10, %v2812_v56, %v2808_v57  ;;  %v2622_v37 = vadd.f32 %v6527_v6, %v6452_v41  ;;  %v2727_v40 = vsel %vm2726_vm11, %v2725_v28, %v2720_v4  ;;  %v2763_v55 = vadd.s32 4294967176, %v6520_v43 }
 0x5bc   :  { %v2817_v63 = vrot.slane %v2619_v26, %v6575_v38  ;;  %v2621_v42 = vadd.f32 %v6527_v6, %v2577_v14  ;;  %v2734_v20 = vsel %vm2733_vm12, %v2732_v52, %v2727_v40  ;;  %v2746_v31 = vrot.slane %v2606_v16, %v2745_v2  ;;  %v2589_v13 = vpop.xlane.xlu1 %2588 }
 0x5bd   :  { %v6569_v50 = vpop.permute.xlu0 %3553  ;;  %v2759_v47 = vsub.s32 %v2756_v35, %v7243_v18  ;;  %v2608_v36 = vadd.f32 %v6527_v6, %v6369_v45  ;;  %v2739_v51 = vrot.slane %v2605_v32, %v6598_v11  ;;  %v2607_v41 = vadd.f32 %v6527_v6, %v6508_v49 }
 0x5be   :  { %v2818_v9 = vsel %vm2726_vm11, %v2817_v63, %v2813_v22  ;;  %v2832_v14 = vrot.slane %v2622_v37, %v2745_v2  ;;  %v2827_v5 = vrot.slane %v2621_v42, %v6598_v11  ;;  %v2623_v45 = vadd.f32 %v6527_v6, %v2583_v15 }
 0x5bf   :  { %v2823_v38 = vsel %vm2733_vm12, %v2822_v53, %v2818_v9  ;;  %v2741_v1 = vsel %vm2740_vm13, %v2739_v51, %v2734_v20  ;;  %v2766_v49 = vsub.s32 %v2763_v55, %v7243_v18  ;;  %v2760_v30 = vrot.slane %v2608_v36, %v2759_v47 }
 0x5c0   :  { %v2748_v23 = vsel %vm2747_vm14, %v2746_v31, %v2741_v1  ;;  %v2753_v60 = vrot.slane %v2607_v41, %v2752_v7  ;;  %v2609_v24 = vadd.f32 %v6527_v6, %v6513_v46  ;;  %v2828_v29 = vsel %vm2740_vm13, %v2827_v5, %v2823_v38  ;;  %v6707_v36 = vpop.permute.xlu1 %3493 }
 0x5c1   :  { %v6595_v44 = vpop.permute.xlu0 %3559  ;;  %v2625_v56 = vadd.f32 %v6527_v6, %v2589_v13  ;;  %v2833_v11 = vsel %vm2747_vm14, %v2832_v14, %v2828_v29  ;;  %v2837_v2 = vrot.slane %v2623_v45, %v2752_v7  ;;  %vm2628_vm3 = vcmp.lt.s32.totalorder %v6520_v43, 16 }
 0x5c2   :  { %7245 = vst [vmem:[#allocation32_spill] sm:$0xff] %v6595_v44  ;;  %v2755_v27 = vsel %vm2754_vm15, %v2753_v60, %v2748_v23  ;;  %v2767_v52 = vrot.slane %v2609_v24, %v2766_v49  ;;  %vm2853_vm4 = vcmask 1041408   ;;  %v7248_v7 = vcvt.f32.s32 %v6376_v10  ;;  %v3030_v44 = vld [vmem:[%s7080_s4 + $0xf0] sm:$0xff] }
 0x5c3   :  { %v2762_v4 = vsel %vm2761_vm0, %v2760_v30, %v2755_v27  ;;  %v2847_v16 = vrot.slane %v2625_v56, %v2766_v49  ;;  %v2838_v46 = vsel %vm2754_vm15, %v2837_v2, %v2833_v11  ;;  %v7249_v22 = vcvt.f32.s32 %v6381_v54  ;;  %v7275_v2 = vld [vmem:[#allocation9_spill] sm:$0xff] }
 0x5c4   :  { %v2769_v15 = vsel %vm2768_vm1, %v2767_v52, %v2762_v4  ;;  %v7250_v53 = vcvt.f32.s32 %v6392_v21  ;;  %v7251_v37 = vcvt.f32.s32 %v6413_v61  ;;  %v7252_v40 = vcvt.f32.s32 %v6425_v19  ;;  %v6709_v51 = vpop.permute.xlu1 %3499 }
 0x5c5   :  { %v6623_v25 = vpop.permute.xlu0 %3565  ;;  %v7253_v55 = vcvt.f32.s32 %v6433_v58  ;;  %v7254_v63 = vcvt.f32.s32 %v6445_v8  ;;  %v7255_v10 = vcvt.f32.s32 %v6457_v12  ;;  %v7256_v54 = vcvt.f32.s32 %v6467_v62 }
 0x5c6   :  { %7246 = vst [vmem:[#allocation33_spill] sm:$0xff] %v6623_v25  ;;  %v7257_v21 = vcvt.f32.s32 %v6477_v34  ;;  %v7258_v61 = vcvt.f32.s32 %v6489_v48  ;;  %v7259_v19 = vcvt.f32.s32 %v6499_v39  ;;  %v3026_v25 = vld [vmem:[%s7080_s4 + $0xd0] sm:$0xff] }
 0x5c8   :  { %v6711_v41 = vpop.permute.xlu1 %3502 }
 0x5c9   :  { %v6649_v17 = vpop.permute.xlu0 %3571  ;;  %7262 = vst [vmem:[#allocation37_spill] sm:$0xff] %v6711_v41 }
 0x5ca   :  { %7247 = vst [vmem:[#allocation34_spill] sm:$0xff] %v6649_v17 }
 0x5cc   :  { %v6713_v9 = vpop.permute.xlu1 %3508 }
 0x5cd   :  { %7263 = vst [vmem:[#allocation38_spill] sm:$0xff] %v6713_v9  ;;  %v3028_v9 = vld [vmem:[%s7080_s4 + $0xe0] sm:$0xff] }
 0x5d0   :  { %v6715_v38 = vpop.permute.xlu1 %3514 }
 0x5d1   :  { %7264 = vst [vmem:[#allocation39_spill] sm:$0xff] %v6715_v38 }
 0x5d4   :  { %v6717_v14 = vpop.permute.xlu1 %3520 }
 0x5d5   :  { %7265 = vst [vmem:[#allocation40_spill] sm:$0xff] %v6717_v14  ;;  %v3022_v14 = vld [vmem:[%s7080_s4 + $0xb0] sm:$0xff] }
 0x5d8   :  { %v6719_v13 = vpop.permute.xlu1 %3526 }
 0x5d9   :  { %7266 = vst [vmem:[#allocation41_spill] sm:$0xff] %v6719_v13 }
 0x5dc   :  { %v6721_v1 = vpop.permute.xlu1 %3532 }
 0x5dd   :  { %7267 = vst [vmem:[#allocation42_spill] sm:$0xff] %v6721_v1 }
 0x5e0   :  { %v6723_v5 = vpop.permute.xlu1 %3538 }
 0x5e1   :  { %7268 = vst [vmem:[#allocation43_spill] sm:$0xff] %v6723_v5 }
 0x5e4   :  { %v6725_v45 = vpop.permute.xlu1 %3544 }
 0x5e8   :  { %v6727_v23 = vpop.permute.xlu1 %3550 }
 0x5ec   :  { %v6729_v49 = vpop.permute.xlu1 %3556 }
 0x5ed   :  { %7269 = vst [vmem:[#allocation44_spill] sm:$0xff] %v6729_v49  ;;  %v3031_v49 = vld [vmem:[%s7080_s4 + $0xf8] sm:$0xff] }
 0x5f0   :  { %v6731_v30 = vpop.permute.xlu1 %3562 }
 0x5f1   :  { %7270 = vst [vmem:[#allocation45_spill] sm:$0xff] %v6731_v30 }
 0x5f4   :  { %v6733_v60 = vpop.permute.xlu1 %3568 }
 0x5f5   :  { %7271 = vst [vmem:[#allocation46_spill] sm:$0xff] %v6733_v60  ;;  %v3024_v60 = vld [vmem:[%s7080_s4 + $0xc0] sm:$0xff] }
 0x5f6   :  { %v2586_v0 = vpop.xlane.xlu0 %2585 }
 0x5f7   :  { %v2624_v3 = vadd.f32 %v6527_v6, %v2586_v0 }
 0x5f9   :  { %v2842_v26 = vrot.slane %v2624_v3, %v2759_v47 }
 0x5fb   :  { %v2843_v35 = vsel %vm2761_vm0, %v2842_v26, %v2838_v46  ;;  %v2935_v26 = vsub.s32 1, %v7243_v18 }
 0x5fc   :  { %v2848_v28 = vsel %vm2768_vm1, %v2847_v16, %v2843_v35 }
 0x5fd   :  { %v2850_v6 = vsel %vm2849_vm2, %v2848_v28, %v2769_v15 }
 0x5fe   :  { %v2852_v32 = vsel %vm2628_vm3, %v2850_v6, -1e+30  ;;  %v6694_v58 = vpop.permute.xlu0 %3577 }
 0x5ff   :  { %v2854_v57 = vsel %vm2853_vm4, %v2852_v32, -inf  ;;  %7260 = vst [vmem:[#allocation35_spill] sm:$0xff] %v6694_v58 }
 0x600   :  { %2855 = vmax.xlane.f32.xlu0 %v2854_v57 }
 0x602   :  { %v6696_v42 = vpop.permute.xlu0 %3583 }
 0x603   :  { %7261 = vst [vmem:[#allocation36_spill] sm:$0xff] %v6696_v42 }
 0x607   :  { %v6698_v8 = vpop.permute.xlu0 %3129 }
 0x608   :  { %vm3224_vm5 = vcmp.eq.s32.totalorder %v6520_v43, %v6698_v8 }
 0x60a   :  { %v6735_v24 = vpop.permute.xlu1 %3574 }
 0x60b   :  { %v6700_v12 = vpop.permute.xlu0 %3138  ;;  %7272 = vst [vmem:[#allocation47_spill] sm:$0xff] %v6735_v24 }
 0x60c   :  { %vm3227_vm8 = vcmp.eq.s32.totalorder %v6520_v43, %v6700_v12 }
 0x60e   :  { %v6737_v29 = vpop.permute.xlu1 %3580 }
 0x60f   :  { %v6702_v20 = vpop.permute.xlu0 %3144  ;;  %7273 = vst [vmem:[#allocation48_spill] sm:$0xff] %v6737_v29 }
 0x610   :  { %vm3229_vm10 = vcmp.eq.s32.totalorder %v6520_v43, %v6702_v20 }
 0x612   :  { %v6739_v56 = vpop.permute.xlu1 %3586 }
 0x613   :  { %v6704_v62 = vpop.permute.xlu0 %3150  ;;  %7274 = vst [vmem:[#allocation49_spill] sm:$0xff] %v6739_v56 }
 0x614   :  { %vm3231_vm12 = vcmp.eq.s32.totalorder %v6520_v43, %v6704_v62 }
 0x616   :  { %3156 = vperm.xlu0 %4428, %v7248_v7  }
 0x61a   :  { %3162 = vperm.xlu0 %4428, %v7249_v22  }
 0x61e   :  { %3168 = vperm.xlu0 %4428, %v7250_v53   ;;  %v3001_v53 = vld [vmem:[%s7080_s4 + $0x8] sm:$0xff] }
 0x622   :  { %3174 = vperm.xlu0 %4428, %v7251_v37   ;;  %v3000_v37 = vld [vmem:[%s7080_s4] sm:$0xff] }
 0x626   :  { %3180 = vperm.xlu0 %4428, %v7252_v40  }
 0x62a   :  { %3186 = vperm.xlu0 %4428, %v7253_v55  }
 0x62e   :  { %3192 = vperm.xlu0 %4428, %v7254_v63  }
 0x632   :  { %3198 = vperm.xlu0 %4428, %v7255_v10  }
 0x636   :  { %3204 = vperm.xlu0 %4428, %v7256_v54   ;;  %v3002_v54 = vld [vmem:[%s7080_s4 + $0x10] sm:$0xff] }
 0x63a   :  { %3210 = vperm.xlu0 %4428, %v7257_v21  }
 0x63e   :  { %3216 = vperm.xlu0 %4428, %v7258_v61  }
 0x642   :  { %3222 = vperm.xlu0 %4428, %v7259_v19  }
 0x689   :  { %v2856_v34 = vpop.xlane.xlu0 %2855 }
 0x68a   :  { %v2857_v31 = vsub.f32 %v2852_v32, %v2856_v34  ;;  %v3004_v34 = vld [vmem:[%s7080_s4 + $0x20] sm:$0xff] }
 0x68c   :  { %v2858_v47 = vmul.f32 1.442695, %v2857_v31  ;;  %v3003_v31 = vld [vmem:[%s7080_s4 + $0x18] sm:$0xff] }
 0x68e   :  { %4624 = vpow2.f32 %v2858_v47 }
 0x691   :  { %v6743_v52 = vpop.permute.xlu0 %3156 }
 0x692   :  { %vm3233_vm14 = vcmp.eq.s32.totalorder %v6520_v43, %v6743_v52 }
 0x695   :  { %v6745_v16 = vpop.permute.xlu0 %3162 }
 0x696   :  { %vm3235_vm0 = vcmp.eq.s32.totalorder %v6520_v43, %v6745_v16 }
 0x699   :  { %v6747_v18 = vpop.permute.xlu0 %3168 }
 0x69b   :  { %v4625_v48 = vpop.eup %4624 }
 0x69c   :  { %v2860_v39 = vsel %vm2853_vm4, %v4625_v48, 0.0 }
 0x69d   :  { %2861 = vadd.xlane.f32.xlu1 %v2860_v39  ;;  %v6749_v46 = vpop.permute.xlu0 %3174 }
 0x6a1   :  { %v6751_v35 = vpop.permute.xlu0 %3180 }
 0x6a5   :  { %v6753_v15 = vpop.permute.xlu0 %3186 }
 0x6a9   :  { %v6755_v28 = vpop.permute.xlu0 %3192 }
 0x6ad   :  { %v6757_v6 = vpop.permute.xlu0 %3198 }
 0x6b1   :  { %v6759_v32 = vpop.permute.xlu0 %3204 }
 0x6b5   :  { %v6761_v57 = vpop.permute.xlu0 %3210 }
 0x6b9   :  { %v6763_v7 = vpop.permute.xlu0 %3216 }
 0x6bd   :  { %v6765_v22 = vpop.permute.xlu0 %3222 }
 0x726   :  { %v2862_v0 = vpop.xlane.xlu1 %2861 }
 0x727   :  { %4626 = vrcp.f32 %v2862_v0 }
 0x734   :  { %v4627_v11 = vpop.eup %4626 }
 0x735   :  { %v2864_v3 = vmul.f32 %v4627_v11, %v4625_v48  ;;  %v3006_v11 = vld [vmem:[%s7080_s4 + $0x30] sm:$0xff] }
 0x737   :  { %v2869_v27 = vrot.slane %v2864_v3, %v7275_v2  ;;  %2865 = vst [vmem:[#allocation4] sm:$0x3] %v2864_v3  ;;  %v2936_v4 = vrot.slane %v2864_v3, %v2935_v26  ;;  %v3005_v3 = vld [vmem:[%s7080_s4 + $0x28] sm:$0xff] }
 0x739   :  { %2875 = vbcast.lane.b32.xlu1 %v2869_v27, 264  ;;  %2871 = vbcast.lane.b32.xlu0 %v2869_v27, 256 }
 0x73d   :  { %2879 = vbcast.lane.b32.xlu1 %v2869_v27, 272  ;;  %2887 = vbcast.lane.b32.xlu0 %v2869_v27, 288 }
 0x741   :  { %2883 = vbcast.lane.b32.xlu1 %v2869_v27, 280  ;;  %2895 = vbcast.lane.b32.xlu0 %v2869_v27, 304 }
 0x745   :  { %2891 = vbcast.lane.b32.xlu1 %v2869_v27, 296  ;;  %2903 = vbcast.lane.b32.xlu0 %v2869_v27, 320 }
 0x749   :  { %2899 = vbcast.lane.b32.xlu1 %v2869_v27, 312  ;;  %2911 = vbcast.lane.b32.xlu0 %v2869_v27, 336 }
 0x74d   :  { %2907 = vbcast.lane.b32.xlu1 %v2869_v27, 328  ;;  %2919 = vbcast.lane.b32.xlu0 %v2869_v27, 352 }
 0x751   :  { %2915 = vbcast.lane.b32.xlu1 %v2869_v27, 344  ;;  %2927 = vbcast.lane.b32.xlu0 %v2869_v27, 368 }
 0x755   :  { %2923 = vbcast.lane.b32.xlu1 %v2869_v27, 360  ;;  %2938 = vbcast.lane.b32.xlu0 %v2936_v4, 256 }
 0x759   :  { %2931 = vbcast.lane.b32.xlu1 %v2869_v27, 376  ;;  %2946 = vbcast.lane.b32.xlu0 %v2936_v4, 272 }
 0x75d   :  { %2942 = vbcast.lane.b32.xlu1 %v2936_v4, 264  ;;  %2954 = vbcast.lane.b32.xlu0 %v2936_v4, 288 }
 0x761   :  { %2950 = vbcast.lane.b32.xlu1 %v2936_v4, 280  ;;  %2962 = vbcast.lane.b32.xlu0 %v2936_v4, 304 }
 0x765   :  { %2958 = vbcast.lane.b32.xlu1 %v2936_v4, 296  ;;  %2970 = vbcast.lane.b32.xlu0 %v2936_v4, 320 }
 0x769   :  { %2966 = vbcast.lane.b32.xlu1 %v2936_v4, 312  ;;  %2978 = vbcast.lane.b32.xlu0 %v2936_v4, 336 }
 0x76d   :  { %2974 = vbcast.lane.b32.xlu1 %v2936_v4, 328  ;;  %2986 = vbcast.lane.b32.xlu0 %v2936_v4, 352 }
 0x771   :  { %2982 = vbcast.lane.b32.xlu1 %v2936_v4, 344  ;;  %2994 = vbcast.lane.b32.xlu0 %v2936_v4, 368 }
 0x775   :  { %2990 = vbcast.lane.b32.xlu1 %v2936_v4, 360 }
 0x779   :  { %2998 = vbcast.lane.b32.xlu1 %v2936_v4, 376 }
 0x7ab   :  { %v2876_v40 = vpop.permute.xlu1 %2875  ;;  %v2872_v55 = vpop.permute.xlu0 %2871 }
 0x7ac   :  { %v6773_v63 = vmul.f32 %v3001_v53, %v2876_v40  ;;  %v6775_v10 = vmul.f32 %v3000_v37, %v2872_v55  ;;  %v3008_v53 = vld [vmem:[%s7080_s4 + $0x40] sm:$0xff]  ;;  %v3007_v37 = vld [vmem:[%s7080_s4 + $0x38] sm:$0xff] }
 0x7ae   :  { %3263 = vperm.xlu0 %4428, %v6773_v63   ;;  %3258 = vperm.xlu1 %4429, %v6775_v10  }
 0x7af   :  { %v2880_v21 = vpop.permute.xlu1 %2879  ;;  %v2888_v61 = vpop.permute.xlu0 %2887 }
 0x7b0   :  { %v6782_v19 = vmul.f32 %v3002_v54, %v2880_v21  ;;  %v6791_v39 = vmul.f32 %v3004_v34, %v2888_v61  ;;  %v3010_v61 = vld [vmem:[%s7080_s4 + $0x50] sm:$0xff]  ;;  %v3009_v34 = vld [vmem:[%s7080_s4 + $0x48] sm:$0xff] }
 0x7b2   :  { %3268 = vperm.xlu1 %4429, %v6782_v19  }
 0x7b3   :  { %v2884_v47 = vpop.permute.xlu1 %2883  ;;  %v2896_v48 = vpop.permute.xlu0 %2895 }
 0x7b4   :  { %v6793_v0 = vmul.f32 %v3003_v31, %v2884_v47  ;;  %v6803_v26 = vmul.f32 %v3006_v11, %v2896_v48 }
 0x7b6   :  { %3273 = vperm.xlu0 %4428, %v6793_v0   ;;  %3278 = vperm.xlu1 %4429, %v6791_v39  }
 0x7b7   :  { %v2892_v2 = vpop.permute.xlu1 %2891  ;;  %v2904_v27 = vpop.permute.xlu0 %2903 }
 0x7b8   :  { %v6805_v4 = vmul.f32 %v3005_v3, %v2892_v2  ;;  %v6815_v54 = vmul.f32 %v3008_v53, %v2904_v27  ;;  %v3012_v3 = vld [vmem:[%s7080_s4 + $0x60] sm:$0xff]  ;;  %v3011_v2 = vld [vmem:[%s7080_s4 + $0x58] sm:$0xff] }
 0x7ba   :  { %3283 = vperm.xlu0 %4428, %v6805_v4   ;;  %3288 = vperm.xlu1 %4429, %v6803_v26  }
 0x7bb   :  { %v2900_v40 = vpop.permute.xlu1 %2899  ;;  %v2912_v55 = vpop.permute.xlu0 %2911 }
 0x7bc   :  { %v6817_v21 = vmul.f32 %v3007_v37, %v2900_v40  ;;  %v6827_v48 = vmul.f32 %v3010_v61, %v2912_v55  ;;  %v3014_v55 = vld [vmem:[%s7080_s4 + $0x70] sm:$0xff]  ;;  %v3013_v61 = vld [vmem:[%s7080_s4 + $0x68] sm:$0xff] }
 0x7be   :  { %3293 = vperm.xlu0 %4428, %v6817_v21   ;;  %3298 = vperm.xlu1 %4429, %v6815_v54  }
 0x7bf   :  { %v2908_v31 = vpop.permute.xlu1 %2907  ;;  %v2920_v47 = vpop.permute.xlu0 %2919 }
 0x7c0   :  { %v6829_v11 = vmul.f32 %v3009_v34, %v2908_v31  ;;  %v6839_v37 = vmul.f32 %v3012_v3, %v2920_v47  ;;  %v3016_v3 = vld [vmem:[%s7080_s4 + $0x80] sm:$0xff] }
 0x7c2   :  { %3303 = vperm.xlu0 %4428, %v6829_v11   ;;  %3308 = vperm.xlu1 %4429, %v6827_v48  }
 0x7c3   :  { %v2916_v27 = vpop.permute.xlu1 %2915  ;;  %v2928_v53 = vpop.permute.xlu0 %2927 }
 0x7c4   :  { %v6841_v40 = vmul.f32 %v3011_v2, %v2916_v27  ;;  %v6851_v5 = vmul.f32 %v3014_v55, %v2928_v53  ;;  %v3015_v2 = vld [vmem:[%s7080_s4 + $0x78] sm:$0xff]  ;;  %v3018_v55 = vld [vmem:[%s7080_s4 + $0x90] sm:$0xff] }
 0x7c6   :  { %3313 = vperm.xlu0 %4428, %v6841_v40   ;;  %3318 = vperm.xlu1 %4429, %v6839_v37  }
 0x7c7   :  { %v2924_v34 = vpop.permute.xlu1 %2923  ;;  %v2939_v31 = vpop.permute.xlu0 %2938 }
 0x7c8   :  { %v6853_v47 = vmul.f32 %v3013_v61, %v2924_v34  ;;  %v6863_v1 = vmul.f32 %v3016_v3, %v2939_v31  ;;  %v3017_v61 = vld [vmem:[%s7080_s4 + $0x88] sm:$0xff]  ;;  %v3020_v31 = vld [vmem:[%s7080_s4 + $0xa0] sm:$0xff]  ;;  %v3019_v3 = vld [vmem:[%s7080_s4 + $0x98] sm:$0xff] }
 0x7ca   :  { %3323 = vperm.xlu0 %4428, %v6853_v47   ;;  %3328 = vperm.xlu1 %4429, %v6851_v5  }
 0x7cb   :  { %v2932_v27 = vpop.permute.xlu1 %2931  ;;  %v2947_v56 = vpop.permute.xlu0 %2946 }
 0x7cc   :  { %v6865_v53 = vmul.f32 %v3015_v2, %v2932_v27  ;;  %v3050_v29 = vmul.f32 %v3018_v55, %v2947_v56  ;;  %v3021_v56 = vld [vmem:[%s7080_s4 + $0xa8] sm:$0xff] }
 0x7ce   :  { %3333 = vperm.xlu0 %4428, %v6865_v53   ;;  %3338 = vperm.xlu1 %4429, %v6863_v1  }
 0x7cf   :  { %v2943_v34 = vpop.permute.xlu1 %2942  ;;  %v2955_v42 = vpop.permute.xlu0 %2954 }
 0x7d0   :  { %v3049_v13 = vmul.f32 %v3017_v61, %v2943_v34  ;;  %v3052_v58 = vmul.f32 %v3020_v31, %v2955_v42  ;;  %v3023_v42 = vld [vmem:[%s7080_s4 + $0xb8] sm:$0xff] }
 0x7d2   :  { %3343 = vperm.xlu0 %4428, %v3049_v13   ;;  %3348 = vperm.xlu1 %4429, %v3050_v29  }
 0x7d3   :  { %v2951_v2 = vpop.permute.xlu1 %2950  ;;  %v2963_v27 = vpop.permute.xlu0 %2962 }
 0x7d4   :  { %v3051_v24 = vmul.f32 %v3019_v3, %v2951_v2  ;;  %v3054_v34 = vmul.f32 %v3022_v14, %v2963_v27  ;;  %v3025_v14 = vld [vmem:[%s7080_s4 + $0xc8] sm:$0xff] }
 0x7d6   :  { %3353 = vperm.xlu0 %4428, %v3051_v24   ;;  %3358 = vperm.xlu1 %4429, %v3052_v58  }
 0x7d7   :  { %v2959_v55 = vpop.permute.xlu1 %2958  ;;  %v2971_v61 = vpop.permute.xlu0 %2970 }
 0x7d8   :  { %v3053_v17 = vmul.f32 %v3021_v56, %v2959_v55  ;;  %v3056_v2 = vmul.f32 %v3024_v60, %v2971_v61  ;;  %v3027_v60 = vld [vmem:[%s7080_s4 + $0xd8] sm:$0xff] }
 0x7da   :  { %3363 = vperm.xlu0 %4428, %v3053_v17   ;;  %3368 = vperm.xlu1 %4429, %v3054_v34  }
 0x7db   :  { %v2967_v31 = vpop.permute.xlu1 %2966  ;;  %v2979_v3 = vpop.permute.xlu0 %2978 }
 0x7dc   :  { %v3055_v38 = vmul.f32 %v3023_v42, %v2967_v31  ;;  %v3058_v55 = vmul.f32 %v3026_v25, %v2979_v3  ;;  %v3029_v25 = vld [vmem:[%s7080_s4 + $0xe8] sm:$0xff]  ;;  %s4675_s4 = smov [#allocation4]  }
 0x7dd   :  { %s3845_s6 = sshll.u32 %s4675_s4, 4  ;;  %s3846_s6 = int_to_ptr.vmem [resolvable:$true] %s3845_s6 }
 0x7de   :  { %3373 = vperm.xlu0 %4428, %v3055_v38   ;;  %3378 = vperm.xlu1 %4429, %v3056_v2   ;;  %s4628_s28 = scalar_lea.vmem %s3846_s6, 32  ;;  %p4633_p1 = scmp.lt.s32.totalorder %s3846_s6, %s3846_s6 }
 0x7df   :  { %v2975_v27 = vpop.permute.xlu1 %2974  ;;  %v2987_v56 = vpop.permute.xlu0 %2986  ;;  %p4629_p0 = scmp.ne.s32.totalorder %s3846_s6, %s4628_s28  ;;  %p4634_p2 = scmp.lt.s32.totalorder %s4628_s28, %s4628_s28 }
 0x7e0   :  { %v3057_v30 = vmul.f32 %v3025_v14, %v2975_v27  ;;  %v3060_v42 = vmul.f32 %v3028_v9, %v2987_v56 }
 0x7e1   :  { %p4635_p3 = por %p4634_p2, %p4633_p1 }
 0x7e2   :  { %3383 = vperm.xlu0 %4428, %v3057_v30   ;;  %3388 = vperm.xlu1 %4429, %v3058_v55  }
 0x7e3   :  { %v2983_v61 = vpop.permute.xlu1 %2982  ;;  %v2995_v41 = vpop.permute.xlu0 %2994  ;;  %p4636_p4 = pnand %p4635_p3, %p4629_p0 }
 0x7e4   :  { %v3059_v31 = vmul.f32 %v3027_v60, %v2983_v61  ;;  %v3062_v14 = vmul.f32 %v3030_v44, %v2995_v41  ;;  %v7276_v60 = vmov 1  }
 0x7e6   :  { %3393 = vperm.xlu0 %4428, %v3059_v31   ;;  %3398 = vperm.xlu1 %4429, %v3060_v42  }
 0x7e7   :  { %v2991_v3 = vpop.permute.xlu1 %2990 }
 0x7e8   :  { %v3061_v27 = vmul.f32 %v3029_v25, %v2991_v3 }
 0x7ea   :  { %3403 = vperm.xlu0 %4428, %v3061_v27   ;;  %3408 = vperm.xlu1 %4429, %v3062_v14  }
 0x7eb   :  { %v2999_v9 = vpop.permute.xlu1 %2998 }
 0x7ec   :  { %v3063_v56 = vmul.f32 %v3031_v49, %v2999_v9 }
 0x7ee   :  { %3413 = vperm.xlu0 %4428, %v3063_v56   ;;  %4431 = vset.pattern.permute.xlu1 %v7276_v60 }
 0x7ef   :  { %3625 = vperm.xlu1 %4431, %v6773_v63  }
 0x7f2   :  { %4430 = vset.pattern.permute.xlu0 %v7276_v60 }
 0x7f3   :  { %3621 = vperm.xlu0 %4430, %v6775_v10   ;;  %3633 = vperm.xlu1 %4431, %v6793_v0   ;;  %v7279_v10 = vld [vmem:[#allocation15_spill] sm:$0xff] }
 0x7f4   :  { %vm3228_vm9 = vcmp.eq.s32.totalorder %v6520_v43, %v7279_v10 }
 0x7f7   :  { %3629 = vperm.xlu0 %4430, %v6782_v19   ;;  %3685 = vperm.xlu1 %4431, %v6863_v1   ;;  %v7278_v1 = vld [vmem:[#allocation14_spill] sm:$0xff] }
 0x7f8   :  { %vm3226_vm7 = vcmp.eq.s32.totalorder %v6520_v43, %v7278_v1 }
 0x7fb   :  { %3637 = vperm.xlu0 %4430, %v6791_v39   ;;  %3693 = vperm.xlu1 %4431, %v3050_v29  }
 0x7ff   :  { %3689 = vperm.xlu0 %4430, %v3049_v13   ;;  %3701 = vperm.xlu1 %4431, %v3052_v58  }
 0x803   :  { %3697 = vperm.xlu0 %4430, %v3051_v24   ;;  %3705 = vperm.xlu1 %4431, %v3053_v17   ;;  %v7277_v17 = vld [vmem:[#allocation13_spill] sm:$0xff] }
 0x804   :  { %vm3225_vm6 = vcmp.eq.s32.totalorder %v6520_v43, %v7277_v17 }
 0x807   :  { %3641 = vperm.xlu0 %4430, %v6805_v4   ;;  %3709 = vperm.xlu1 %4431, %v3054_v34  }
 0x80b   :  { %3645 = vperm.xlu0 %4430, %v6803_v26   ;;  %3713 = vperm.xlu1 %4431, %v3055_v38  }
 0x80f   :  { %3649 = vperm.xlu0 %4430, %v6817_v21   ;;  %3717 = vperm.xlu1 %4431, %v3056_v2  }
 0x813   :  { %3653 = vperm.xlu0 %4430, %v6815_v54   ;;  %3721 = vperm.xlu1 %4431, %v3057_v30   ;;  %v7280_v54 = vld [vmem:[#allocation16_spill] sm:$0xff] }
 0x814   :  { %vm3230_vm11 = vcmp.eq.s32.totalorder %v6520_v43, %v7280_v54 }
 0x817   :  { %3657 = vperm.xlu0 %4430, %v6829_v11   ;;  %3725 = vperm.xlu1 %4431, %v3058_v55  }
 0x81b   :  { %3661 = vperm.xlu0 %4430, %v6827_v48   ;;  %3729 = vperm.xlu1 %4431, %v3059_v31  }
 0x81f   :  { %3665 = vperm.xlu0 %4430, %v6841_v40   ;;  %3733 = vperm.xlu1 %4431, %v3060_v42   ;;  %v7282_v42 = vld [vmem:[#allocation18_spill] sm:$0xff] }
 0x820   :  { %vm3234_vm15 = vcmp.eq.s32.totalorder %v6520_v43, %v7282_v42 }
 0x823   :  { %3669 = vperm.xlu0 %4430, %v6839_v37   ;;  %3737 = vperm.xlu1 %4431, %v3061_v27  }
 0x827   :  { %3673 = vperm.xlu0 %4430, %v6853_v47   ;;  %3741 = vperm.xlu1 %4431, %v3062_v14   ;;  %v7281_v47 = vld [vmem:[#allocation17_spill] sm:$0xff] }
 0x828   :  { %vm3232_vm13 = vcmp.eq.s32.totalorder %v6520_v43, %v7281_v47 }
 0x829   :  { %v3259_v44 = vpop.permute.xlu1 %3258  ;;  %v3264_v58 = vpop.permute.xlu0 %3263 }
 0x82a   :  { %v3416_v41 = vsel %vm3224_vm5, %v3259_v44, 0.0  ;;  %v3417_v38 = vsel %vm3225_vm6, %v3264_v58, 0.0 }
 0x82b   :  { %v3448_v13 = vadd.f32 %v3417_v38, %v3416_v41  ;;  %3677 = vperm.xlu0 %4430, %v6851_v5   ;;  %3745 = vperm.xlu1 %4431, %v3063_v56  }
 0x82d   :  { %v3269_v49 = vpop.permute.xlu1 %3268 }
 0x82e   :  { %v3418_v30 = vsel %vm3226_vm7, %v3269_v49, 0.0 }
 0x82f   :  { %v3449_v24 = vadd.f32 %v3448_v13, %v3418_v30  ;;  %3681 = vperm.xlu0 %4430, %v6865_v53  }
 0x831   :  { %v3279_v8 = vpop.permute.xlu1 %3278  ;;  %v3274_v29 = vpop.permute.xlu0 %3273 }
 0x832   :  { %v3419_v63 = vsel %vm3227_vm8, %v3274_v29, 0.0  ;;  %v3420_v5 = vsel %vm3228_vm9, %v3279_v8, 0.0 }
 0x833   :  { %v3450_v19 = vadd.f32 %v3449_v24, %v3419_v63 }
 0x835   :  { %v3289_v39 = vpop.permute.xlu1 %3288  ;;  %v3451_v0 = vadd.f32 %v3450_v19, %v3420_v5  ;;  %v3284_v26 = vpop.permute.xlu0 %3283 }
 0x836   :  { %v3421_v4 = vsel %vm3229_vm10, %v3284_v26, 0.0  ;;  %v3422_v48 = vsel %vm3230_vm11, %v3289_v39, 0.0 }
 0x837   :  { %v3452_v21 = vadd.f32 %v3451_v0, %v3421_v4 }
 0x839   :  { %v3299_v12 = vpop.permute.xlu1 %3298  ;;  %v3453_v11 = vadd.f32 %v3452_v21, %v3422_v48  ;;  %v3294_v37 = vpop.permute.xlu0 %3293 }
 0x83a   :  { %v3423_v40 = vsel %vm3231_vm12, %v3294_v37, 0.0  ;;  %v3424_v20 = vsel %vm3232_vm13, %v3299_v12, 0.0 }
 0x83b   :  { %v3454_v53 = vadd.f32 %v3453_v11, %v3423_v40 }
 0x83d   :  { %v3309_v34 = vpop.permute.xlu1 %3308  ;;  %v3455_v2 = vadd.f32 %v3454_v53, %v3424_v20  ;;  %v3304_v55 = vpop.permute.xlu0 %3303 }
 0x83e   :  { %v3425_v61 = vsel %vm3233_vm14, %v3304_v55, 0.0  ;;  %v3426_v62 = vsel %vm3234_vm15, %v3309_v34, 0.0 }
 0x83f   :  { %v3456_v31 = vadd.f32 %v3455_v2, %v3425_v61 }
 0x841   :  { %v3319_v25 = vpop.permute.xlu1 %3318  ;;  %v3457_v3 = vadd.f32 %v3456_v31, %v3426_v62  ;;  %v3314_v14 = vpop.permute.xlu0 %3313 }
 0x842   :  { %4639 = shalt.err (!%p4636_p4)
}
 0x843   :  { %3848 = dma.vmem_to_hbm [thread:$0]  %s3846_s6, 32, %s7085_s9, [#allocation5]   ;;  %v3427_v52 = vsel %vm3235_vm0, %v3314_v14, 0.0  ;;  %v7283_v27 = vld [vmem:[#allocation19_spill] sm:$0xff]  ;;  %vm3237_vm3 = vcmp.eq.s32.totalorder %v6520_v43, %v6747_v18  ;;  %v7284_v58 = vld [vmem:[#allocation20_spill] sm:$0xff]  ;;  %vm3239_vm5 = vcmp.eq.s32.totalorder %v6520_v43, %v6749_v46  ;;  %v7285_v8 = vld [vmem:[#allocation21_spill] sm:$0xff]  ;;  %vm3241_vm7 = vcmp.eq.s32.totalorder %v6520_v43, %v6751_v35 }
 0x844   :  { %vm3236_vm1 = vcmp.eq.s32.totalorder %v6520_v43, %v7283_v27  ;;  %v3458_v9 = vadd.f32 %v3457_v3, %v3427_v52  ;;  %vm3238_vm4 = vcmp.eq.s32.totalorder %v6520_v43, %v7284_v58  ;;  %vm3240_vm6 = vcmp.eq.s32.totalorder %v6520_v43, %v7285_v8  ;;  %v7286_v19 = vld [vmem:[#allocation22_spill] sm:$0xff]  ;;  %v7287_v54 = vld [vmem:[#allocation23_spill] sm:$0xff]  ;;  %v7288_v40 = vld [vmem:[#allocation24_spill] sm:$0xff]  ;;  %s4676_s9 = smov [#allocation2]  }
 0x845   :  { %v3428_v56 = vsel %vm3236_vm1, %v3319_v25, 0.0  ;;  %v3329_v16 = vpop.permute.xlu1 %3328  ;;  %v3324_v44 = vpop.permute.xlu0 %3323  ;;  %vm3242_vm8 = vcmp.eq.s32.totalorder %v6520_v43, %v7286_v19  ;;  %vm3243_vm9 = vcmp.eq.s32.totalorder %v6520_v43, %v6753_v15  ;;  %vm3244_vm10 = vcmp.eq.s32.totalorder %v6520_v43, %v7287_v54  ;;  %v7289_v55 = vld [vmem:[#allocation25_spill] sm:$0xff]  ;;  %v7290_v3 = vld [vmem:[#allocation26_spill] sm:$0xff]  ;;  %s3835_s30 = sshll.u32 %s4676_s9, 4  ;;  %s3836_s30 = int_to_ptr.vmem [resolvable:$true] %s3835_s30 }
 0x846   :  { %v3459_v60 = vadd.f32 %v3458_v9, %v3428_v56  ;;  %v3429_v17 = vsel %vm3237_vm3, %v3324_v44, 0.0  ;;  %v3430_v38 = vsel %vm3238_vm4, %v3329_v16, 0.0  ;;  %vm3245_vm11 = vcmp.eq.s32.totalorder %v6520_v43, %v6755_v28  ;;  %v7291_v16 = vld [vmem:[#allocation27_spill] sm:$0xff]  ;;  %s4648_s10 = scalar_lea.vmem %s3836_s30, 32  ;;  %p4653_p6 = scmp.lt.s32.totalorder %s3836_s30, %s3836_s30 }
 0x847   :  { %vm3246_vm12 = vcmp.eq.s32.totalorder %v6520_v43, %v7288_v40  ;;  %vm3247_vm13 = vcmp.eq.s32.totalorder %v6520_v43, %v6757_v6  ;;  %vm3248_vm14 = vcmp.eq.s32.totalorder %v6520_v43, %v7289_v55  ;;  %vm3249_vm15 = vcmp.eq.s32.totalorder %v6520_v43, %v6759_v32  ;;  %v7293_v40 = vld [vmem:[#allocation10_spill] sm:$0xff]  ;;  %p4649_p5 = scmp.ne.s32.totalorder %s3836_s30, %s4648_s10  ;;  %p4654_p7 = scmp.lt.s32.totalorder %s4648_s10, %s4648_s10 }
 0x848   :  { %v3460_v41 = vadd.f32 %v3459_v60, %v3429_v17  ;;  %vm3250_vm0 = vcmp.eq.s32.totalorder %v6520_v43, %v7290_v3  ;;  %vm3251_vm1 = vcmp.eq.s32.totalorder %v6520_v43, %v6761_v57  ;;  %vm3252_vm3 = vcmp.eq.s32.totalorder %v6520_v43, %v7291_v16  ;;  %v7297_v3 = vld [vmem:[#allocation32_spill] sm:$0xff]  ;;  %v7299_v16 = vld [vmem:[#allocation45_spill] sm:$0xff] }
 0x849   :  { %v3339_v13 = vpop.permute.xlu1 %3338  ;;  %v3334_v49 = vpop.permute.xlu0 %3333  ;;  %vm3253_vm4 = vcmp.eq.s32.totalorder %v6520_v43, %v6763_v7  ;;  %p4655_p8 = por %p4654_p7, %p4653_p6 }
 0x84a   :  { %v3461_v1 = vadd.f32 %v3460_v41, %v3430_v38  ;;  %v3431_v30 = vsel %vm3239_vm5, %v3334_v49, 0.0  ;;  %v3432_v63 = vsel %vm3240_vm6, %v3339_v13, 0.0  ;;  %vm3254_vm5 = vcmp.eq.s32.totalorder %v6520_v43, %v6408_v59 }
 0x84b   :  { %vm3255_vm6 = vcmp.eq.s32.totalorder %v6520_v43, %v6765_v22  ;;  %p4656_p9 = pnand %p4655_p8, %p4649_p5 }
 0x84c   :  { %v6968_v24 = vadd.f32 %v3461_v1, %v3431_v30 }
 0x84d   :  { %v3349_v18 = vpop.permute.xlu1 %3348  ;;  %v3344_v29 = vpop.permute.xlu0 %3343 }
 0x84e   :  { %v3433_v10 = vsel %vm3241_vm7, %v3344_v29, 0.0  ;;  %v3434_v46 = vsel %vm3242_vm8, %v3349_v18, 0.0  ;;  %vm3605_vm7 = vcmp.eq.s32.totalorder %v6520_v43, %v6725_v45  ;;  %vm3604_vm8 = vcmp.eq.s32.totalorder %v6520_v43, %v6522_v33 }
 0x84f   :  { %v3469_v5 = vadd.f32 %v3433_v10, %v3432_v63 }
 0x851   :  { %v3359_v39 = vpop.permute.xlu1 %3358  ;;  %v3470_v0 = vadd.f32 %v3469_v5, %v3434_v46  ;;  %v3354_v26 = vpop.permute.xlu0 %3353 }
 0x852   :  { %v3435_v4 = vsel %vm3243_vm9, %v3354_v26, 0.0  ;;  %v3436_v35 = vsel %vm3244_vm10, %v3359_v39, 0.0  ;;  %vm3607_vm10 = vcmp.eq.s32.totalorder %v6520_v43, %v6727_v23 }
 0x853   :  { %v3471_v21 = vadd.f32 %v3470_v0, %v3435_v4  ;;  %v7292_v4 = vld [vmem:[#allocation8_spill] sm:$0xff] }
 0x854   :  { %vm3606_vm9 = vcmp.eq.s32.totalorder %v6520_v43, %v7292_v4  ;;  %v7306_v4 = vld [vmem:[#allocation40_spill] sm:$0xff] }
 0x855   :  { %v3369_v48 = vpop.permute.xlu1 %3368  ;;  %v3472_v12 = vadd.f32 %v3471_v21, %v3436_v35  ;;  %v3364_v11 = vpop.permute.xlu0 %3363 }
 0x856   :  { %v3437_v37 = vsel %vm3245_vm11, %v3364_v11, 0.0  ;;  %v3438_v15 = vsel %vm3246_vm12, %v3369_v48, 0.0  ;;  %vm3588_vm11 = vcmp.eq.s32.totalorder %v6520_v43, %v6707_v36  ;;  %vm3589_vm12 = vcmp.eq.s32.totalorder %v6520_v43, %v7293_v40  ;;  %v7294_v36 = vld [vmem:[#allocation44_spill] sm:$0xff] }
 0x857   :  { %v3473_v47 = vadd.f32 %v3472_v12, %v3437_v37 }
 0x859   :  { %v3379_v53 = vpop.permute.xlu1 %3378  ;;  %v3474_v20 = vadd.f32 %v3473_v47, %v3438_v15  ;;  %v3374_v34 = vpop.permute.xlu0 %3373 }
 0x85a   :  { %v3439_v2 = vsel %vm3247_vm13, %v3374_v34, 0.0  ;;  %v3440_v28 = vsel %vm3248_vm14, %v3379_v53, 0.0  ;;  %vm3590_vm13 = vcmp.eq.s32.totalorder %v6520_v43, %v6709_v51  ;;  %vm3608_vm14 = vcmp.eq.s32.totalorder %v6520_v43, %v6569_v50  ;;  %v7296_v50 = vld [vmem:[#allocation11_spill] sm:$0xff] }
 0x85b   :  { %v3475_v61 = vadd.f32 %v3474_v20, %v3439_v2 }
 0x85d   :  { %v3389_v42 = vpop.permute.xlu1 %3388  ;;  %v3476_v31 = vadd.f32 %v3475_v61, %v3440_v28  ;;  %v3384_v62 = vpop.permute.xlu0 %3383 }
 0x85e   :  { %v3441_v25 = vsel %vm3249_vm15, %v3384_v62, 0.0  ;;  %v3442_v6 = vsel %vm3250_vm0, %v3389_v42, 0.0  ;;  %vm3609_vm15 = vcmp.eq.s32.totalorder %v6520_v43, %v7294_v36 }
 0x85f   :  { %v3477_v14 = vadd.f32 %v3476_v31, %v3441_v25  ;;  %v7295_v31 = vld [vmem:[#allocation37_spill] sm:$0xff] }
 0x860   :  { %vm3591_vm0 = vcmp.eq.s32.totalorder %v6520_v43, %v7295_v31 }
 0x861   :  { %v3399_v52 = vpop.permute.xlu1 %3398  ;;  %v3478_v27 = vadd.f32 %v3477_v14, %v3442_v6  ;;  %v3394_v9 = vpop.permute.xlu0 %3393 }
 0x862   :  { %v3443_v56 = vsel %vm3251_vm1, %v3394_v9, 0.0  ;;  %v3444_v32 = vsel %vm3252_vm3, %v3399_v52, 0.0  ;;  %vm3592_vm1 = vcmp.eq.s32.totalorder %v6520_v43, %v7296_v50  ;;  %vm3610_vm3 = vcmp.eq.s32.totalorder %v6520_v43, %v7297_v3  ;;  %v7314_v50 = vld [vmem:[#allocation42_spill] sm:$0xff] }
 0x863   :  { %v3479_v60 = vadd.f32 %v3478_v27, %v3443_v56  ;;  %v7298_v56 = vld [vmem:[#allocation38_spill] sm:$0xff] }
 0x865   :  { %v3409_v44 = vpop.permute.xlu1 %3408  ;;  %v3480_v17 = vadd.f32 %v3479_v60, %v3444_v32  ;;  %v3404_v58 = vpop.permute.xlu0 %3403 }
 0x866   :  { %v3445_v41 = vsel %vm3253_vm4, %v3404_v58, 0.0  ;;  %v3446_v57 = vsel %vm3254_vm5, %v3409_v44, 0.0  ;;  %vm3593_vm4 = vcmp.eq.s32.totalorder %v6520_v43, %v7298_v56  ;;  %vm3611_vm5 = vcmp.eq.s32.totalorder %v6520_v43, %v7299_v16  ;;  %v7301_v58 = vld [vmem:[#allocation33_spill] sm:$0xff] }
 0x867   :  { %v3481_v38 = vadd.f32 %v3480_v17, %v3445_v41  ;;  %v7300_v17 = vld [vmem:[#allocation28_spill] sm:$0xff]  ;;  %v7315_v56 = vld [vmem:[#allocation49_spill] sm:$0xff] }
 0x869   :  { %v3482_v13 = vadd.f32 %v3481_v38, %v3446_v57  ;;  %v3414_v1 = vpop.permute.xlu0 %3413 }
 0x86a   :  { %v3447_v49 = vsel %vm3255_vm6, %v3414_v1, 0.0  ;;  %v3626_v30 = vpop.permute.xlu1 %3625  ;;  %vm3594_vm6 = vcmp.eq.s32.totalorder %v6520_v43, %v7300_v17 }
 0x86b   :  { %v7002_v8 = vadd.f32 %v3482_v13, %v3447_v49  ;;  %v3749_v15 = vsel %vm3589_vm12, %v3626_v30, 0.0  ;;  %v7302_v30 = vld [vmem:[#allocation39_spill] sm:$0xff]  ;;  %vm3597_vm12 = vcmp.eq.s32.totalorder %v6520_v43, %v7306_v4 }
 0x86d   :  { %v3484_v3 = vrot.slane %v7002_v8, 4 }
 0x86e   :  { %v3634_v18 = vpop.permute.xlu1 %3633  ;;  %v3622_v7 = vpop.permute.xlu0 %3621 }
 0x86f   :  { %v3748_v37 = vsel %vm3588_vm11, %v3622_v7, 0.0  ;;  %v3751_v62 = vsel %vm3591_vm0, %v3634_v18, 0.0  ;;  %v7303_v18 = vld [vmem:[#allocation46_spill] sm:$0xff] }
 0x870   :  { %v3780_v34 = vadd.f32 %v3749_v15, %v3748_v37 }
 0x872   :  { %v3686_v29 = vpop.permute.xlu1 %3685  ;;  %v3630_v63 = vpop.permute.xlu0 %3629 }
 0x873   :  { %v3764_v0 = vsel %vm3604_vm8, %v3686_v29, 0.0  ;;  %v3750_v53 = vsel %vm3590_vm13, %v3630_v63, 0.0  ;;  %vm3595_vm8 = vcmp.eq.s32.totalorder %v6520_v43, %v7302_v30 }
 0x874   :  { %v3781_v55 = vadd.f32 %v3780_v34, %v3750_v53  ;;  %v7310_v53 = vld [vmem:[#allocation41_spill] sm:$0xff] }
 0x875   :  { %vm3599_vm0 = vcmp.eq.s32.totalorder %v6520_v43, %v7310_v53 }
 0x876   :  { %v3694_v10 = vpop.permute.xlu1 %3693  ;;  %v3638_v19 = vpop.permute.xlu0 %3637  ;;  %v3782_v25 = vadd.f32 %v3781_v55, %v3751_v62 }
 0x877   :  { %v3766_v35 = vsel %vm3606_vm9, %v3694_v10, 0.0  ;;  %v3752_v52 = vsel %vm3592_vm1, %v3638_v19, 0.0  ;;  %vm3613_vm9 = vcmp.eq.s32.totalorder %v6520_v43, %v7303_v18  ;;  %v7304_v19 = vld [vmem:[#allocation12_spill] sm:$0xff] }
 0x878   :  { %v3783_v44 = vadd.f32 %v3782_v25, %v3752_v52  ;;  %v3463_v25 = vrot.slane %v6968_v24, 4 }
 0x87a   :  { %v3702_v5 = vpop.permute.xlu1 %3701  ;;  %v3690_v46 = vpop.permute.xlu0 %3689 }
 0x87b   :  { %v3765_v59 = vsel %vm3605_vm7, %v3690_v46, 0.0  ;;  %v3768_v20 = vsel %vm3608_vm14, %v3702_v5, 0.0  ;;  %vm3612_vm7 = vcmp.eq.s32.totalorder %v6520_v43, %v7301_v58  ;;  %v7305_v5 = vld [vmem:[#allocation34_spill] sm:$0xff]  ;;  %v3464_v58 = vadd.f32 %v3463_v25, %v6968_v24 }
 0x87c   :  { %v3801_v26 = vadd.f32 %v3765_v59, %v3764_v0  ;;  %vm3614_vm11 = vcmp.eq.s32.totalorder %v6520_v43, %v7305_v5 }
 0x87e   :  { %v3706_v22 = vpop.permute.xlu1 %3705  ;;  %v3698_v39 = vpop.permute.xlu0 %3697  ;;  %v3802_v48 = vadd.f32 %v3801_v26, %v3766_v35 }
 0x87f   :  { %v3767_v12 = vsel %vm3607_vm10, %v3698_v39, 0.0  ;;  %v3769_v42 = vsel %vm3609_vm15, %v3706_v22, 0.0  ;;  %vm3596_vm10 = vcmp.eq.s32.totalorder %v6520_v43, %v7304_v19 }
 0x880   :  { %v3803_v33 = vadd.f32 %v3802_v48, %v3767_v12 }
 0x882   :  { %v3710_v54 = vpop.permute.xlu1 %3709  ;;  %v3642_v21 = vpop.permute.xlu0 %3641  ;;  %v3804_v2 = vadd.f32 %v3803_v33, %v3768_v20  ;;  %v7311_v20 = vld [vmem:[#allocation48_spill] sm:$0xff] }
 0x883   :  { %v3770_v27 = vsel %vm3610_vm3, %v3710_v54, 0.0  ;;  %v3753_v60 = vsel %vm3593_vm4, %v3642_v21, 0.0  ;;  %v7307_v54 = vld [vmem:[#allocation47_spill] sm:$0xff]  ;;  %vm3617_vm1 = vcmp.eq.s32.totalorder %v6520_v43, %v7311_v20 }
 0x884   :  { %v3805_v51 = vadd.f32 %v3804_v2, %v3769_v42  ;;  %v3784_v1 = vadd.f32 %v3783_v44, %v3753_v60  ;;  %vm3615_vm13 = vcmp.eq.s32.totalorder %v6520_v43, %v7307_v54  ;;  %v7316_v60 = vld [vmem:[#allocation31_spill] sm:$0xff] }
 0x886   :  { %v3714_v45 = vpop.permute.xlu1 %3713  ;;  %v3646_v11 = vpop.permute.xlu0 %3645  ;;  %v3806_v9 = vadd.f32 %v3805_v51, %v3770_v27 }
 0x887   :  { %v3771_v32 = vsel %vm3611_vm5, %v3714_v45, 0.0  ;;  %v3754_v57 = vsel %vm3594_vm6, %v3646_v11, 0.0  ;;  %v7308_v45 = vld [vmem:[#allocation29_spill] sm:$0xff]  ;;  %v7309_v11 = vld [vmem:[#allocation35_spill] sm:$0xff]  ;;  %vm3601_vm5 = vcmp.eq.s32.totalorder %v6520_v43, %v7314_v50  ;;  %vm3619_vm6 = vcmp.eq.s32.totalorder %v6520_v43, %v7315_v56 }
 0x888   :  { %v3807_v49 = vadd.f32 %v3806_v9, %v3771_v32  ;;  %v3785_v63 = vadd.f32 %v3784_v1, %v3754_v57  ;;  %vm3598_vm14 = vcmp.eq.s32.totalorder %v6520_v43, %v7308_v45  ;;  %vm3616_vm15 = vcmp.eq.s32.totalorder %v6520_v43, %v7309_v11 }
 0x88a   :  { %v3718_v47 = vpop.permute.xlu1 %3717  ;;  %v3650_v23 = vpop.permute.xlu0 %3649 }
 0x88b   :  { %v3772_v13 = vsel %vm3612_vm7, %v3718_v47, 0.0  ;;  %v3755_v7 = vsel %vm3595_vm8, %v3650_v23, 0.0  ;;  %vm3602_vm7 = vcmp.eq.s32.totalorder %v6520_v43, %v7316_v60 }
 0x88c   :  { %v3808_v10 = vadd.f32 %v3807_v49, %v3772_v13  ;;  %v3786_v0 = vadd.f32 %v3785_v63, %v3755_v7  ;;  %v7317_v49 = vld [vmem:[#allocation43_spill] sm:$0xff]  ;;  %v3465_v7 = vrot.slane %v3464_v58, 2 }
 0x88d   :  { %vm3603_vm8 = vcmp.eq.s32.totalorder %v6520_v43, %v7317_v49 }
 0x88e   :  { %v3722_v61 = vpop.permute.xlu1 %3721  ;;  %v3654_v28 = vpop.permute.xlu0 %3653 }
 0x88f   :  { %v3773_v29 = vsel %vm3613_vm9, %v3722_v61, 0.0  ;;  %v3756_v22 = vsel %vm3596_vm10, %v3654_v28, 0.0  ;;  %v7312_v61 = vld [vmem:[#allocation30_spill] sm:$0xff]  ;;  %v7313_v28 = vld [vmem:[#allocation36_spill] sm:$0xff] }
 0x890   :  { %v3809_v26 = vadd.f32 %v3808_v10, %v3773_v29  ;;  %v3787_v48 = vadd.f32 %v3786_v0, %v3756_v22  ;;  %vm3600_vm3 = vcmp.eq.s32.totalorder %v6520_v43, %v7312_v61  ;;  %vm3618_vm4 = vcmp.eq.s32.totalorder %v6520_v43, %v7313_v28 }
 0x892   :  { %v3726_v14 = vpop.permute.xlu1 %3725  ;;  %v3658_v6 = vpop.permute.xlu0 %3657 }
 0x893   :  { %v3774_v39 = vsel %vm3614_vm11, %v3726_v14, 0.0  ;;  %v3757_v21 = vsel %vm3597_vm12, %v3658_v6, 0.0 }
 0x894   :  { %v3810_v12 = vadd.f32 %v3809_v26, %v3774_v39  ;;  %v3788_v23 = vadd.f32 %v3787_v48, %v3757_v21 }
 0x896   :  { %v3730_v41 = vpop.permute.xlu1 %3729  ;;  %v3662_v38 = vpop.permute.xlu0 %3661 }
 0x897   :  { %v3775_v35 = vsel %vm3615_vm13, %v3730_v41, 0.0  ;;  %v3758_v40 = vsel %vm3598_vm14, %v3662_v38, 0.0  ;;  %v3485_v41 = vadd.f32 %v3484_v3, %v7002_v8 }
 0x898   :  { %v3811_v15 = vadd.f32 %v3810_v12, %v3775_v35  ;;  %v3789_v55 = vadd.f32 %v3788_v23, %v3758_v40 }
 0x899   :  { %v3486_v29 = vrot.slane %v3485_v41, 2 }
 0x89a   :  { %v3734_v46 = vpop.permute.xlu1 %3733  ;;  %v3666_v59 = vpop.permute.xlu0 %3665 }
 0x89b   :  { %v3776_v47 = vsel %vm3616_vm15, %v3734_v46, 0.0  ;;  %v3759_v34 = vsel %vm3599_vm0, %v3666_v59, 0.0  ;;  %v3466_v46 = vadd.f32 %v3465_v7, %v3464_v58  ;;  %v3487_v59 = vadd.f32 %v3486_v29, %v3485_v41 }
 0x89c   :  { %v3812_v36 = vadd.f32 %v3811_v15, %v3776_v47  ;;  %v3790_v14 = vadd.f32 %v3789_v55, %v3759_v34 }
 0x89d   :  { %v3467_v0 = vrot.slane %v3466_v46, 1  ;;  %v3488_v26 = vrot.slane %v3487_v59, 1 }
 0x89e   :  { %v3738_v33 = vpop.permute.xlu1 %3737  ;;  %v3670_v37 = vpop.permute.xlu0 %3669 }
 0x89f   :  { %v3777_v2 = vsel %vm3617_vm1, %v3738_v33, 0.0  ;;  %v3760_v51 = vsel %vm3600_vm3, %v3670_v37, 0.0  ;;  %v3468_v43 = vadd.f32 %v3467_v0, %v3466_v46  ;;  %v3489_v35 = vadd.f32 %v3488_v26, %v3487_v59 }
 0x8a0   :  { %v3813_v6 = vadd.f32 %v3812_v36, %v3777_v2  ;;  %v3791_v27 = vadd.f32 %v3790_v14, %v3760_v51 }
 0x8a2   :  { %v3742_v42 = vpop.permute.xlu1 %3741  ;;  %v3674_v31 = vpop.permute.xlu0 %3673 }
 0x8a3   :  { %v3778_v62 = vsel %vm3618_vm4, %v3742_v42, 0.0  ;;  %v3761_v52 = vsel %vm3601_vm5, %v3674_v31, 0.0 }
 0x8a4   :  { %v3814_v9 = vadd.f32 %v3813_v6, %v3778_v62  ;;  %v3792_v38 = vadd.f32 %v3791_v27, %v3761_v52 }
 0x8a6   :  { %v3746_v16 = vpop.permute.xlu1 %3745  ;;  %v3678_v32 = vpop.permute.xlu0 %3677 }
 0x8a7   :  { %v3779_v44 = vsel %vm3619_vm6, %v3746_v16, 0.0  ;;  %v3762_v17 = vsel %vm3602_vm7, %v3678_v32, 0.0 }
 0x8a8   :  { %v3815_v57 = vadd.f32 %v3814_v9, %v3779_v44  ;;  %v3793_v1 = vadd.f32 %v3792_v38, %v3762_v17 }
 0x8aa   :  { %v3816_v13 = vrot.slane %v3815_v57, 4  ;;  %v3682_v30 = vpop.permute.xlu0 %3681 }
 0x8ab   :  { %v3763_v18 = vsel %vm3603_vm8, %v3682_v30, 0.0 }
 0x8ac   :  { %v3817_v63 = vadd.f32 %v3816_v13, %v3815_v57  ;;  %v3794_v10 = vadd.f32 %v3793_v1, %v3763_v18 }
 0x8ae   :  { %v3818_v19 = vrot.slane %v3817_v63, 2  ;;  %v3795_v5 = vrot.slane %v3794_v10, 4 }
 0x8b0   :  { %v3819_v24 = vadd.f32 %v3818_v19, %v3817_v63  ;;  %v3796_v22 = vadd.f32 %v3795_v5, %v3794_v10 }
 0x8b2   :  { %v3820_v8 = vrot.slane %v3819_v24, 1  ;;  %v3797_v39 = vrot.slane %v3796_v22, 2 }
 0x8b4   :  { %v3798_v4 = vadd.f32 %v3797_v39, %v3796_v22  ;;  %v3821_v21 = vadd.f32 %v3820_v8, %v3819_v24 }
 0x8b6   :  { %v3799_v54 = vrot.slane %v3798_v4, 1  ;;  %v3823_v45 = vadd.f32 %v3821_v21, %v3489_v35 }
 0x8b8   :  { %v3800_v48 = vadd.f32 %v3799_v54, %v3798_v4 }
 0x8ba   :  { %v3822_v12 = vadd.f32 %v3800_v48, %v3468_v43 }
 0x8bc   :  { %v3826_v11 = vsel %vm2849_vm2, %v3823_v45, %v3822_v12 }
 0x8bd   :  { %3828 = vst [vmem:[#allocation2] sm:$0x3] %v3826_v11 }
 0x8be   :  { %4659 = shalt.err (!%p4656_p9)
}
 0x8bf   :  { %3838 = dma.vmem_to_hbm [thread:$0]  %s3836_s30, 32, %s7084_s8, [#allocation3]  }
 0x8c0   :  { %4668 = dma.done.wait [#allocation3], 32  }
 0x8c1   :  { %4669 = vsyncadd [#allocation3], 4294967264 }
 0x8c2   :  { %4670 = dma.done.wait [#allocation5], 32  }
 0x8c3   :  { %4671 = vsyncadd [#allocation5], 4294967264 }
 0x8c4   :  { %3855 = vsyncpa [#allocation3], 1 }
 0x8c5   :  { %3856 = vsyncpa [#allocation5], 1 }

</bundles_post_ra>
